<compile_context>
chip_gen: v5e
topology: v5e:2x2
jax: 0.10.0
libtpu: 0.0.40
codegen_flags: <defaults>
</compile_context>

<pallas_src>
import jax
import jax.numpy as jnp
from jax.experimental import pallas as pl
from jax.experimental.pallas import tpu as pltpu


_SQRT_2_OVER_PI = 0.7978845608028654


def _gelu_tanh(x):
    # nn.GELU() is exact-erf; the tanh form keeps the transcendental on the EUP
    # instead of a ~12-op VALU polynomial.  |delta| <~ 1e-3 pre layer-scale.
    return 0.5 * x * (1.0 + jnp.tanh(_SQRT_2_OVER_PI * (x + 0.044715 * (x * x * x))))


def _shift_pixels(x, delta, hw):
    """y[..., p] = x[..., (p + delta) % hw] for a static integer delta (XLU roll)."""
    s = (-delta) % hw
    if s == 0:
        return x
    return pltpu.roll(x, s, axis=x.ndim - 1)


@jax.jit
def gcc_cvx_lg_block(x_nchw, params):
    """Forward pass of gcc_cvx_lg_Block on an NCHW tensor (drop_path = 0)."""
    eps = 1e-6
    B, C, H, W = x_nchw.shape
    assert C % 4 == 0
    Cg, Cl = C // 4, C // 2
    HW = H * W
    C4 = 4 * C
    K = params["gH_w"].shape[1]
    # instance_kernel_method=None in the reference => feature size == meta kernel size.
    assert H == K and W == K
    assert Cl % 8 == 0 and HW % 128 == 0, "layout needs dim % 16 == 0 and H*W % 128 == 0"

    f32 = jnp.float32
    x = x_nchw.reshape(B, C, HW)                      # NCHW, pixels flattened (free)

    # --------------- trace-time parameter preprocessing (tiny) ---------------
    # gcc positional encodings broadcast onto the flattened pixel axis.
    pe_h = jnp.broadcast_to(params["gH_pe"][:, :, None], (Cg, H, W)).reshape(Cg, HW)
    pe_w = jnp.broadcast_to(params["gW_pe"][:, None, :], (Cg, H, W)).reshape(Cg, HW)
    pe_g = jnp.concatenate([pe_h, pe_w], axis=0).astype(f32)              # (Cl, HW)
    # Per-tap per-channel weights for the combined (gcc-H | gcc-W) half tile;
    # each branch's taps are zero on the other branch's channels.
    zg = jnp.zeros((K, Cg), f32)
    w_gh = jnp.concatenate([params["gH_w"].T, zg], axis=1)[:, :, None]    # (K, Cl, 1)
    w_gw = jnp.concatenate([zg, params["gW_w"].T], axis=1)[:, :, None]    # (K, Cl, 1)
    b_g = jnp.concatenate([params["gH_b"], params["gW_b"]])[:, None]      # (Cl, 1)
    # 7x7 depthwise taps, (di, dj) row-major == torch Conv2d weight[:, 0] layout.
    w_dw = jnp.transpose(params["dw_w"], (1, 2, 0)).reshape(49, Cl)[:, :, None]
    b_dw = params["dw_b"][:, None]                                        # (Cl, 1)
    # Fold the LayerNorm affine into pwconv1 and gamma into pwconv2; transpose so
    # both in-kernel dots directly produce (channels, pixels) tiles.
    w1f = params["ln_w"][:, None] * params["w1"]                          # (C, 4C)
    b1f = params["ln_b"] @ params["w1"] + params["b1"]                    # (4C,)
    w2f = params["w2"] * params["gamma"][None, :]                         # (4C, C)
    b2f = params["b2"] * params["gamma"]                                  # (C,)
    w1t, b1c = w1f.T, b1f[:, None]                                        # (4C, C), (4C, 1)
    w2t, b2c = w2f.T, b2f[:, None]                                        # (C, 4C), (C, 1)

    def kernel(xg_ref, xl_ref, pe_ref, wgh_ref, wgw_ref, bg_ref,
               wdw_ref, bdw_ref, w1t_ref, b1_ref, w2t_ref, b2_ref, o_ref):
        xg = xg_ref[0].astype(f32)                    # (Cl, HW) gcc-H | gcc-W channels
        xl = xl_ref[0].astype(f32)                    # (Cl, HW) local dwconv channels

        lane = jax.lax.broadcasted_iota(jnp.int32, (Cl, HW), 1)
        if (W & (W - 1)) == 0:                        # static: W is a power of two
            wi = lane & (W - 1)                       # column index inside a row
            hi = lane >> (W.bit_length() - 1)         # row index
        else:
            wi = lane % W
            hi = lane // W

        # ---- global branches: circular depthwise convs along H and along W ----
        xgp = xg + pe_ref[...]
        acc_g = jnp.zeros((Cl, HW), f32)
        for k in range(K):
            # 'H' type: row (h + k) % H  ==  flat pixel (p + k*W) % (H*W).
            acc_g = acc_g + wgh_ref[k] * _shift_pixels(xgp, k * W, HW)
            # 'W' type: column (w + k) % W within the same row.
            if k == 0:
                tap_w = xgp
            else:
                tap_w = jnp.where(wi < W - k,
                                  _shift_pixels(xgp, k, HW),
                                  _shift_pixels(xgp, k - W, HW))
            acc_g = acc_g + wgw_ref[k] * tap_w
        yg = acc_g + bg_ref[...]

        # ---- local branch: depthwise 7x7, zero padding 3 ----
        acc_l = jnp.zeros((Cl, HW), f32)
        t = 0
        for di in range(-3, 4):
            for dj in range(-3, 4):
                valid = ((hi >= -di) & (hi < H - di) &
                         (wi >= -dj) & (wi < W - dj))
                tap = jnp.where(valid, _shift_pixels(xl, di * W + dj, HW), 0.0)
                acc_l = acc_l + wdw_ref[t] * tap
                t += 1
        yl = acc_l + bdw_ref[...]

        # ---- LayerNorm (over channels) -> pwconv1 -> GELU -> pwconv2 -> +res ----
        xmix = jnp.concatenate([yg, yl], axis=0)      # (C, HW), torch channel order
        mean = jnp.sum(xmix, axis=0, keepdims=True) * (1.0 / C)
        xc = xmix - mean
        var = jnp.sum(xc * xc, axis=0, keepdims=True) * (1.0 / C)
        xn = xc * jax.lax.rsqrt(var + eps)            # LN affine folded into w1t/b1
        h = jnp.dot(w1t_ref[...], xn, preferred_element_type=f32) + b1_ref[...]
        h = _gelu_tanh(h)
        y = jnp.dot(w2t_ref[...], h, preferred_element_type=f32) + b2_ref[...]
        res = jnp.concatenate([xg, xl], axis=0)       # original channels (residual)
        o_ref[0] = (res + y).astype(o_ref.dtype)

    # VMEM: clamp the request to the device capacity (v7x only has 64 MiB).
    try:
        vmem_cap = pltpu.get_tpu_info().vmem_capacity_bytes
    except Exception:
        vmem_cap = 64 * 2 ** 20
    vmem_bytes = int(min(int(0.85 * vmem_cap), 32 * 2 ** 20))

    # TODO(synk): for dim >= ~512 tile the 4*dim hidden axis with an accumulator and
    # single-buffer the constant-index weight blocks to stay inside v7x's 64 MiB.
    # TODO(synk): for B == 1 add a second 'parallel' grid axis so both v7x
    # TensorCores get work (requires splitting the channel groups or a halo scheme).
    out = pl.pallas_call(
        kernel,
        out_shape=jax.ShapeDtypeStruct((B, C, HW), x_nchw.dtype),
        grid=(B,),
        in_specs=[
            pl.BlockSpec((1, Cl, HW), lambda b: (b, 0, 0)),   # x, channels [0, C/2)
            pl.BlockSpec((1, Cl, HW), lambda b: (b, 1, 0)),   # x, channels [C/2, C)
            pl.BlockSpec((Cl, HW), lambda b: (0, 0)),         # gcc pe (flattened)
            pl.BlockSpec((K, Cl, 1), lambda b: (0, 0, 0)),    # gcc 'H' taps
            pl.BlockSpec((K, Cl, 1), lambda b: (0, 0, 0)),    # gcc 'W' taps
            pl.BlockSpec((Cl, 1), lambda b: (0, 0)),          # gcc bias
            pl.BlockSpec((49, Cl, 1), lambda b: (0, 0, 0)),   # dw 7x7 taps
            pl.BlockSpec((Cl, 1), lambda b: (0, 0)),          # dw bias
            pl.BlockSpec((C4, C), lambda b: (0, 0)),          # pwconv1 (LN folded)
            pl.BlockSpec((C4, 1), lambda b: (0, 0)),
            pl.BlockSpec((C, C4), lambda b: (0, 0)),          # pwconv2 (gamma folded)
            pl.BlockSpec((C, 1), lambda b: (0, 0)),
        ],
        out_specs=pl.BlockSpec((1, C, HW), lambda b: (b, 0, 0)),
        compiler_params=pltpu.CompilerParams(
            dimension_semantics=("parallel",),
            vmem_limit_bytes=vmem_bytes),
    )(x, x, pe_g, w_gh, w_gw, b_g, w_dw, b_dw, w1t, b1c, w2t, b2c)

    return out.reshape(B, C, H, W)


# ---------------- parameters (deterministic, synthetic) ----------------
def init_params(key, dim, meta_kernel_size=16):
    Cl, Cg = dim // 2, dim // 4
    K = meta_kernel_size
    ks = jax.random.split(key, 10)
    p = {}
    p["dw_w"] = 0.02 * jax.random.normal(ks[0], (Cl, 7, 7), jnp.float32)  # torch (Cl,1,7,7)
    p["dw_b"] = 0.02 * jax.random.normal(ks[1], (Cl,), jnp.float32)
    p["gH_w"] = 0.02 * jax.random.normal(ks[2], (Cg, K), jnp.float32)     # torch (Cg,1,K,1)
    p["gH_b"] = jax.random.normal(ks[3], (Cg,), jnp.float32)
    p["gH_pe"] = jax.random.normal(ks[4], (Cg, K), jnp.float32)           # torch (1,Cg,K,1)
    p["gW_w"] = 0.02 * jax.random.normal(ks[5], (Cg, K), jnp.float32)     # torch (Cg,1,1,K)
    p["gW_b"] = jax.random.normal(ks[6], (Cg,), jnp.float32)
    p["gW_pe"] = jax.random.normal(ks[7], (Cg, K), jnp.float32)           # torch (1,Cg,1,K)
    p["ln_w"] = jnp.ones((dim,), jnp.float32)
    p["ln_b"] = jnp.zeros((dim,), jnp.float32)
    p["w1"] = 0.02 * jax.random.normal(ks[8], (dim, 4 * dim), jnp.float32)
    p["b1"] = jnp.zeros((4 * dim,), jnp.float32)
    p["w2"] = 0.02 * jax.random.normal(ks[9], (4 * dim, dim), jnp.float32)
    p["b2"] = jnp.zeros((dim,), jnp.float32)
    p["gamma"] = 1e-6 * jnp.ones((dim,), jnp.float32)   # layer_scale_init_value
    return p


# -------- independent pure-JAX reference (mirrors the PyTorch forward) --------
def reference_block(x, p, eps=1e-6):
    B, C, H, W = x.shape
    Cg, Cl = C // 4, C // 2
    hp = jax.lax.Precision.HIGHEST
    dn = ("NCHW", "OIHW", "NCHW")
    x1, x2, xl = x[:, :Cg], x[:, Cg:Cl], x[:, Cl:]
    yl = jax.lax.conv_general_dilated(xl, p["dw_w"][:, None], (1, 1), ((3, 3), (3, 3)),
                                      dimension_numbers=dn, feature_group_count=Cl,
                                      precision=hp) + p["dw_b"][None, :, None, None]
    xh = x1 + p["gH_pe"][None, :, :, None]
    xh = jnp.concatenate([xh, xh[:, :, :-1, :]], axis=2)
    y1 = jax.lax.conv_general_dilated(xh, p["gH_w"][:, None, :, None], (1, 1), ((0, 0), (0, 0)),
                                      dimension_numbers=dn, feature_group_count=Cg,
                                      precision=hp) + p["gH_b"][None, :, None, None]
    xw = x2 + p["gW_pe"][None, :, None, :]
    xw = jnp.concatenate([xw, xw[:, :, :, :-1]], axis=3)
    y2 = jax.lax.conv_general_dilated(xw, p["gW_w"][:, None, None, :], (1, 1), ((0, 0), (0, 0)),
                                      dimension_numbers=dn, feature_group_count=Cg,
                                      precision=hp) + p["gW_b"][None, :, None, None]
    xm = jnp.transpose(jnp.concatenate([y1, y2, yl], axis=1), (0, 2, 3, 1))   # NHWC
    mu = jnp.mean(xm, -1, keepdims=True)
    var = jnp.mean((xm - mu) ** 2, -1, keepdims=True)
    xn = (xm - mu) * jax.lax.rsqrt(var + eps) * p["ln_w"] + p["ln_b"]
    h = _gelu_tanh(jnp.dot(xn, p["w1"], precision=hp) + p["b1"])
    y = (jnp.dot(h, p["w2"], precision=hp) + p["b2"]) * p["gamma"]
    return x + jnp.transpose(y, (0, 3, 1, 2))


if __name__ == "__main__":
    # dim must be divisible by 16 for the aligned channel-half layout; spatial
    # size must equal meta_kernel_size (=16) because instance_kernel_method=None.
    B, dim, H, W = 2, 16, 16, 16
    key = jax.random.PRNGKey(0)
    kx, kp = jax.random.split(key)
    x = jax.random.normal(kx, (B, dim, H, W), jnp.float32)
    params = init_params(kp, dim, meta_kernel_size=H)

    out = gcc_cvx_lg_block(x, params)
    out = jax.block_until_ready(out)
    assert out.shape == (B, dim, H, W) and out.dtype == jnp.float32

    # Sanity check vs. an independent pure-JAX reference.  gamma = 1e-6, so the
    # meaningful comparison is the block delta (out - x), not the residual.
    ref = jax.jit(reference_block)(x, params)
    dk, dr = out - x, ref - x
    rel = float(jnp.max(jnp.abs(dk - dr)) / jnp.maximum(jnp.max(jnp.abs(dr)), 1e-30))
    assert rel < 2e-2, f"kernel/reference mismatch: rel={rel:.3e}"
    print("KERNEL_OK")
</pallas_src>

<mosaic_0001>
module attributes {stable_mosaic.version = 11 : i64} {
  func.func @kernel(%arg0: i32, %arg1: memref<1x8x256xf32, #tpu.memory_space<vmem>>, %arg2: memref<1x8x256xf32, #tpu.memory_space<vmem>>, %arg3: memref<8x256xf32, #tpu.memory_space<vmem>>, %arg4: memref<16x8x1xf32, #tpu.memory_space<vmem>>, %arg5: memref<16x8x1xf32, #tpu.memory_space<vmem>>, %arg6: memref<8x1xf32, #tpu.memory_space<vmem>>, %arg7: memref<49x8x1xf32, #tpu.memory_space<vmem>>, %arg8: memref<8x1xf32, #tpu.memory_space<vmem>>, %arg9: memref<64x16xf32, #tpu.memory_space<vmem>>, %arg10: memref<64x1xf32, #tpu.memory_space<vmem>>, %arg11: memref<16x64xf32, #tpu.memory_space<vmem>>, %arg12: memref<16x1xf32, #tpu.memory_space<vmem>>, %arg13: memref<1x16x256xf32, #tpu.memory_space<vmem>>) attributes {dimension_semantics = [#tpu.dimension_semantics<parallel>], iteration_bounds = array<i64: 2>, scalar_prefetch = 0 : i64, scratch_operands = 0 : i64, tpu.core_type = #tpu.core_type<tc>, window_params = [{transform_indices = @transform_0, window_bounds = array<i64: 1, 8, 256>}, {transform_indices = @transform_1, window_bounds = array<i64: 1, 8, 256>}, {pipeline_mode = #tpu.pipeline_mode<synchronous>, transform_indices = @transform_2, window_bounds = array<i64: 8, 256>}, {pipeline_mode = #tpu.pipeline_mode<synchronous>, transform_indices = @transform_3, window_bounds = array<i64: 16, 8, 1>}, {pipeline_mode = #tpu.pipeline_mode<synchronous>, transform_indices = @transform_4, window_bounds = array<i64: 16, 8, 1>}, {pipeline_mode = #tpu.pipeline_mode<synchronous>, transform_indices = @transform_5, window_bounds = array<i64: 8, 1>}, {pipeline_mode = #tpu.pipeline_mode<synchronous>, transform_indices = @transform_6, window_bounds = array<i64: 49, 8, 1>}, {pipeline_mode = #tpu.pipeline_mode<synchronous>, transform_indices = @transform_7, window_bounds = array<i64: 8, 1>}, {pipeline_mode = #tpu.pipeline_mode<synchronous>, transform_indices = @transform_8, window_bounds = array<i64: 64, 16>}, {pipeline_mode = #tpu.pipeline_mode<synchronous>, transform_indices = @transform_9, window_bounds = array<i64: 64, 1>}, {pipeline_mode = #tpu.pipeline_mode<synchronous>, transform_indices = @transform_10, window_bounds = array<i64: 16, 64>}, {pipeline_mode = #tpu.pipeline_mode<synchronous>, transform_indices = @transform_11, window_bounds = array<i64: 16, 1>}, {transform_indices = @transform_12, window_bounds = array<i64: 1, 16, 256>}]} {
    %c0 = arith.constant 0 : index
    %c0_0 = arith.constant 0 : index
    %c0_1 = arith.constant 0 : index
    %0 = vector.load %arg1[%c0, %c0_0, %c0_1] : memref<1x8x256xf32, #tpu.memory_space<vmem>>, vector<1x8x256xf32>
    %1 = vector.shape_cast %0 : vector<1x8x256xf32> to vector<8x256xf32>
    %c0_2 = arith.constant 0 : index
    %c0_3 = arith.constant 0 : index
    %c0_4 = arith.constant 0 : index
    %2 = vector.load %arg2[%c0_2, %c0_3, %c0_4] : memref<1x8x256xf32, #tpu.memory_space<vmem>>, vector<1x8x256xf32>
    %3 = vector.shape_cast %2 : vector<1x8x256xf32> to vector<8x256xf32>
    %4 = tpu.iota {dimensions = array<i32: 1>} : vector<8x256xi32>
    %c15_i32 = arith.constant 15 : i32
    %5 = vector.broadcast %c15_i32 : i32 to vector<8x256xi32>
    %6 = arith.andi %4, %5 : vector<8x256xi32>
    %c4_i32 = arith.constant 4 : i32
    %7 = vector.broadcast %c4_i32 : i32 to vector<8x256xi32>
    %8 = arith.shrsi %4, %7 : vector<8x256xi32>
    %c0_5 = arith.constant 0 : index
    %c0_6 = arith.constant 0 : index
    %9 = vector.load %arg3[%c0_5, %c0_6] : memref<8x256xf32, #tpu.memory_space<vmem>>, vector<8x256xf32>
    %10 = arith.addf %1, %9 : vector<8x256xf32>
    %cst = arith.constant 0.000000e+00 : f32
    %11 = vector.broadcast %cst : f32 to vector<8x256xf32>
    %c0_7 = arith.constant 0 : index
    %c0_8 = arith.constant 0 : index
    %c0_9 = arith.constant 0 : index
    %12 = vector.load %arg4[%c0_7, %c0_8, %c0_9] : memref<16x8x1xf32, #tpu.memory_space<vmem>>, vector<1x8x1xf32>
    %13 = vector.shape_cast %12 : vector<1x8x1xf32> to vector<8x1xf32>
    %14 = vector.broadcast %13 : vector<8x1xf32> to vector<8x256xf32>
    %15 = arith.mulf %14, %10 : vector<8x256xf32>
    %16 = arith.addf %11, %15 : vector<8x256xf32>
    %c0_10 = arith.constant 0 : index
    %c0_11 = arith.constant 0 : index
    %c0_12 = arith.constant 0 : index
    %17 = vector.load %arg5[%c0_10, %c0_11, %c0_12] : memref<16x8x1xf32, #tpu.memory_space<vmem>>, vector<1x8x1xf32>
    %18 = vector.shape_cast %17 : vector<1x8x1xf32> to vector<8x1xf32>
    %19 = vector.broadcast %18 : vector<8x1xf32> to vector<8x256xf32>
    %20 = arith.mulf %19, %10 : vector<8x256xf32>
    %21 = arith.addf %16, %20 : vector<8x256xf32>
    %c1 = arith.constant 1 : index
    %c0_13 = arith.constant 0 : index
    %c0_14 = arith.constant 0 : index
    %22 = vector.load %arg4[%c1, %c0_13, %c0_14] : memref<16x8x1xf32, #tpu.memory_space<vmem>>, vector<1x8x1xf32>
    %23 = vector.shape_cast %22 : vector<1x8x1xf32> to vector<8x1xf32>
    %c240_i32 = arith.constant 240 : i32
    %24 = tpu.dynamic_rotate %10 by %c240_i32 dim 1 : vector<8x256xf32>, i32 -> vector<8x256xf32>
    %25 = vector.broadcast %23 : vector<8x1xf32> to vector<8x256xf32>
    %26 = arith.mulf %25, %24 : vector<8x256xf32>
    %27 = arith.addf %21, %26 : vector<8x256xf32>
    %c15_i32_15 = arith.constant 15 : i32
    %28 = vector.broadcast %c15_i32_15 : i32 to vector<8x256xi32>
    %29 = arith.cmpi slt, %6, %28 : vector<8x256xi32>
    %c255_i32 = arith.constant 255 : i32
    %30 = tpu.dynamic_rotate %10 by %c255_i32 dim 1 : vector<8x256xf32>, i32 -> vector<8x256xf32>
    %c15_i32_16 = arith.constant 15 : i32
    %31 = tpu.dynamic_rotate %10 by %c15_i32_16 dim 1 : vector<8x256xf32>, i32 -> vector<8x256xf32>
    %32 = arith.select %29, %30, %31 : vector<8x256xi1>, vector<8x256xf32>
    %c1_17 = arith.constant 1 : index
    %c0_18 = arith.constant 0 : index
    %c0_19 = arith.constant 0 : index
    %33 = vector.load %arg5[%c1_17, %c0_18, %c0_19] : memref<16x8x1xf32, #tpu.memory_space<vmem>>, vector<1x8x1xf32>
    %34 = vector.shape_cast %33 : vector<1x8x1xf32> to vector<8x1xf32>
    %35 = vector.broadcast %34 : vector<8x1xf32> to vector<8x256xf32>
    %36 = arith.mulf %35, %32 : vector<8x256xf32>
    %37 = arith.addf %27, %36 : vector<8x256xf32>
    %c2 = arith.constant 2 : index
    %c0_20 = arith.constant 0 : index
    %c0_21 = arith.constant 0 : index
    %38 = vector.load %arg4[%c2, %c0_20, %c0_21] : memref<16x8x1xf32, #tpu.memory_space<vmem>>, vector<1x8x1xf32>
    %39 = vector.shape_cast %38 : vector<1x8x1xf32> to vector<8x1xf32>
    %c224_i32 = arith.constant 224 : i32
    %40 = tpu.dynamic_rotate %10 by %c224_i32 dim 1 : vector<8x256xf32>, i32 -> vector<8x256xf32>
    %41 = vector.broadcast %39 : vector<8x1xf32> to vector<8x256xf32>
    %42 = arith.mulf %41, %40 : vector<8x256xf32>
    %43 = arith.addf %37, %42 : vector<8x256xf32>
    %c14_i32 = arith.constant 14 : i32
    %44 = vector.broadcast %c14_i32 : i32 to vector<8x256xi32>
    %45 = arith.cmpi slt, %6, %44 : vector<8x256xi32>
    %c254_i32 = arith.constant 254 : i32
    %46 = tpu.dynamic_rotate %10 by %c254_i32 dim 1 : vector<8x256xf32>, i32 -> vector<8x256xf32>
    %c14_i32_22 = arith.constant 14 : i32
    %47 = tpu.dynamic_rotate %10 by %c14_i32_22 dim 1 : vector<8x256xf32>, i32 -> vector<8x256xf32>
    %48 = arith.select %45, %46, %47 : vector<8x256xi1>, vector<8x256xf32>
    %c2_23 = arith.constant 2 : index
    %c0_24 = arith.constant 0 : index
    %c0_25 = arith.constant 0 : index
    %49 = vector.load %arg5[%c2_23, %c0_24, %c0_25] : memref<16x8x1xf32, #tpu.memory_space<vmem>>, vector<1x8x1xf32>
    %50 = vector.shape_cast %49 : vector<1x8x1xf32> to vector<8x1xf32>
    %51 = vector.broadcast %50 : vector<8x1xf32> to vector<8x256xf32>
    %52 = arith.mulf %51, %48 : vector<8x256xf32>
    %53 = arith.addf %43, %52 : vector<8x256xf32>
    %c3 = arith.constant 3 : index
    %c0_26 = arith.constant 0 : index
    %c0_27 = arith.constant 0 : index
    %54 = vector.load %arg4[%c3, %c0_26, %c0_27] : memref<16x8x1xf32, #tpu.memory_space<vmem>>, vector<1x8x1xf32>
    %55 = vector.shape_cast %54 : vector<1x8x1xf32> to vector<8x1xf32>
    %c208_i32 = arith.constant 208 : i32
    %56 = tpu.dynamic_rotate %10 by %c208_i32 dim 1 : vector<8x256xf32>, i32 -> vector<8x256xf32>
    %57 = vector.broadcast %55 : vector<8x1xf32> to vector<8x256xf32>
    %58 = arith.mulf %57, %56 : vector<8x256xf32>
    %59 = arith.addf %53, %58 : vector<8x256xf32>
    %c13_i32 = arith.constant 13 : i32
    %60 = vector.broadcast %c13_i32 : i32 to vector<8x256xi32>
    %61 = arith.cmpi slt, %6, %60 : vector<8x256xi32>
    %c253_i32 = arith.constant 253 : i32
    %62 = tpu.dynamic_rotate %10 by %c253_i32 dim 1 : vector<8x256xf32>, i32 -> vector<8x256xf32>
    %c13_i32_28 = arith.constant 13 : i32
    %63 = tpu.dynamic_rotate %10 by %c13_i32_28 dim 1 : vector<8x256xf32>, i32 -> vector<8x256xf32>
    %64 = arith.select %61, %62, %63 : vector<8x256xi1>, vector<8x256xf32>
    %c3_29 = arith.constant 3 : index
    %c0_30 = arith.constant 0 : index
    %c0_31 = arith.constant 0 : index
    %65 = vector.load %arg5[%c3_29, %c0_30, %c0_31] : memref<16x8x1xf32, #tpu.memory_space<vmem>>, vector<1x8x1xf32>
    %66 = vector.shape_cast %65 : vector<1x8x1xf32> to vector<8x1xf32>
    %67 = vector.broadcast %66 : vector<8x1xf32> to vector<8x256xf32>
    %68 = arith.mulf %67, %64 : vector<8x256xf32>
    %69 = arith.addf %59, %68 : vector<8x256xf32>
    %c4 = arith.constant 4 : index
    %c0_32 = arith.constant 0 : index
    %c0_33 = arith.constant 0 : index
    %70 = vector.load %arg4[%c4, %c0_32, %c0_33] : memref<16x8x1xf32, #tpu.memory_space<vmem>>, vector<1x8x1xf32>
    %71 = vector.shape_cast %70 : vector<1x8x1xf32> to vector<8x1xf32>
    %c192_i32 = arith.constant 192 : i32
    %72 = tpu.dynamic_rotate %10 by %c192_i32 dim 1 : vector<8x256xf32>, i32 -> vector<8x256xf32>
    %73 = vector.broadcast %71 : vector<8x1xf32> to vector<8x256xf32>
    %74 = arith.mulf %73, %72 : vector<8x256xf32>
    %75 = arith.addf %69, %74 : vector<8x256xf32>
    %c12_i32 = arith.constant 12 : i32
    %76 = vector.broadcast %c12_i32 : i32 to vector<8x256xi32>
    %77 = arith.cmpi slt, %6, %76 : vector<8x256xi32>
    %c252_i32 = arith.constant 252 : i32
    %78 = tpu.dynamic_rotate %10 by %c252_i32 dim 1 : vector<8x256xf32>, i32 -> vector<8x256xf32>
    %c12_i32_34 = arith.constant 12 : i32
    %79 = tpu.dynamic_rotate %10 by %c12_i32_34 dim 1 : vector<8x256xf32>, i32 -> vector<8x256xf32>
    %80 = arith.select %77, %78, %79 : vector<8x256xi1>, vector<8x256xf32>
    %c4_35 = arith.constant 4 : index
    %c0_36 = arith.constant 0 : index
    %c0_37 = arith.constant 0 : index
    %81 = vector.load %arg5[%c4_35, %c0_36, %c0_37] : memref<16x8x1xf32, #tpu.memory_space<vmem>>, vector<1x8x1xf32>
    %82 = vector.shape_cast %81 : vector<1x8x1xf32> to vector<8x1xf32>
    %83 = vector.broadcast %82 : vector<8x1xf32> to vector<8x256xf32>
    %84 = arith.mulf %83, %80 : vector<8x256xf32>
    %85 = arith.addf %75, %84 : vector<8x256xf32>
    %c5 = arith.constant 5 : index
    %c0_38 = arith.constant 0 : index
    %c0_39 = arith.constant 0 : index
    %86 = vector.load %arg4[%c5, %c0_38, %c0_39] : memref<16x8x1xf32, #tpu.memory_space<vmem>>, vector<1x8x1xf32>
    %87 = vector.shape_cast %86 : vector<1x8x1xf32> to vector<8x1xf32>
    %c176_i32 = arith.constant 176 : i32
    %88 = tpu.dynamic_rotate %10 by %c176_i32 dim 1 : vector<8x256xf32>, i32 -> vector<8x256xf32>
    %89 = vector.broadcast %87 : vector<8x1xf32> to vector<8x256xf32>
    %90 = arith.mulf %89, %88 : vector<8x256xf32>
    %91 = arith.addf %85, %90 : vector<8x256xf32>
    %c11_i32 = arith.constant 11 : i32
    %92 = vector.broadcast %c11_i32 : i32 to vector<8x256xi32>
    %93 = arith.cmpi slt, %6, %92 : vector<8x256xi32>
    %c251_i32 = arith.constant 251 : i32
    %94 = tpu.dynamic_rotate %10 by %c251_i32 dim 1 : vector<8x256xf32>, i32 -> vector<8x256xf32>
    %c11_i32_40 = arith.constant 11 : i32
    %95 = tpu.dynamic_rotate %10 by %c11_i32_40 dim 1 : vector<8x256xf32>, i32 -> vector<8x256xf32>
    %96 = arith.select %93, %94, %95 : vector<8x256xi1>, vector<8x256xf32>
    %c5_41 = arith.constant 5 : index
    %c0_42 = arith.constant 0 : index
    %c0_43 = arith.constant 0 : index
    %97 = vector.load %arg5[%c5_41, %c0_42, %c0_43] : memref<16x8x1xf32, #tpu.memory_space<vmem>>, vector<1x8x1xf32>
    %98 = vector.shape_cast %97 : vector<1x8x1xf32> to vector<8x1xf32>
    %99 = vector.broadcast %98 : vector<8x1xf32> to vector<8x256xf32>
    %100 = arith.mulf %99, %96 : vector<8x256xf32>
    %101 = arith.addf %91, %100 : vector<8x256xf32>
    %c6 = arith.constant 6 : index
    %c0_44 = arith.constant 0 : index
    %c0_45 = arith.constant 0 : index
    %102 = vector.load %arg4[%c6, %c0_44, %c0_45] : memref<16x8x1xf32, #tpu.memory_space<vmem>>, vector<1x8x1xf32>
    %103 = vector.shape_cast %102 : vector<1x8x1xf32> to vector<8x1xf32>
    %c160_i32 = arith.constant 160 : i32
    %104 = tpu.dynamic_rotate %10 by %c160_i32 dim 1 : vector<8x256xf32>, i32 -> vector<8x256xf32>
    %105 = vector.broadcast %103 : vector<8x1xf32> to vector<8x256xf32>
    %106 = arith.mulf %105, %104 : vector<8x256xf32>
    %107 = arith.addf %101, %106 : vector<8x256xf32>
    %c10_i32 = arith.constant 10 : i32
    %108 = vector.broadcast %c10_i32 : i32 to vector<8x256xi32>
    %109 = arith.cmpi slt, %6, %108 : vector<8x256xi32>
    %c250_i32 = arith.constant 250 : i32
    %110 = tpu.dynamic_rotate %10 by %c250_i32 dim 1 : vector<8x256xf32>, i32 -> vector<8x256xf32>
    %c10_i32_46 = arith.constant 10 : i32
    %111 = tpu.dynamic_rotate %10 by %c10_i32_46 dim 1 : vector<8x256xf32>, i32 -> vector<8x256xf32>
    %112 = arith.select %109, %110, %111 : vector<8x256xi1>, vector<8x256xf32>
    %c6_47 = arith.constant 6 : index
    %c0_48 = arith.constant 0 : index
    %c0_49 = arith.constant 0 : index
    %113 = vector.load %arg5[%c6_47, %c0_48, %c0_49] : memref<16x8x1xf32, #tpu.memory_space<vmem>>, vector<1x8x1xf32>
    %114 = vector.shape_cast %113 : vector<1x8x1xf32> to vector<8x1xf32>
    %115 = vector.broadcast %114 : vector<8x1xf32> to vector<8x256xf32>
    %116 = arith.mulf %115, %112 : vector<8x256xf32>
    %117 = arith.addf %107, %116 : vector<8x256xf32>
    %c7 = arith.constant 7 : index
    %c0_50 = arith.constant 0 : index
    %c0_51 = arith.constant 0 : index
    %118 = vector.load %arg4[%c7, %c0_50, %c0_51] : memref<16x8x1xf32, #tpu.memory_space<vmem>>, vector<1x8x1xf32>
    %119 = vector.shape_cast %118 : vector<1x8x1xf32> to vector<8x1xf32>
    %c144_i32 = arith.constant 144 : i32
    %120 = tpu.dynamic_rotate %10 by %c144_i32 dim 1 : vector<8x256xf32>, i32 -> vector<8x256xf32>
    %121 = vector.broadcast %119 : vector<8x1xf32> to vector<8x256xf32>
    %122 = arith.mulf %121, %120 : vector<8x256xf32>
    %123 = arith.addf %117, %122 : vector<8x256xf32>
    %c9_i32 = arith.constant 9 : i32
    %124 = vector.broadcast %c9_i32 : i32 to vector<8x256xi32>
    %125 = arith.cmpi slt, %6, %124 : vector<8x256xi32>
    %c249_i32 = arith.constant 249 : i32
    %126 = tpu.dynamic_rotate %10 by %c249_i32 dim 1 : vector<8x256xf32>, i32 -> vector<8x256xf32>
    %c9_i32_52 = arith.constant 9 : i32
    %127 = tpu.dynamic_rotate %10 by %c9_i32_52 dim 1 : vector<8x256xf32>, i32 -> vector<8x256xf32>
    %128 = arith.select %125, %126, %127 : vector<8x256xi1>, vector<8x256xf32>
    %c7_53 = arith.constant 7 : index
    %c0_54 = arith.constant 0 : index
    %c0_55 = arith.constant 0 : index
    %129 = vector.load %arg5[%c7_53, %c0_54, %c0_55] : memref<16x8x1xf32, #tpu.memory_space<vmem>>, vector<1x8x1xf32>
    %130 = vector.shape_cast %129 : vector<1x8x1xf32> to vector<8x1xf32>
    %131 = vector.broadcast %130 : vector<8x1xf32> to vector<8x256xf32>
    %132 = arith.mulf %131, %128 : vector<8x256xf32>
    %133 = arith.addf %123, %132 : vector<8x256xf32>
    %c8 = arith.constant 8 : index
    %c0_56 = arith.constant 0 : index
    %c0_57 = arith.constant 0 : index
    %134 = vector.load %arg4[%c8, %c0_56, %c0_57] : memref<16x8x1xf32, #tpu.memory_space<vmem>>, vector<1x8x1xf32>
    %135 = vector.shape_cast %134 : vector<1x8x1xf32> to vector<8x1xf32>
    %c128_i32 = arith.constant 128 : i32
    %136 = tpu.dynamic_rotate %10 by %c128_i32 dim 1 : vector<8x256xf32>, i32 -> vector<8x256xf32>
    %137 = vector.broadcast %135 : vector<8x1xf32> to vector<8x256xf32>
    %138 = arith.mulf %137, %136 : vector<8x256xf32>
    %139 = arith.addf %133, %138 : vector<8x256xf32>
    %c8_i32 = arith.constant 8 : i32
    %140 = vector.broadcast %c8_i32 : i32 to vector<8x256xi32>
    %141 = arith.cmpi slt, %6, %140 : vector<8x256xi32>
    %c248_i32 = arith.constant 248 : i32
    %142 = tpu.dynamic_rotate %10 by %c248_i32 dim 1 : vector<8x256xf32>, i32 -> vector<8x256xf32>
    %c8_i32_58 = arith.constant 8 : i32
    %143 = tpu.dynamic_rotate %10 by %c8_i32_58 dim 1 : vector<8x256xf32>, i32 -> vector<8x256xf32>
    %144 = arith.select %141, %142, %143 : vector<8x256xi1>, vector<8x256xf32>
    %c8_59 = arith.constant 8 : index
    %c0_60 = arith.constant 0 : index
    %c0_61 = arith.constant 0 : index
    %145 = vector.load %arg5[%c8_59, %c0_60, %c0_61] : memref<16x8x1xf32, #tpu.memory_space<vmem>>, vector<1x8x1xf32>
    %146 = vector.shape_cast %145 : vector<1x8x1xf32> to vector<8x1xf32>
    %147 = vector.broadcast %146 : vector<8x1xf32> to vector<8x256xf32>
    %148 = arith.mulf %147, %144 : vector<8x256xf32>
    %149 = arith.addf %139, %148 : vector<8x256xf32>
    %c9 = arith.constant 9 : index
    %c0_62 = arith.constant 0 : index
    %c0_63 = arith.constant 0 : index
    %150 = vector.load %arg4[%c9, %c0_62, %c0_63] : memref<16x8x1xf32, #tpu.memory_space<vmem>>, vector<1x8x1xf32>
    %151 = vector.shape_cast %150 : vector<1x8x1xf32> to vector<8x1xf32>
    %c112_i32 = arith.constant 112 : i32
    %152 = tpu.dynamic_rotate %10 by %c112_i32 dim 1 : vector<8x256xf32>, i32 -> vector<8x256xf32>
    %153 = vector.broadcast %151 : vector<8x1xf32> to vector<8x256xf32>
    %154 = arith.mulf %153, %152 : vector<8x256xf32>
    %155 = arith.addf %149, %154 : vector<8x256xf32>
    %c7_i32 = arith.constant 7 : i32
    %156 = vector.broadcast %c7_i32 : i32 to vector<8x256xi32>
    %157 = arith.cmpi slt, %6, %156 : vector<8x256xi32>
    %c247_i32 = arith.constant 247 : i32
    %158 = tpu.dynamic_rotate %10 by %c247_i32 dim 1 : vector<8x256xf32>, i32 -> vector<8x256xf32>
    %c7_i32_64 = arith.constant 7 : i32
    %159 = tpu.dynamic_rotate %10 by %c7_i32_64 dim 1 : vector<8x256xf32>, i32 -> vector<8x256xf32>
    %160 = arith.select %157, %158, %159 : vector<8x256xi1>, vector<8x256xf32>
    %c9_65 = arith.constant 9 : index
    %c0_66 = arith.constant 0 : index
    %c0_67 = arith.constant 0 : index
    %161 = vector.load %arg5[%c9_65, %c0_66, %c0_67] : memref<16x8x1xf32, #tpu.memory_space<vmem>>, vector<1x8x1xf32>
    %162 = vector.shape_cast %161 : vector<1x8x1xf32> to vector<8x1xf32>
    %163 = vector.broadcast %162 : vector<8x1xf32> to vector<8x256xf32>
    %164 = arith.mulf %163, %160 : vector<8x256xf32>
    %165 = arith.addf %155, %164 : vector<8x256xf32>
    %c10 = arith.constant 10 : index
    %c0_68 = arith.constant 0 : index
    %c0_69 = arith.constant 0 : index
    %166 = vector.load %arg4[%c10, %c0_68, %c0_69] : memref<16x8x1xf32, #tpu.memory_space<vmem>>, vector<1x8x1xf32>
    %167 = vector.shape_cast %166 : vector<1x8x1xf32> to vector<8x1xf32>
    %c96_i32 = arith.constant 96 : i32
    %168 = tpu.dynamic_rotate %10 by %c96_i32 dim 1 : vector<8x256xf32>, i32 -> vector<8x256xf32>
    %169 = vector.broadcast %167 : vector<8x1xf32> to vector<8x256xf32>
    %170 = arith.mulf %169, %168 : vector<8x256xf32>
    %171 = arith.addf %165, %170 : vector<8x256xf32>
    %c6_i32 = arith.constant 6 : i32
    %172 = vector.broadcast %c6_i32 : i32 to vector<8x256xi32>
    %173 = arith.cmpi slt, %6, %172 : vector<8x256xi32>
    %c246_i32 = arith.constant 246 : i32
    %174 = tpu.dynamic_rotate %10 by %c246_i32 dim 1 : vector<8x256xf32>, i32 -> vector<8x256xf32>
    %c6_i32_70 = arith.constant 6 : i32
    %175 = tpu.dynamic_rotate %10 by %c6_i32_70 dim 1 : vector<8x256xf32>, i32 -> vector<8x256xf32>
    %176 = arith.select %173, %174, %175 : vector<8x256xi1>, vector<8x256xf32>
    %c10_71 = arith.constant 10 : index
    %c0_72 = arith.constant 0 : index
    %c0_73 = arith.constant 0 : index
    %177 = vector.load %arg5[%c10_71, %c0_72, %c0_73] : memref<16x8x1xf32, #tpu.memory_space<vmem>>, vector<1x8x1xf32>
    %178 = vector.shape_cast %177 : vector<1x8x1xf32> to vector<8x1xf32>
    %179 = vector.broadcast %178 : vector<8x1xf32> to vector<8x256xf32>
    %180 = arith.mulf %179, %176 : vector<8x256xf32>
    %181 = arith.addf %171, %180 : vector<8x256xf32>
    %c11 = arith.constant 11 : index
    %c0_74 = arith.constant 0 : index
    %c0_75 = arith.constant 0 : index
    %182 = vector.load %arg4[%c11, %c0_74, %c0_75] : memref<16x8x1xf32, #tpu.memory_space<vmem>>, vector<1x8x1xf32>
    %183 = vector.shape_cast %182 : vector<1x8x1xf32> to vector<8x1xf32>
    %c80_i32 = arith.constant 80 : i32
    %184 = tpu.dynamic_rotate %10 by %c80_i32 dim 1 : vector<8x256xf32>, i32 -> vector<8x256xf32>
    %185 = vector.broadcast %183 : vector<8x1xf32> to vector<8x256xf32>
    %186 = arith.mulf %185, %184 : vector<8x256xf32>
    %187 = arith.addf %181, %186 : vector<8x256xf32>
    %c5_i32 = arith.constant 5 : i32
    %188 = vector.broadcast %c5_i32 : i32 to vector<8x256xi32>
    %189 = arith.cmpi slt, %6, %188 : vector<8x256xi32>
    %c245_i32 = arith.constant 245 : i32
    %190 = tpu.dynamic_rotate %10 by %c245_i32 dim 1 : vector<8x256xf32>, i32 -> vector<8x256xf32>
    %c5_i32_76 = arith.constant 5 : i32
    %191 = tpu.dynamic_rotate %10 by %c5_i32_76 dim 1 : vector<8x256xf32>, i32 -> vector<8x256xf32>
    %192 = arith.select %189, %190, %191 : vector<8x256xi1>, vector<8x256xf32>
    %c11_77 = arith.constant 11 : index
    %c0_78 = arith.constant 0 : index
    %c0_79 = arith.constant 0 : index
    %193 = vector.load %arg5[%c11_77, %c0_78, %c0_79] : memref<16x8x1xf32, #tpu.memory_space<vmem>>, vector<1x8x1xf32>
    %194 = vector.shape_cast %193 : vector<1x8x1xf32> to vector<8x1xf32>
    %195 = vector.broadcast %194 : vector<8x1xf32> to vector<8x256xf32>
    %196 = arith.mulf %195, %192 : vector<8x256xf32>
    %197 = arith.addf %187, %196 : vector<8x256xf32>
    %c12 = arith.constant 12 : index
    %c0_80 = arith.constant 0 : index
    %c0_81 = arith.constant 0 : index
    %198 = vector.load %arg4[%c12, %c0_80, %c0_81] : memref<16x8x1xf32, #tpu.memory_space<vmem>>, vector<1x8x1xf32>
    %199 = vector.shape_cast %198 : vector<1x8x1xf32> to vector<8x1xf32>
    %c64_i32 = arith.constant 64 : i32
    %200 = tpu.dynamic_rotate %10 by %c64_i32 dim 1 : vector<8x256xf32>, i32 -> vector<8x256xf32>
    %201 = vector.broadcast %199 : vector<8x1xf32> to vector<8x256xf32>
    %202 = arith.mulf %201, %200 : vector<8x256xf32>
    %203 = arith.addf %197, %202 : vector<8x256xf32>
    %c4_i32_82 = arith.constant 4 : i32
    %204 = vector.broadcast %c4_i32_82 : i32 to vector<8x256xi32>
    %205 = arith.cmpi slt, %6, %204 : vector<8x256xi32>
    %c244_i32 = arith.constant 244 : i32
    %206 = tpu.dynamic_rotate %10 by %c244_i32 dim 1 : vector<8x256xf32>, i32 -> vector<8x256xf32>
    %c4_i32_83 = arith.constant 4 : i32
    %207 = tpu.dynamic_rotate %10 by %c4_i32_83 dim 1 : vector<8x256xf32>, i32 -> vector<8x256xf32>
    %208 = arith.select %205, %206, %207 : vector<8x256xi1>, vector<8x256xf32>
    %c12_84 = arith.constant 12 : index
    %c0_85 = arith.constant 0 : index
    %c0_86 = arith.constant 0 : index
    %209 = vector.load %arg5[%c12_84, %c0_85, %c0_86] : memref<16x8x1xf32, #tpu.memory_space<vmem>>, vector<1x8x1xf32>
    %210 = vector.shape_cast %209 : vector<1x8x1xf32> to vector<8x1xf32>
    %211 = vector.broadcast %210 : vector<8x1xf32> to vector<8x256xf32>
    %212 = arith.mulf %211, %208 : vector<8x256xf32>
    %213 = arith.addf %203, %212 : vector<8x256xf32>
    %c13 = arith.constant 13 : index
    %c0_87 = arith.constant 0 : index
    %c0_88 = arith.constant 0 : index
    %214 = vector.load %arg4[%c13, %c0_87, %c0_88] : memref<16x8x1xf32, #tpu.memory_space<vmem>>, vector<1x8x1xf32>
    %215 = vector.shape_cast %214 : vector<1x8x1xf32> to vector<8x1xf32>
    %c48_i32 = arith.constant 48 : i32
    %216 = tpu.dynamic_rotate %10 by %c48_i32 dim 1 : vector<8x256xf32>, i32 -> vector<8x256xf32>
    %217 = vector.broadcast %215 : vector<8x1xf32> to vector<8x256xf32>
    %218 = arith.mulf %217, %216 : vector<8x256xf32>
    %219 = arith.addf %213, %218 : vector<8x256xf32>
    %c3_i32 = arith.constant 3 : i32
    %220 = vector.broadcast %c3_i32 : i32 to vector<8x256xi32>
    %221 = arith.cmpi slt, %6, %220 : vector<8x256xi32>
    %c243_i32 = arith.constant 243 : i32
    %222 = tpu.dynamic_rotate %10 by %c243_i32 dim 1 : vector<8x256xf32>, i32 -> vector<8x256xf32>
    %c3_i32_89 = arith.constant 3 : i32
    %223 = tpu.dynamic_rotate %10 by %c3_i32_89 dim 1 : vector<8x256xf32>, i32 -> vector<8x256xf32>
    %224 = arith.select %221, %222, %223 : vector<8x256xi1>, vector<8x256xf32>
    %c13_90 = arith.constant 13 : index
    %c0_91 = arith.constant 0 : index
    %c0_92 = arith.constant 0 : index
    %225 = vector.load %arg5[%c13_90, %c0_91, %c0_92] : memref<16x8x1xf32, #tpu.memory_space<vmem>>, vector<1x8x1xf32>
    %226 = vector.shape_cast %225 : vector<1x8x1xf32> to vector<8x1xf32>
    %227 = vector.broadcast %226 : vector<8x1xf32> to vector<8x256xf32>
    %228 = arith.mulf %227, %224 : vector<8x256xf32>
    %229 = arith.addf %219, %228 : vector<8x256xf32>
    %c14 = arith.constant 14 : index
    %c0_93 = arith.constant 0 : index
    %c0_94 = arith.constant 0 : index
    %230 = vector.load %arg4[%c14, %c0_93, %c0_94] : memref<16x8x1xf32, #tpu.memory_space<vmem>>, vector<1x8x1xf32>
    %231 = vector.shape_cast %230 : vector<1x8x1xf32> to vector<8x1xf32>
    %c32_i32 = arith.constant 32 : i32
    %232 = tpu.dynamic_rotate %10 by %c32_i32 dim 1 : vector<8x256xf32>, i32 -> vector<8x256xf32>
    %233 = vector.broadcast %231 : vector<8x1xf32> to vector<8x256xf32>
    %234 = arith.mulf %233, %232 : vector<8x256xf32>
    %235 = arith.addf %229, %234 : vector<8x256xf32>
    %c2_i32 = arith.constant 2 : i32
    %236 = vector.broadcast %c2_i32 : i32 to vector<8x256xi32>
    %237 = arith.cmpi slt, %6, %236 : vector<8x256xi32>
    %c242_i32 = arith.constant 242 : i32
    %238 = tpu.dynamic_rotate %10 by %c242_i32 dim 1 : vector<8x256xf32>, i32 -> vector<8x256xf32>
    %c2_i32_95 = arith.constant 2 : i32
    %239 = tpu.dynamic_rotate %10 by %c2_i32_95 dim 1 : vector<8x256xf32>, i32 -> vector<8x256xf32>
    %240 = arith.select %237, %238, %239 : vector<8x256xi1>, vector<8x256xf32>
    %c14_96 = arith.constant 14 : index
    %c0_97 = arith.constant 0 : index
    %c0_98 = arith.constant 0 : index
    %241 = vector.load %arg5[%c14_96, %c0_97, %c0_98] : memref<16x8x1xf32, #tpu.memory_space<vmem>>, vector<1x8x1xf32>
    %242 = vector.shape_cast %241 : vector<1x8x1xf32> to vector<8x1xf32>
    %243 = vector.broadcast %242 : vector<8x1xf32> to vector<8x256xf32>
    %244 = arith.mulf %243, %240 : vector<8x256xf32>
    %245 = arith.addf %235, %244 : vector<8x256xf32>
    %c15 = arith.constant 15 : index
    %c0_99 = arith.constant 0 : index
    %c0_100 = arith.constant 0 : index
    %246 = vector.load %arg4[%c15, %c0_99, %c0_100] : memref<16x8x1xf32, #tpu.memory_space<vmem>>, vector<1x8x1xf32>
    %247 = vector.shape_cast %246 : vector<1x8x1xf32> to vector<8x1xf32>
    %c16_i32 = arith.constant 16 : i32
    %248 = tpu.dynamic_rotate %10 by %c16_i32 dim 1 : vector<8x256xf32>, i32 -> vector<8x256xf32>
    %249 = vector.broadcast %247 : vector<8x1xf32> to vector<8x256xf32>
    %250 = arith.mulf %249, %248 : vector<8x256xf32>
    %251 = arith.addf %245, %250 : vector<8x256xf32>
    %c1_i32 = arith.constant 1 : i32
    %252 = vector.broadcast %c1_i32 : i32 to vector<8x256xi32>
    %253 = arith.cmpi slt, %6, %252 : vector<8x256xi32>
    %c241_i32 = arith.constant 241 : i32
    %254 = tpu.dynamic_rotate %10 by %c241_i32 dim 1 : vector<8x256xf32>, i32 -> vector<8x256xf32>
    %c1_i32_101 = arith.constant 1 : i32
    %255 = tpu.dynamic_rotate %10 by %c1_i32_101 dim 1 : vector<8x256xf32>, i32 -> vector<8x256xf32>
    %256 = arith.select %253, %254, %255 : vector<8x256xi1>, vector<8x256xf32>
    %c15_102 = arith.constant 15 : index
    %c0_103 = arith.constant 0 : index
    %c0_104 = arith.constant 0 : index
    %257 = vector.load %arg5[%c15_102, %c0_103, %c0_104] : memref<16x8x1xf32, #tpu.memory_space<vmem>>, vector<1x8x1xf32>
    %258 = vector.shape_cast %257 : vector<1x8x1xf32> to vector<8x1xf32>
    %259 = vector.broadcast %258 : vector<8x1xf32> to vector<8x256xf32>
    %260 = arith.mulf %259, %256 : vector<8x256xf32>
    %261 = arith.addf %251, %260 : vector<8x256xf32>
    %c0_105 = arith.constant 0 : index
    %c0_106 = arith.constant 0 : index
    %262 = vector.load %arg6[%c0_105, %c0_106] : memref<8x1xf32, #tpu.memory_space<vmem>>, vector<8x1xf32>
    %263 = vector.broadcast %262 : vector<8x1xf32> to vector<8x256xf32>
    %264 = arith.addf %261, %263 : vector<8x256xf32>
    %cst_107 = arith.constant 0.000000e+00 : f32
    %265 = vector.broadcast %cst_107 : f32 to vector<8x256xf32>
    %c3_i32_108 = arith.constant 3 : i32
    %266 = vector.broadcast %c3_i32_108 : i32 to vector<8x256xi32>
    %267 = arith.cmpi sge, %8, %266 : vector<8x256xi32>
    %c19_i32 = arith.constant 19 : i32
    %268 = vector.broadcast %c19_i32 : i32 to vector<8x256xi32>
    %269 = arith.cmpi slt, %8, %268 : vector<8x256xi32>
    %270 = arith.andi %267, %269 : vector<8x256xi1>
    %c3_i32_109 = arith.constant 3 : i32
    %271 = vector.broadcast %c3_i32_109 : i32 to vector<8x256xi32>
    %272 = arith.cmpi sge, %6, %271 : vector<8x256xi32>
    %273 = arith.andi %270, %272 : vector<8x256xi1>
    %c19_i32_110 = arith.constant 19 : i32
    %274 = vector.broadcast %c19_i32_110 : i32 to vector<8x256xi32>
    %275 = arith.cmpi slt, %6, %274 : vector<8x256xi32>
    %276 = arith.andi %273, %275 : vector<8x256xi1>
    %c51_i32 = arith.constant 51 : i32
    %277 = tpu.dynamic_rotate %3 by %c51_i32 dim 1 : vector<8x256xf32>, i32 -> vector<8x256xf32>
    %cst_111 = arith.constant 0.000000e+00 : f32
    %278 = vector.broadcast %cst_111 : f32 to vector<8x256xf32>
    %279 = arith.select %276, %277, %278 : vector<8x256xi1>, vector<8x256xf32>
    %c0_112 = arith.constant 0 : index
    %c0_113 = arith.constant 0 : index
    %c0_114 = arith.constant 0 : index
    %280 = vector.load %arg7[%c0_112, %c0_113, %c0_114] : memref<49x8x1xf32, #tpu.memory_space<vmem>>, vector<1x8x1xf32>
    %281 = vector.shape_cast %280 : vector<1x8x1xf32> to vector<8x1xf32>
    %282 = vector.broadcast %281 : vector<8x1xf32> to vector<8x256xf32>
    %283 = arith.mulf %282, %279 : vector<8x256xf32>
    %284 = arith.addf %265, %283 : vector<8x256xf32>
    %c3_i32_115 = arith.constant 3 : i32
    %285 = vector.broadcast %c3_i32_115 : i32 to vector<8x256xi32>
    %286 = arith.cmpi sge, %8, %285 : vector<8x256xi32>
    %c19_i32_116 = arith.constant 19 : i32
    %287 = vector.broadcast %c19_i32_116 : i32 to vector<8x256xi32>
    %288 = arith.cmpi slt, %8, %287 : vector<8x256xi32>
    %289 = arith.andi %286, %288 : vector<8x256xi1>
    %c2_i32_117 = arith.constant 2 : i32
    %290 = vector.broadcast %c2_i32_117 : i32 to vector<8x256xi32>
    %291 = arith.cmpi sge, %6, %290 : vector<8x256xi32>
    %292 = arith.andi %289, %291 : vector<8x256xi1>
    %c18_i32 = arith.constant 18 : i32
    %293 = vector.broadcast %c18_i32 : i32 to vector<8x256xi32>
    %294 = arith.cmpi slt, %6, %293 : vector<8x256xi32>
    %295 = arith.andi %292, %294 : vector<8x256xi1>
    %c50_i32 = arith.constant 50 : i32
    %296 = tpu.dynamic_rotate %3 by %c50_i32 dim 1 : vector<8x256xf32>, i32 -> vector<8x256xf32>
    %cst_118 = arith.constant 0.000000e+00 : f32
    %297 = vector.broadcast %cst_118 : f32 to vector<8x256xf32>
    %298 = arith.select %295, %296, %297 : vector<8x256xi1>, vector<8x256xf32>
    %c1_119 = arith.constant 1 : index
    %c0_120 = arith.constant 0 : index
    %c0_121 = arith.constant 0 : index
    %299 = vector.load %arg7[%c1_119, %c0_120, %c0_121] : memref<49x8x1xf32, #tpu.memory_space<vmem>>, vector<1x8x1xf32>
    %300 = vector.shape_cast %299 : vector<1x8x1xf32> to vector<8x1xf32>
    %301 = vector.broadcast %300 : vector<8x1xf32> to vector<8x256xf32>
    %302 = arith.mulf %301, %298 : vector<8x256xf32>
    %303 = arith.addf %284, %302 : vector<8x256xf32>
    %c3_i32_122 = arith.constant 3 : i32
    %304 = vector.broadcast %c3_i32_122 : i32 to vector<8x256xi32>
    %305 = arith.cmpi sge, %8, %304 : vector<8x256xi32>
    %c19_i32_123 = arith.constant 19 : i32
    %306 = vector.broadcast %c19_i32_123 : i32 to vector<8x256xi32>
    %307 = arith.cmpi slt, %8, %306 : vector<8x256xi32>
    %308 = arith.andi %305, %307 : vector<8x256xi1>
    %c1_i32_124 = arith.constant 1 : i32
    %309 = vector.broadcast %c1_i32_124 : i32 to vector<8x256xi32>
    %310 = arith.cmpi sge, %6, %309 : vector<8x256xi32>
    %311 = arith.andi %308, %310 : vector<8x256xi1>
    %c17_i32 = arith.constant 17 : i32
    %312 = vector.broadcast %c17_i32 : i32 to vector<8x256xi32>
    %313 = arith.cmpi slt, %6, %312 : vector<8x256xi32>
    %314 = arith.andi %311, %313 : vector<8x256xi1>
    %c49_i32 = arith.constant 49 : i32
    %315 = tpu.dynamic_rotate %3 by %c49_i32 dim 1 : vector<8x256xf32>, i32 -> vector<8x256xf32>
    %cst_125 = arith.constant 0.000000e+00 : f32
    %316 = vector.broadcast %cst_125 : f32 to vector<8x256xf32>
    %317 = arith.select %314, %315, %316 : vector<8x256xi1>, vector<8x256xf32>
    %c2_126 = arith.constant 2 : index
    %c0_127 = arith.constant 0 : index
    %c0_128 = arith.constant 0 : index
    %318 = vector.load %arg7[%c2_126, %c0_127, %c0_128] : memref<49x8x1xf32, #tpu.memory_space<vmem>>, vector<1x8x1xf32>
    %319 = vector.shape_cast %318 : vector<1x8x1xf32> to vector<8x1xf32>
    %320 = vector.broadcast %319 : vector<8x1xf32> to vector<8x256xf32>
    %321 = arith.mulf %320, %317 : vector<8x256xf32>
    %322 = arith.addf %303, %321 : vector<8x256xf32>
    %c3_i32_129 = arith.constant 3 : i32
    %323 = vector.broadcast %c3_i32_129 : i32 to vector<8x256xi32>
    %324 = arith.cmpi sge, %8, %323 : vector<8x256xi32>
    %c19_i32_130 = arith.constant 19 : i32
    %325 = vector.broadcast %c19_i32_130 : i32 to vector<8x256xi32>
    %326 = arith.cmpi slt, %8, %325 : vector<8x256xi32>
    %327 = arith.andi %324, %326 : vector<8x256xi1>
    %c0_i32 = arith.constant 0 : i32
    %328 = vector.broadcast %c0_i32 : i32 to vector<8x256xi32>
    %329 = arith.cmpi sge, %6, %328 : vector<8x256xi32>
    %330 = arith.andi %327, %329 : vector<8x256xi1>
    %c16_i32_131 = arith.constant 16 : i32
    %331 = vector.broadcast %c16_i32_131 : i32 to vector<8x256xi32>
    %332 = arith.cmpi slt, %6, %331 : vector<8x256xi32>
    %333 = arith.andi %330, %332 : vector<8x256xi1>
    %c48_i32_132 = arith.constant 48 : i32
    %334 = tpu.dynamic_rotate %3 by %c48_i32_132 dim 1 : vector<8x256xf32>, i32 -> vector<8x256xf32>
    %cst_133 = arith.constant 0.000000e+00 : f32
    %335 = vector.broadcast %cst_133 : f32 to vector<8x256xf32>
    %336 = arith.select %333, %334, %335 : vector<8x256xi1>, vector<8x256xf32>
    %c3_134 = arith.constant 3 : index
    %c0_135 = arith.constant 0 : index
    %c0_136 = arith.constant 0 : index
    %337 = vector.load %arg7[%c3_134, %c0_135, %c0_136] : memref<49x8x1xf32, #tpu.memory_space<vmem>>, vector<1x8x1xf32>
    %338 = vector.shape_cast %337 : vector<1x8x1xf32> to vector<8x1xf32>
    %339 = vector.broadcast %338 : vector<8x1xf32> to vector<8x256xf32>
    %340 = arith.mulf %339, %336 : vector<8x256xf32>
    %341 = arith.addf %322, %340 : vector<8x256xf32>
    %c3_i32_137 = arith.constant 3 : i32
    %342 = vector.broadcast %c3_i32_137 : i32 to vector<8x256xi32>
    %343 = arith.cmpi sge, %8, %342 : vector<8x256xi32>
    %c19_i32_138 = arith.constant 19 : i32
    %344 = vector.broadcast %c19_i32_138 : i32 to vector<8x256xi32>
    %345 = arith.cmpi slt, %8, %344 : vector<8x256xi32>
    %346 = arith.andi %343, %345 : vector<8x256xi1>
    %c-1_i32 = arith.constant -1 : i32
    %347 = vector.broadcast %c-1_i32 : i32 to vector<8x256xi32>
    %348 = arith.cmpi sge, %6, %347 : vector<8x256xi32>
    %349 = arith.andi %346, %348 : vector<8x256xi1>
    %c15_i32_139 = arith.constant 15 : i32
    %350 = vector.broadcast %c15_i32_139 : i32 to vector<8x256xi32>
    %351 = arith.cmpi slt, %6, %350 : vector<8x256xi32>
    %352 = arith.andi %349, %351 : vector<8x256xi1>
    %c47_i32 = arith.constant 47 : i32
    %353 = tpu.dynamic_rotate %3 by %c47_i32 dim 1 : vector<8x256xf32>, i32 -> vector<8x256xf32>
    %cst_140 = arith.constant 0.000000e+00 : f32
    %354 = vector.broadcast %cst_140 : f32 to vector<8x256xf32>
    %355 = arith.select %352, %353, %354 : vector<8x256xi1>, vector<8x256xf32>
    %c4_141 = arith.constant 4 : index
    %c0_142 = arith.constant 0 : index
    %c0_143 = arith.constant 0 : index
    %356 = vector.load %arg7[%c4_141, %c0_142, %c0_143] : memref<49x8x1xf32, #tpu.memory_space<vmem>>, vector<1x8x1xf32>
    %357 = vector.shape_cast %356 : vector<1x8x1xf32> to vector<8x1xf32>
    %358 = vector.broadcast %357 : vector<8x1xf32> to vector<8x256xf32>
    %359 = arith.mulf %358, %355 : vector<8x256xf32>
    %360 = arith.addf %341, %359 : vector<8x256xf32>
    %c3_i32_144 = arith.constant 3 : i32
    %361 = vector.broadcast %c3_i32_144 : i32 to vector<8x256xi32>
    %362 = arith.cmpi sge, %8, %361 : vector<8x256xi32>
    %c19_i32_145 = arith.constant 19 : i32
    %363 = vector.broadcast %c19_i32_145 : i32 to vector<8x256xi32>
    %364 = arith.cmpi slt, %8, %363 : vector<8x256xi32>
    %365 = arith.andi %362, %364 : vector<8x256xi1>
    %c-2_i32 = arith.constant -2 : i32
    %366 = vector.broadcast %c-2_i32 : i32 to vector<8x256xi32>
    %367 = arith.cmpi sge, %6, %366 : vector<8x256xi32>
    %368 = arith.andi %365, %367 : vector<8x256xi1>
    %c14_i32_146 = arith.constant 14 : i32
    %369 = vector.broadcast %c14_i32_146 : i32 to vector<8x256xi32>
    %370 = arith.cmpi slt, %6, %369 : vector<8x256xi32>
    %371 = arith.andi %368, %370 : vector<8x256xi1>
    %c46_i32 = arith.constant 46 : i32
    %372 = tpu.dynamic_rotate %3 by %c46_i32 dim 1 : vector<8x256xf32>, i32 -> vector<8x256xf32>
    %cst_147 = arith.constant 0.000000e+00 : f32
    %373 = vector.broadcast %cst_147 : f32 to vector<8x256xf32>
    %374 = arith.select %371, %372, %373 : vector<8x256xi1>, vector<8x256xf32>
    %c5_148 = arith.constant 5 : index
    %c0_149 = arith.constant 0 : index
    %c0_150 = arith.constant 0 : index
    %375 = vector.load %arg7[%c5_148, %c0_149, %c0_150] : memref<49x8x1xf32, #tpu.memory_space<vmem>>, vector<1x8x1xf32>
    %376 = vector.shape_cast %375 : vector<1x8x1xf32> to vector<8x1xf32>
    %377 = vector.broadcast %376 : vector<8x1xf32> to vector<8x256xf32>
    %378 = arith.mulf %377, %374 : vector<8x256xf32>
    %379 = arith.addf %360, %378 : vector<8x256xf32>
    %c3_i32_151 = arith.constant 3 : i32
    %380 = vector.broadcast %c3_i32_151 : i32 to vector<8x256xi32>
    %381 = arith.cmpi sge, %8, %380 : vector<8x256xi32>
    %c19_i32_152 = arith.constant 19 : i32
    %382 = vector.broadcast %c19_i32_152 : i32 to vector<8x256xi32>
    %383 = arith.cmpi slt, %8, %382 : vector<8x256xi32>
    %384 = arith.andi %381, %383 : vector<8x256xi1>
    %c-3_i32 = arith.constant -3 : i32
    %385 = vector.broadcast %c-3_i32 : i32 to vector<8x256xi32>
    %386 = arith.cmpi sge, %6, %385 : vector<8x256xi32>
    %387 = arith.andi %384, %386 : vector<8x256xi1>
    %c13_i32_153 = arith.constant 13 : i32
    %388 = vector.broadcast %c13_i32_153 : i32 to vector<8x256xi32>
    %389 = arith.cmpi slt, %6, %388 : vector<8x256xi32>
    %390 = arith.andi %387, %389 : vector<8x256xi1>
    %c45_i32 = arith.constant 45 : i32
    %391 = tpu.dynamic_rotate %3 by %c45_i32 dim 1 : vector<8x256xf32>, i32 -> vector<8x256xf32>
    %cst_154 = arith.constant 0.000000e+00 : f32
    %392 = vector.broadcast %cst_154 : f32 to vector<8x256xf32>
    %393 = arith.select %390, %391, %392 : vector<8x256xi1>, vector<8x256xf32>
    %c6_155 = arith.constant 6 : index
    %c0_156 = arith.constant 0 : index
    %c0_157 = arith.constant 0 : index
    %394 = vector.load %arg7[%c6_155, %c0_156, %c0_157] : memref<49x8x1xf32, #tpu.memory_space<vmem>>, vector<1x8x1xf32>
    %395 = vector.shape_cast %394 : vector<1x8x1xf32> to vector<8x1xf32>
    %396 = vector.broadcast %395 : vector<8x1xf32> to vector<8x256xf32>
    %397 = arith.mulf %396, %393 : vector<8x256xf32>
    %398 = arith.addf %379, %397 : vector<8x256xf32>
    %c2_i32_158 = arith.constant 2 : i32
    %399 = vector.broadcast %c2_i32_158 : i32 to vector<8x256xi32>
    %400 = arith.cmpi sge, %8, %399 : vector<8x256xi32>
    %c18_i32_159 = arith.constant 18 : i32
    %401 = vector.broadcast %c18_i32_159 : i32 to vector<8x256xi32>
    %402 = arith.cmpi slt, %8, %401 : vector<8x256xi32>
    %403 = arith.andi %400, %402 : vector<8x256xi1>
    %c3_i32_160 = arith.constant 3 : i32
    %404 = vector.broadcast %c3_i32_160 : i32 to vector<8x256xi32>
    %405 = arith.cmpi sge, %6, %404 : vector<8x256xi32>
    %406 = arith.andi %403, %405 : vector<8x256xi1>
    %c19_i32_161 = arith.constant 19 : i32
    %407 = vector.broadcast %c19_i32_161 : i32 to vector<8x256xi32>
    %408 = arith.cmpi slt, %6, %407 : vector<8x256xi32>
    %409 = arith.andi %406, %408 : vector<8x256xi1>
    %c35_i32 = arith.constant 35 : i32
    %410 = tpu.dynamic_rotate %3 by %c35_i32 dim 1 : vector<8x256xf32>, i32 -> vector<8x256xf32>
    %cst_162 = arith.constant 0.000000e+00 : f32
    %411 = vector.broadcast %cst_162 : f32 to vector<8x256xf32>
    %412 = arith.select %409, %410, %411 : vector<8x256xi1>, vector<8x256xf32>
    %c7_163 = arith.constant 7 : index
    %c0_164 = arith.constant 0 : index
    %c0_165 = arith.constant 0 : index
    %413 = vector.load %arg7[%c7_163, %c0_164, %c0_165] : memref<49x8x1xf32, #tpu.memory_space<vmem>>, vector<1x8x1xf32>
    %414 = vector.shape_cast %413 : vector<1x8x1xf32> to vector<8x1xf32>
    %415 = vector.broadcast %414 : vector<8x1xf32> to vector<8x256xf32>
    %416 = arith.mulf %415, %412 : vector<8x256xf32>
    %417 = arith.addf %398, %416 : vector<8x256xf32>
    %c2_i32_166 = arith.constant 2 : i32
    %418 = vector.broadcast %c2_i32_166 : i32 to vector<8x256xi32>
    %419 = arith.cmpi sge, %8, %418 : vector<8x256xi32>
    %c18_i32_167 = arith.constant 18 : i32
    %420 = vector.broadcast %c18_i32_167 : i32 to vector<8x256xi32>
    %421 = arith.cmpi slt, %8, %420 : vector<8x256xi32>
    %422 = arith.andi %419, %421 : vector<8x256xi1>
    %c2_i32_168 = arith.constant 2 : i32
    %423 = vector.broadcast %c2_i32_168 : i32 to vector<8x256xi32>
    %424 = arith.cmpi sge, %6, %423 : vector<8x256xi32>
    %425 = arith.andi %422, %424 : vector<8x256xi1>
    %c18_i32_169 = arith.constant 18 : i32
    %426 = vector.broadcast %c18_i32_169 : i32 to vector<8x256xi32>
    %427 = arith.cmpi slt, %6, %426 : vector<8x256xi32>
    %428 = arith.andi %425, %427 : vector<8x256xi1>
    %c34_i32 = arith.constant 34 : i32
    %429 = tpu.dynamic_rotate %3 by %c34_i32 dim 1 : vector<8x256xf32>, i32 -> vector<8x256xf32>
    %cst_170 = arith.constant 0.000000e+00 : f32
    %430 = vector.broadcast %cst_170 : f32 to vector<8x256xf32>
    %431 = arith.select %428, %429, %430 : vector<8x256xi1>, vector<8x256xf32>
    %c8_171 = arith.constant 8 : index
    %c0_172 = arith.constant 0 : index
    %c0_173 = arith.constant 0 : index
    %432 = vector.load %arg7[%c8_171, %c0_172, %c0_173] : memref<49x8x1xf32, #tpu.memory_space<vmem>>, vector<1x8x1xf32>
    %433 = vector.shape_cast %432 : vector<1x8x1xf32> to vector<8x1xf32>
    %434 = vector.broadcast %433 : vector<8x1xf32> to vector<8x256xf32>
    %435 = arith.mulf %434, %431 : vector<8x256xf32>
    %436 = arith.addf %417, %435 : vector<8x256xf32>
    %c2_i32_174 = arith.constant 2 : i32
    %437 = vector.broadcast %c2_i32_174 : i32 to vector<8x256xi32>
    %438 = arith.cmpi sge, %8, %437 : vector<8x256xi32>
    %c18_i32_175 = arith.constant 18 : i32
    %439 = vector.broadcast %c18_i32_175 : i32 to vector<8x256xi32>
    %440 = arith.cmpi slt, %8, %439 : vector<8x256xi32>
    %441 = arith.andi %438, %440 : vector<8x256xi1>
    %c1_i32_176 = arith.constant 1 : i32
    %442 = vector.broadcast %c1_i32_176 : i32 to vector<8x256xi32>
    %443 = arith.cmpi sge, %6, %442 : vector<8x256xi32>
    %444 = arith.andi %441, %443 : vector<8x256xi1>
    %c17_i32_177 = arith.constant 17 : i32
    %445 = vector.broadcast %c17_i32_177 : i32 to vector<8x256xi32>
    %446 = arith.cmpi slt, %6, %445 : vector<8x256xi32>
    %447 = arith.andi %444, %446 : vector<8x256xi1>
    %c33_i32 = arith.constant 33 : i32
    %448 = tpu.dynamic_rotate %3 by %c33_i32 dim 1 : vector<8x256xf32>, i32 -> vector<8x256xf32>
    %cst_178 = arith.constant 0.000000e+00 : f32
    %449 = vector.broadcast %cst_178 : f32 to vector<8x256xf32>
    %450 = arith.select %447, %448, %449 : vector<8x256xi1>, vector<8x256xf32>
    %c9_179 = arith.constant 9 : index
    %c0_180 = arith.constant 0 : index
    %c0_181 = arith.constant 0 : index
    %451 = vector.load %arg7[%c9_179, %c0_180, %c0_181] : memref<49x8x1xf32, #tpu.memory_space<vmem>>, vector<1x8x1xf32>
    %452 = vector.shape_cast %451 : vector<1x8x1xf32> to vector<8x1xf32>
    %453 = vector.broadcast %452 : vector<8x1xf32> to vector<8x256xf32>
    %454 = arith.mulf %453, %450 : vector<8x256xf32>
    %455 = arith.addf %436, %454 : vector<8x256xf32>
    %c2_i32_182 = arith.constant 2 : i32
    %456 = vector.broadcast %c2_i32_182 : i32 to vector<8x256xi32>
    %457 = arith.cmpi sge, %8, %456 : vector<8x256xi32>
    %c18_i32_183 = arith.constant 18 : i32
    %458 = vector.broadcast %c18_i32_183 : i32 to vector<8x256xi32>
    %459 = arith.cmpi slt, %8, %458 : vector<8x256xi32>
    %460 = arith.andi %457, %459 : vector<8x256xi1>
    %c0_i32_184 = arith.constant 0 : i32
    %461 = vector.broadcast %c0_i32_184 : i32 to vector<8x256xi32>
    %462 = arith.cmpi sge, %6, %461 : vector<8x256xi32>
    %463 = arith.andi %460, %462 : vector<8x256xi1>
    %c16_i32_185 = arith.constant 16 : i32
    %464 = vector.broadcast %c16_i32_185 : i32 to vector<8x256xi32>
    %465 = arith.cmpi slt, %6, %464 : vector<8x256xi32>
    %466 = arith.andi %463, %465 : vector<8x256xi1>
    %c32_i32_186 = arith.constant 32 : i32
    %467 = tpu.dynamic_rotate %3 by %c32_i32_186 dim 1 : vector<8x256xf32>, i32 -> vector<8x256xf32>
    %cst_187 = arith.constant 0.000000e+00 : f32
    %468 = vector.broadcast %cst_187 : f32 to vector<8x256xf32>
    %469 = arith.select %466, %467, %468 : vector<8x256xi1>, vector<8x256xf32>
    %c10_188 = arith.constant 10 : index
    %c0_189 = arith.constant 0 : index
    %c0_190 = arith.constant 0 : index
    %470 = vector.load %arg7[%c10_188, %c0_189, %c0_190] : memref<49x8x1xf32, #tpu.memory_space<vmem>>, vector<1x8x1xf32>
    %471 = vector.shape_cast %470 : vector<1x8x1xf32> to vector<8x1xf32>
    %472 = vector.broadcast %471 : vector<8x1xf32> to vector<8x256xf32>
    %473 = arith.mulf %472, %469 : vector<8x256xf32>
    %474 = arith.addf %455, %473 : vector<8x256xf32>
    %c2_i32_191 = arith.constant 2 : i32
    %475 = vector.broadcast %c2_i32_191 : i32 to vector<8x256xi32>
    %476 = arith.cmpi sge, %8, %475 : vector<8x256xi32>
    %c18_i32_192 = arith.constant 18 : i32
    %477 = vector.broadcast %c18_i32_192 : i32 to vector<8x256xi32>
    %478 = arith.cmpi slt, %8, %477 : vector<8x256xi32>
    %479 = arith.andi %476, %478 : vector<8x256xi1>
    %c-1_i32_193 = arith.constant -1 : i32
    %480 = vector.broadcast %c-1_i32_193 : i32 to vector<8x256xi32>
    %481 = arith.cmpi sge, %6, %480 : vector<8x256xi32>
    %482 = arith.andi %479, %481 : vector<8x256xi1>
    %c15_i32_194 = arith.constant 15 : i32
    %483 = vector.broadcast %c15_i32_194 : i32 to vector<8x256xi32>
    %484 = arith.cmpi slt, %6, %483 : vector<8x256xi32>
    %485 = arith.andi %482, %484 : vector<8x256xi1>
    %c31_i32 = arith.constant 31 : i32
    %486 = tpu.dynamic_rotate %3 by %c31_i32 dim 1 : vector<8x256xf32>, i32 -> vector<8x256xf32>
    %cst_195 = arith.constant 0.000000e+00 : f32
    %487 = vector.broadcast %cst_195 : f32 to vector<8x256xf32>
    %488 = arith.select %485, %486, %487 : vector<8x256xi1>, vector<8x256xf32>
    %c11_196 = arith.constant 11 : index
    %c0_197 = arith.constant 0 : index
    %c0_198 = arith.constant 0 : index
    %489 = vector.load %arg7[%c11_196, %c0_197, %c0_198] : memref<49x8x1xf32, #tpu.memory_space<vmem>>, vector<1x8x1xf32>
    %490 = vector.shape_cast %489 : vector<1x8x1xf32> to vector<8x1xf32>
    %491 = vector.broadcast %490 : vector<8x1xf32> to vector<8x256xf32>
    %492 = arith.mulf %491, %488 : vector<8x256xf32>
    %493 = arith.addf %474, %492 : vector<8x256xf32>
    %c2_i32_199 = arith.constant 2 : i32
    %494 = vector.broadcast %c2_i32_199 : i32 to vector<8x256xi32>
    %495 = arith.cmpi sge, %8, %494 : vector<8x256xi32>
    %c18_i32_200 = arith.constant 18 : i32
    %496 = vector.broadcast %c18_i32_200 : i32 to vector<8x256xi32>
    %497 = arith.cmpi slt, %8, %496 : vector<8x256xi32>
    %498 = arith.andi %495, %497 : vector<8x256xi1>
    %c-2_i32_201 = arith.constant -2 : i32
    %499 = vector.broadcast %c-2_i32_201 : i32 to vector<8x256xi32>
    %500 = arith.cmpi sge, %6, %499 : vector<8x256xi32>
    %501 = arith.andi %498, %500 : vector<8x256xi1>
    %c14_i32_202 = arith.constant 14 : i32
    %502 = vector.broadcast %c14_i32_202 : i32 to vector<8x256xi32>
    %503 = arith.cmpi slt, %6, %502 : vector<8x256xi32>
    %504 = arith.andi %501, %503 : vector<8x256xi1>
    %c30_i32 = arith.constant 30 : i32
    %505 = tpu.dynamic_rotate %3 by %c30_i32 dim 1 : vector<8x256xf32>, i32 -> vector<8x256xf32>
    %cst_203 = arith.constant 0.000000e+00 : f32
    %506 = vector.broadcast %cst_203 : f32 to vector<8x256xf32>
    %507 = arith.select %504, %505, %506 : vector<8x256xi1>, vector<8x256xf32>
    %c12_204 = arith.constant 12 : index
    %c0_205 = arith.constant 0 : index
    %c0_206 = arith.constant 0 : index
    %508 = vector.load %arg7[%c12_204, %c0_205, %c0_206] : memref<49x8x1xf32, #tpu.memory_space<vmem>>, vector<1x8x1xf32>
    %509 = vector.shape_cast %508 : vector<1x8x1xf32> to vector<8x1xf32>
    %510 = vector.broadcast %509 : vector<8x1xf32> to vector<8x256xf32>
    %511 = arith.mulf %510, %507 : vector<8x256xf32>
    %512 = arith.addf %493, %511 : vector<8x256xf32>
    %c2_i32_207 = arith.constant 2 : i32
    %513 = vector.broadcast %c2_i32_207 : i32 to vector<8x256xi32>
    %514 = arith.cmpi sge, %8, %513 : vector<8x256xi32>
    %c18_i32_208 = arith.constant 18 : i32
    %515 = vector.broadcast %c18_i32_208 : i32 to vector<8x256xi32>
    %516 = arith.cmpi slt, %8, %515 : vector<8x256xi32>
    %517 = arith.andi %514, %516 : vector<8x256xi1>
    %c-3_i32_209 = arith.constant -3 : i32
    %518 = vector.broadcast %c-3_i32_209 : i32 to vector<8x256xi32>
    %519 = arith.cmpi sge, %6, %518 : vector<8x256xi32>
    %520 = arith.andi %517, %519 : vector<8x256xi1>
    %c13_i32_210 = arith.constant 13 : i32
    %521 = vector.broadcast %c13_i32_210 : i32 to vector<8x256xi32>
    %522 = arith.cmpi slt, %6, %521 : vector<8x256xi32>
    %523 = arith.andi %520, %522 : vector<8x256xi1>
    %c29_i32 = arith.constant 29 : i32
    %524 = tpu.dynamic_rotate %3 by %c29_i32 dim 1 : vector<8x256xf32>, i32 -> vector<8x256xf32>
    %cst_211 = arith.constant 0.000000e+00 : f32
    %525 = vector.broadcast %cst_211 : f32 to vector<8x256xf32>
    %526 = arith.select %523, %524, %525 : vector<8x256xi1>, vector<8x256xf32>
    %c13_212 = arith.constant 13 : index
    %c0_213 = arith.constant 0 : index
    %c0_214 = arith.constant 0 : index
    %527 = vector.load %arg7[%c13_212, %c0_213, %c0_214] : memref<49x8x1xf32, #tpu.memory_space<vmem>>, vector<1x8x1xf32>
    %528 = vector.shape_cast %527 : vector<1x8x1xf32> to vector<8x1xf32>
    %529 = vector.broadcast %528 : vector<8x1xf32> to vector<8x256xf32>
    %530 = arith.mulf %529, %526 : vector<8x256xf32>
    %531 = arith.addf %512, %530 : vector<8x256xf32>
    %c1_i32_215 = arith.constant 1 : i32
    %532 = vector.broadcast %c1_i32_215 : i32 to vector<8x256xi32>
    %533 = arith.cmpi sge, %8, %532 : vector<8x256xi32>
    %c17_i32_216 = arith.constant 17 : i32
    %534 = vector.broadcast %c17_i32_216 : i32 to vector<8x256xi32>
    %535 = arith.cmpi slt, %8, %534 : vector<8x256xi32>
    %536 = arith.andi %533, %535 : vector<8x256xi1>
    %c3_i32_217 = arith.constant 3 : i32
    %537 = vector.broadcast %c3_i32_217 : i32 to vector<8x256xi32>
    %538 = arith.cmpi sge, %6, %537 : vector<8x256xi32>
    %539 = arith.andi %536, %538 : vector<8x256xi1>
    %c19_i32_218 = arith.constant 19 : i32
    %540 = vector.broadcast %c19_i32_218 : i32 to vector<8x256xi32>
    %541 = arith.cmpi slt, %6, %540 : vector<8x256xi32>
    %542 = arith.andi %539, %541 : vector<8x256xi1>
    %c19_i32_219 = arith.constant 19 : i32
    %543 = tpu.dynamic_rotate %3 by %c19_i32_219 dim 1 : vector<8x256xf32>, i32 -> vector<8x256xf32>
    %cst_220 = arith.constant 0.000000e+00 : f32
    %544 = vector.broadcast %cst_220 : f32 to vector<8x256xf32>
    %545 = arith.select %542, %543, %544 : vector<8x256xi1>, vector<8x256xf32>
    %c14_221 = arith.constant 14 : index
    %c0_222 = arith.constant 0 : index
    %c0_223 = arith.constant 0 : index
    %546 = vector.load %arg7[%c14_221, %c0_222, %c0_223] : memref<49x8x1xf32, #tpu.memory_space<vmem>>, vector<1x8x1xf32>
    %547 = vector.shape_cast %546 : vector<1x8x1xf32> to vector<8x1xf32>
    %548 = vector.broadcast %547 : vector<8x1xf32> to vector<8x256xf32>
    %549 = arith.mulf %548, %545 : vector<8x256xf32>
    %550 = arith.addf %531, %549 : vector<8x256xf32>
    %c1_i32_224 = arith.constant 1 : i32
    %551 = vector.broadcast %c1_i32_224 : i32 to vector<8x256xi32>
    %552 = arith.cmpi sge, %8, %551 : vector<8x256xi32>
    %c17_i32_225 = arith.constant 17 : i32
    %553 = vector.broadcast %c17_i32_225 : i32 to vector<8x256xi32>
    %554 = arith.cmpi slt, %8, %553 : vector<8x256xi32>
    %555 = arith.andi %552, %554 : vector<8x256xi1>
    %c2_i32_226 = arith.constant 2 : i32
    %556 = vector.broadcast %c2_i32_226 : i32 to vector<8x256xi32>
    %557 = arith.cmpi sge, %6, %556 : vector<8x256xi32>
    %558 = arith.andi %555, %557 : vector<8x256xi1>
    %c18_i32_227 = arith.constant 18 : i32
    %559 = vector.broadcast %c18_i32_227 : i32 to vector<8x256xi32>
    %560 = arith.cmpi slt, %6, %559 : vector<8x256xi32>
    %561 = arith.andi %558, %560 : vector<8x256xi1>
    %c18_i32_228 = arith.constant 18 : i32
    %562 = tpu.dynamic_rotate %3 by %c18_i32_228 dim 1 : vector<8x256xf32>, i32 -> vector<8x256xf32>
    %cst_229 = arith.constant 0.000000e+00 : f32
    %563 = vector.broadcast %cst_229 : f32 to vector<8x256xf32>
    %564 = arith.select %561, %562, %563 : vector<8x256xi1>, vector<8x256xf32>
    %c15_230 = arith.constant 15 : index
    %c0_231 = arith.constant 0 : index
    %c0_232 = arith.constant 0 : index
    %565 = vector.load %arg7[%c15_230, %c0_231, %c0_232] : memref<49x8x1xf32, #tpu.memory_space<vmem>>, vector<1x8x1xf32>
    %566 = vector.shape_cast %565 : vector<1x8x1xf32> to vector<8x1xf32>
    %567 = vector.broadcast %566 : vector<8x1xf32> to vector<8x256xf32>
    %568 = arith.mulf %567, %564 : vector<8x256xf32>
    %569 = arith.addf %550, %568 : vector<8x256xf32>
    %c1_i32_233 = arith.constant 1 : i32
    %570 = vector.broadcast %c1_i32_233 : i32 to vector<8x256xi32>
    %571 = arith.cmpi sge, %8, %570 : vector<8x256xi32>
    %c17_i32_234 = arith.constant 17 : i32
    %572 = vector.broadcast %c17_i32_234 : i32 to vector<8x256xi32>
    %573 = arith.cmpi slt, %8, %572 : vector<8x256xi32>
    %574 = arith.andi %571, %573 : vector<8x256xi1>
    %c1_i32_235 = arith.constant 1 : i32
    %575 = vector.broadcast %c1_i32_235 : i32 to vector<8x256xi32>
    %576 = arith.cmpi sge, %6, %575 : vector<8x256xi32>
    %577 = arith.andi %574, %576 : vector<8x256xi1>
    %c17_i32_236 = arith.constant 17 : i32
    %578 = vector.broadcast %c17_i32_236 : i32 to vector<8x256xi32>
    %579 = arith.cmpi slt, %6, %578 : vector<8x256xi32>
    %580 = arith.andi %577, %579 : vector<8x256xi1>
    %c17_i32_237 = arith.constant 17 : i32
    %581 = tpu.dynamic_rotate %3 by %c17_i32_237 dim 1 : vector<8x256xf32>, i32 -> vector<8x256xf32>
    %cst_238 = arith.constant 0.000000e+00 : f32
    %582 = vector.broadcast %cst_238 : f32 to vector<8x256xf32>
    %583 = arith.select %580, %581, %582 : vector<8x256xi1>, vector<8x256xf32>
    %c16 = arith.constant 16 : index
    %c0_239 = arith.constant 0 : index
    %c0_240 = arith.constant 0 : index
    %584 = vector.load %arg7[%c16, %c0_239, %c0_240] : memref<49x8x1xf32, #tpu.memory_space<vmem>>, vector<1x8x1xf32>
    %585 = vector.shape_cast %584 : vector<1x8x1xf32> to vector<8x1xf32>
    %586 = vector.broadcast %585 : vector<8x1xf32> to vector<8x256xf32>
    %587 = arith.mulf %586, %583 : vector<8x256xf32>
    %588 = arith.addf %569, %587 : vector<8x256xf32>
    %c1_i32_241 = arith.constant 1 : i32
    %589 = vector.broadcast %c1_i32_241 : i32 to vector<8x256xi32>
    %590 = arith.cmpi sge, %8, %589 : vector<8x256xi32>
    %c17_i32_242 = arith.constant 17 : i32
    %591 = vector.broadcast %c17_i32_242 : i32 to vector<8x256xi32>
    %592 = arith.cmpi slt, %8, %591 : vector<8x256xi32>
    %593 = arith.andi %590, %592 : vector<8x256xi1>
    %c0_i32_243 = arith.constant 0 : i32
    %594 = vector.broadcast %c0_i32_243 : i32 to vector<8x256xi32>
    %595 = arith.cmpi sge, %6, %594 : vector<8x256xi32>
    %596 = arith.andi %593, %595 : vector<8x256xi1>
    %c16_i32_244 = arith.constant 16 : i32
    %597 = vector.broadcast %c16_i32_244 : i32 to vector<8x256xi32>
    %598 = arith.cmpi slt, %6, %597 : vector<8x256xi32>
    %599 = arith.andi %596, %598 : vector<8x256xi1>
    %c16_i32_245 = arith.constant 16 : i32
    %600 = tpu.dynamic_rotate %3 by %c16_i32_245 dim 1 : vector<8x256xf32>, i32 -> vector<8x256xf32>
    %cst_246 = arith.constant 0.000000e+00 : f32
    %601 = vector.broadcast %cst_246 : f32 to vector<8x256xf32>
    %602 = arith.select %599, %600, %601 : vector<8x256xi1>, vector<8x256xf32>
    %c17 = arith.constant 17 : index
    %c0_247 = arith.constant 0 : index
    %c0_248 = arith.constant 0 : index
    %603 = vector.load %arg7[%c17, %c0_247, %c0_248] : memref<49x8x1xf32, #tpu.memory_space<vmem>>, vector<1x8x1xf32>
    %604 = vector.shape_cast %603 : vector<1x8x1xf32> to vector<8x1xf32>
    %605 = vector.broadcast %604 : vector<8x1xf32> to vector<8x256xf32>
    %606 = arith.mulf %605, %602 : vector<8x256xf32>
    %607 = arith.addf %588, %606 : vector<8x256xf32>
    %c1_i32_249 = arith.constant 1 : i32
    %608 = vector.broadcast %c1_i32_249 : i32 to vector<8x256xi32>
    %609 = arith.cmpi sge, %8, %608 : vector<8x256xi32>
    %c17_i32_250 = arith.constant 17 : i32
    %610 = vector.broadcast %c17_i32_250 : i32 to vector<8x256xi32>
    %611 = arith.cmpi slt, %8, %610 : vector<8x256xi32>
    %612 = arith.andi %609, %611 : vector<8x256xi1>
    %c-1_i32_251 = arith.constant -1 : i32
    %613 = vector.broadcast %c-1_i32_251 : i32 to vector<8x256xi32>
    %614 = arith.cmpi sge, %6, %613 : vector<8x256xi32>
    %615 = arith.andi %612, %614 : vector<8x256xi1>
    %c15_i32_252 = arith.constant 15 : i32
    %616 = vector.broadcast %c15_i32_252 : i32 to vector<8x256xi32>
    %617 = arith.cmpi slt, %6, %616 : vector<8x256xi32>
    %618 = arith.andi %615, %617 : vector<8x256xi1>
    %c15_i32_253 = arith.constant 15 : i32
    %619 = tpu.dynamic_rotate %3 by %c15_i32_253 dim 1 : vector<8x256xf32>, i32 -> vector<8x256xf32>
    %cst_254 = arith.constant 0.000000e+00 : f32
    %620 = vector.broadcast %cst_254 : f32 to vector<8x256xf32>
    %621 = arith.select %618, %619, %620 : vector<8x256xi1>, vector<8x256xf32>
    %c18 = arith.constant 18 : index
    %c0_255 = arith.constant 0 : index
    %c0_256 = arith.constant 0 : index
    %622 = vector.load %arg7[%c18, %c0_255, %c0_256] : memref<49x8x1xf32, #tpu.memory_space<vmem>>, vector<1x8x1xf32>
    %623 = vector.shape_cast %622 : vector<1x8x1xf32> to vector<8x1xf32>
    %624 = vector.broadcast %623 : vector<8x1xf32> to vector<8x256xf32>
    %625 = arith.mulf %624, %621 : vector<8x256xf32>
    %626 = arith.addf %607, %625 : vector<8x256xf32>
    %c1_i32_257 = arith.constant 1 : i32
    %627 = vector.broadcast %c1_i32_257 : i32 to vector<8x256xi32>
    %628 = arith.cmpi sge, %8, %627 : vector<8x256xi32>
    %c17_i32_258 = arith.constant 17 : i32
    %629 = vector.broadcast %c17_i32_258 : i32 to vector<8x256xi32>
    %630 = arith.cmpi slt, %8, %629 : vector<8x256xi32>
    %631 = arith.andi %628, %630 : vector<8x256xi1>
    %c-2_i32_259 = arith.constant -2 : i32
    %632 = vector.broadcast %c-2_i32_259 : i32 to vector<8x256xi32>
    %633 = arith.cmpi sge, %6, %632 : vector<8x256xi32>
    %634 = arith.andi %631, %633 : vector<8x256xi1>
    %c14_i32_260 = arith.constant 14 : i32
    %635 = vector.broadcast %c14_i32_260 : i32 to vector<8x256xi32>
    %636 = arith.cmpi slt, %6, %635 : vector<8x256xi32>
    %637 = arith.andi %634, %636 : vector<8x256xi1>
    %c14_i32_261 = arith.constant 14 : i32
    %638 = tpu.dynamic_rotate %3 by %c14_i32_261 dim 1 : vector<8x256xf32>, i32 -> vector<8x256xf32>
    %cst_262 = arith.constant 0.000000e+00 : f32
    %639 = vector.broadcast %cst_262 : f32 to vector<8x256xf32>
    %640 = arith.select %637, %638, %639 : vector<8x256xi1>, vector<8x256xf32>
    %c19 = arith.constant 19 : index
    %c0_263 = arith.constant 0 : index
    %c0_264 = arith.constant 0 : index
    %641 = vector.load %arg7[%c19, %c0_263, %c0_264] : memref<49x8x1xf32, #tpu.memory_space<vmem>>, vector<1x8x1xf32>
    %642 = vector.shape_cast %641 : vector<1x8x1xf32> to vector<8x1xf32>
    %643 = vector.broadcast %642 : vector<8x1xf32> to vector<8x256xf32>
    %644 = arith.mulf %643, %640 : vector<8x256xf32>
    %645 = arith.addf %626, %644 : vector<8x256xf32>
    %c1_i32_265 = arith.constant 1 : i32
    %646 = vector.broadcast %c1_i32_265 : i32 to vector<8x256xi32>
    %647 = arith.cmpi sge, %8, %646 : vector<8x256xi32>
    %c17_i32_266 = arith.constant 17 : i32
    %648 = vector.broadcast %c17_i32_266 : i32 to vector<8x256xi32>
    %649 = arith.cmpi slt, %8, %648 : vector<8x256xi32>
    %650 = arith.andi %647, %649 : vector<8x256xi1>
    %c-3_i32_267 = arith.constant -3 : i32
    %651 = vector.broadcast %c-3_i32_267 : i32 to vector<8x256xi32>
    %652 = arith.cmpi sge, %6, %651 : vector<8x256xi32>
    %653 = arith.andi %650, %652 : vector<8x256xi1>
    %c13_i32_268 = arith.constant 13 : i32
    %654 = vector.broadcast %c13_i32_268 : i32 to vector<8x256xi32>
    %655 = arith.cmpi slt, %6, %654 : vector<8x256xi32>
    %656 = arith.andi %653, %655 : vector<8x256xi1>
    %c13_i32_269 = arith.constant 13 : i32
    %657 = tpu.dynamic_rotate %3 by %c13_i32_269 dim 1 : vector<8x256xf32>, i32 -> vector<8x256xf32>
    %cst_270 = arith.constant 0.000000e+00 : f32
    %658 = vector.broadcast %cst_270 : f32 to vector<8x256xf32>
    %659 = arith.select %656, %657, %658 : vector<8x256xi1>, vector<8x256xf32>
    %c20 = arith.constant 20 : index
    %c0_271 = arith.constant 0 : index
    %c0_272 = arith.constant 0 : index
    %660 = vector.load %arg7[%c20, %c0_271, %c0_272] : memref<49x8x1xf32, #tpu.memory_space<vmem>>, vector<1x8x1xf32>
    %661 = vector.shape_cast %660 : vector<1x8x1xf32> to vector<8x1xf32>
    %662 = vector.broadcast %661 : vector<8x1xf32> to vector<8x256xf32>
    %663 = arith.mulf %662, %659 : vector<8x256xf32>
    %664 = arith.addf %645, %663 : vector<8x256xf32>
    %c0_i32_273 = arith.constant 0 : i32
    %665 = vector.broadcast %c0_i32_273 : i32 to vector<8x256xi32>
    %666 = arith.cmpi sge, %8, %665 : vector<8x256xi32>
    %c16_i32_274 = arith.constant 16 : i32
    %667 = vector.broadcast %c16_i32_274 : i32 to vector<8x256xi32>
    %668 = arith.cmpi slt, %8, %667 : vector<8x256xi32>
    %669 = arith.andi %666, %668 : vector<8x256xi1>
    %c3_i32_275 = arith.constant 3 : i32
    %670 = vector.broadcast %c3_i32_275 : i32 to vector<8x256xi32>
    %671 = arith.cmpi sge, %6, %670 : vector<8x256xi32>
    %672 = arith.andi %669, %671 : vector<8x256xi1>
    %c19_i32_276 = arith.constant 19 : i32
    %673 = vector.broadcast %c19_i32_276 : i32 to vector<8x256xi32>
    %674 = arith.cmpi slt, %6, %673 : vector<8x256xi32>
    %675 = arith.andi %672, %674 : vector<8x256xi1>
    %c3_i32_277 = arith.constant 3 : i32
    %676 = tpu.dynamic_rotate %3 by %c3_i32_277 dim 1 : vector<8x256xf32>, i32 -> vector<8x256xf32>
    %cst_278 = arith.constant 0.000000e+00 : f32
    %677 = vector.broadcast %cst_278 : f32 to vector<8x256xf32>
    %678 = arith.select %675, %676, %677 : vector<8x256xi1>, vector<8x256xf32>
    %c21 = arith.constant 21 : index
    %c0_279 = arith.constant 0 : index
    %c0_280 = arith.constant 0 : index
    %679 = vector.load %arg7[%c21, %c0_279, %c0_280] : memref<49x8x1xf32, #tpu.memory_space<vmem>>, vector<1x8x1xf32>
    %680 = vector.shape_cast %679 : vector<1x8x1xf32> to vector<8x1xf32>
    %681 = vector.broadcast %680 : vector<8x1xf32> to vector<8x256xf32>
    %682 = arith.mulf %681, %678 : vector<8x256xf32>
    %683 = arith.addf %664, %682 : vector<8x256xf32>
    %c0_i32_281 = arith.constant 0 : i32
    %684 = vector.broadcast %c0_i32_281 : i32 to vector<8x256xi32>
    %685 = arith.cmpi sge, %8, %684 : vector<8x256xi32>
    %c16_i32_282 = arith.constant 16 : i32
    %686 = vector.broadcast %c16_i32_282 : i32 to vector<8x256xi32>
    %687 = arith.cmpi slt, %8, %686 : vector<8x256xi32>
    %688 = arith.andi %685, %687 : vector<8x256xi1>
    %c2_i32_283 = arith.constant 2 : i32
    %689 = vector.broadcast %c2_i32_283 : i32 to vector<8x256xi32>
    %690 = arith.cmpi sge, %6, %689 : vector<8x256xi32>
    %691 = arith.andi %688, %690 : vector<8x256xi1>
    %c18_i32_284 = arith.constant 18 : i32
    %692 = vector.broadcast %c18_i32_284 : i32 to vector<8x256xi32>
    %693 = arith.cmpi slt, %6, %692 : vector<8x256xi32>
    %694 = arith.andi %691, %693 : vector<8x256xi1>
    %c2_i32_285 = arith.constant 2 : i32
    %695 = tpu.dynamic_rotate %3 by %c2_i32_285 dim 1 : vector<8x256xf32>, i32 -> vector<8x256xf32>
    %cst_286 = arith.constant 0.000000e+00 : f32
    %696 = vector.broadcast %cst_286 : f32 to vector<8x256xf32>
    %697 = arith.select %694, %695, %696 : vector<8x256xi1>, vector<8x256xf32>
    %c22 = arith.constant 22 : index
    %c0_287 = arith.constant 0 : index
    %c0_288 = arith.constant 0 : index
    %698 = vector.load %arg7[%c22, %c0_287, %c0_288] : memref<49x8x1xf32, #tpu.memory_space<vmem>>, vector<1x8x1xf32>
    %699 = vector.shape_cast %698 : vector<1x8x1xf32> to vector<8x1xf32>
    %700 = vector.broadcast %699 : vector<8x1xf32> to vector<8x256xf32>
    %701 = arith.mulf %700, %697 : vector<8x256xf32>
    %702 = arith.addf %683, %701 : vector<8x256xf32>
    %c0_i32_289 = arith.constant 0 : i32
    %703 = vector.broadcast %c0_i32_289 : i32 to vector<8x256xi32>
    %704 = arith.cmpi sge, %8, %703 : vector<8x256xi32>
    %c16_i32_290 = arith.constant 16 : i32
    %705 = vector.broadcast %c16_i32_290 : i32 to vector<8x256xi32>
    %706 = arith.cmpi slt, %8, %705 : vector<8x256xi32>
    %707 = arith.andi %704, %706 : vector<8x256xi1>
    %c1_i32_291 = arith.constant 1 : i32
    %708 = vector.broadcast %c1_i32_291 : i32 to vector<8x256xi32>
    %709 = arith.cmpi sge, %6, %708 : vector<8x256xi32>
    %710 = arith.andi %707, %709 : vector<8x256xi1>
    %c17_i32_292 = arith.constant 17 : i32
    %711 = vector.broadcast %c17_i32_292 : i32 to vector<8x256xi32>
    %712 = arith.cmpi slt, %6, %711 : vector<8x256xi32>
    %713 = arith.andi %710, %712 : vector<8x256xi1>
    %c1_i32_293 = arith.constant 1 : i32
    %714 = tpu.dynamic_rotate %3 by %c1_i32_293 dim 1 : vector<8x256xf32>, i32 -> vector<8x256xf32>
    %cst_294 = arith.constant 0.000000e+00 : f32
    %715 = vector.broadcast %cst_294 : f32 to vector<8x256xf32>
    %716 = arith.select %713, %714, %715 : vector<8x256xi1>, vector<8x256xf32>
    %c23 = arith.constant 23 : index
    %c0_295 = arith.constant 0 : index
    %c0_296 = arith.constant 0 : index
    %717 = vector.load %arg7[%c23, %c0_295, %c0_296] : memref<49x8x1xf32, #tpu.memory_space<vmem>>, vector<1x8x1xf32>
    %718 = vector.shape_cast %717 : vector<1x8x1xf32> to vector<8x1xf32>
    %719 = vector.broadcast %718 : vector<8x1xf32> to vector<8x256xf32>
    %720 = arith.mulf %719, %716 : vector<8x256xf32>
    %721 = arith.addf %702, %720 : vector<8x256xf32>
    %c0_i32_297 = arith.constant 0 : i32
    %722 = vector.broadcast %c0_i32_297 : i32 to vector<8x256xi32>
    %723 = arith.cmpi sge, %8, %722 : vector<8x256xi32>
    %c16_i32_298 = arith.constant 16 : i32
    %724 = vector.broadcast %c16_i32_298 : i32 to vector<8x256xi32>
    %725 = arith.cmpi slt, %8, %724 : vector<8x256xi32>
    %726 = arith.andi %723, %725 : vector<8x256xi1>
    %c0_i32_299 = arith.constant 0 : i32
    %727 = vector.broadcast %c0_i32_299 : i32 to vector<8x256xi32>
    %728 = arith.cmpi sge, %6, %727 : vector<8x256xi32>
    %729 = arith.andi %726, %728 : vector<8x256xi1>
    %c16_i32_300 = arith.constant 16 : i32
    %730 = vector.broadcast %c16_i32_300 : i32 to vector<8x256xi32>
    %731 = arith.cmpi slt, %6, %730 : vector<8x256xi32>
    %732 = arith.andi %729, %731 : vector<8x256xi1>
    %cst_301 = arith.constant 0.000000e+00 : f32
    %733 = vector.broadcast %cst_301 : f32 to vector<8x256xf32>
    %734 = arith.select %732, %3, %733 : vector<8x256xi1>, vector<8x256xf32>
    %c24 = arith.constant 24 : index
    %c0_302 = arith.constant 0 : index
    %c0_303 = arith.constant 0 : index
    %735 = vector.load %arg7[%c24, %c0_302, %c0_303] : memref<49x8x1xf32, #tpu.memory_space<vmem>>, vector<1x8x1xf32>
    %736 = vector.shape_cast %735 : vector<1x8x1xf32> to vector<8x1xf32>
    %737 = vector.broadcast %736 : vector<8x1xf32> to vector<8x256xf32>
    %738 = arith.mulf %737, %734 : vector<8x256xf32>
    %739 = arith.addf %721, %738 : vector<8x256xf32>
    %c0_i32_304 = arith.constant 0 : i32
    %740 = vector.broadcast %c0_i32_304 : i32 to vector<8x256xi32>
    %741 = arith.cmpi sge, %8, %740 : vector<8x256xi32>
    %c16_i32_305 = arith.constant 16 : i32
    %742 = vector.broadcast %c16_i32_305 : i32 to vector<8x256xi32>
    %743 = arith.cmpi slt, %8, %742 : vector<8x256xi32>
    %744 = arith.andi %741, %743 : vector<8x256xi1>
    %c-1_i32_306 = arith.constant -1 : i32
    %745 = vector.broadcast %c-1_i32_306 : i32 to vector<8x256xi32>
    %746 = arith.cmpi sge, %6, %745 : vector<8x256xi32>
    %747 = arith.andi %744, %746 : vector<8x256xi1>
    %c15_i32_307 = arith.constant 15 : i32
    %748 = vector.broadcast %c15_i32_307 : i32 to vector<8x256xi32>
    %749 = arith.cmpi slt, %6, %748 : vector<8x256xi32>
    %750 = arith.andi %747, %749 : vector<8x256xi1>
    %c255_i32_308 = arith.constant 255 : i32
    %751 = tpu.dynamic_rotate %3 by %c255_i32_308 dim 1 : vector<8x256xf32>, i32 -> vector<8x256xf32>
    %cst_309 = arith.constant 0.000000e+00 : f32
    %752 = vector.broadcast %cst_309 : f32 to vector<8x256xf32>
    %753 = arith.select %750, %751, %752 : vector<8x256xi1>, vector<8x256xf32>
    %c25 = arith.constant 25 : index
    %c0_310 = arith.constant 0 : index
    %c0_311 = arith.constant 0 : index
    %754 = vector.load %arg7[%c25, %c0_310, %c0_311] : memref<49x8x1xf32, #tpu.memory_space<vmem>>, vector<1x8x1xf32>
    %755 = vector.shape_cast %754 : vector<1x8x1xf32> to vector<8x1xf32>
    %756 = vector.broadcast %755 : vector<8x1xf32> to vector<8x256xf32>
    %757 = arith.mulf %756, %753 : vector<8x256xf32>
    %758 = arith.addf %739, %757 : vector<8x256xf32>
    %c0_i32_312 = arith.constant 0 : i32
    %759 = vector.broadcast %c0_i32_312 : i32 to vector<8x256xi32>
    %760 = arith.cmpi sge, %8, %759 : vector<8x256xi32>
    %c16_i32_313 = arith.constant 16 : i32
    %761 = vector.broadcast %c16_i32_313 : i32 to vector<8x256xi32>
    %762 = arith.cmpi slt, %8, %761 : vector<8x256xi32>
    %763 = arith.andi %760, %762 : vector<8x256xi1>
    %c-2_i32_314 = arith.constant -2 : i32
    %764 = vector.broadcast %c-2_i32_314 : i32 to vector<8x256xi32>
    %765 = arith.cmpi sge, %6, %764 : vector<8x256xi32>
    %766 = arith.andi %763, %765 : vector<8x256xi1>
    %c14_i32_315 = arith.constant 14 : i32
    %767 = vector.broadcast %c14_i32_315 : i32 to vector<8x256xi32>
    %768 = arith.cmpi slt, %6, %767 : vector<8x256xi32>
    %769 = arith.andi %766, %768 : vector<8x256xi1>
    %c254_i32_316 = arith.constant 254 : i32
    %770 = tpu.dynamic_rotate %3 by %c254_i32_316 dim 1 : vector<8x256xf32>, i32 -> vector<8x256xf32>
    %cst_317 = arith.constant 0.000000e+00 : f32
    %771 = vector.broadcast %cst_317 : f32 to vector<8x256xf32>
    %772 = arith.select %769, %770, %771 : vector<8x256xi1>, vector<8x256xf32>
    %c26 = arith.constant 26 : index
    %c0_318 = arith.constant 0 : index
    %c0_319 = arith.constant 0 : index
    %773 = vector.load %arg7[%c26, %c0_318, %c0_319] : memref<49x8x1xf32, #tpu.memory_space<vmem>>, vector<1x8x1xf32>
    %774 = vector.shape_cast %773 : vector<1x8x1xf32> to vector<8x1xf32>
    %775 = vector.broadcast %774 : vector<8x1xf32> to vector<8x256xf32>
    %776 = arith.mulf %775, %772 : vector<8x256xf32>
    %777 = arith.addf %758, %776 : vector<8x256xf32>
    %c0_i32_320 = arith.constant 0 : i32
    %778 = vector.broadcast %c0_i32_320 : i32 to vector<8x256xi32>
    %779 = arith.cmpi sge, %8, %778 : vector<8x256xi32>
    %c16_i32_321 = arith.constant 16 : i32
    %780 = vector.broadcast %c16_i32_321 : i32 to vector<8x256xi32>
    %781 = arith.cmpi slt, %8, %780 : vector<8x256xi32>
    %782 = arith.andi %779, %781 : vector<8x256xi1>
    %c-3_i32_322 = arith.constant -3 : i32
    %783 = vector.broadcast %c-3_i32_322 : i32 to vector<8x256xi32>
    %784 = arith.cmpi sge, %6, %783 : vector<8x256xi32>
    %785 = arith.andi %782, %784 : vector<8x256xi1>
    %c13_i32_323 = arith.constant 13 : i32
    %786 = vector.broadcast %c13_i32_323 : i32 to vector<8x256xi32>
    %787 = arith.cmpi slt, %6, %786 : vector<8x256xi32>
    %788 = arith.andi %785, %787 : vector<8x256xi1>
    %c253_i32_324 = arith.constant 253 : i32
    %789 = tpu.dynamic_rotate %3 by %c253_i32_324 dim 1 : vector<8x256xf32>, i32 -> vector<8x256xf32>
    %cst_325 = arith.constant 0.000000e+00 : f32
    %790 = vector.broadcast %cst_325 : f32 to vector<8x256xf32>
    %791 = arith.select %788, %789, %790 : vector<8x256xi1>, vector<8x256xf32>
    %c27 = arith.constant 27 : index
    %c0_326 = arith.constant 0 : index
    %c0_327 = arith.constant 0 : index
    %792 = vector.load %arg7[%c27, %c0_326, %c0_327] : memref<49x8x1xf32, #tpu.memory_space<vmem>>, vector<1x8x1xf32>
    %793 = vector.shape_cast %792 : vector<1x8x1xf32> to vector<8x1xf32>
    %794 = vector.broadcast %793 : vector<8x1xf32> to vector<8x256xf32>
    %795 = arith.mulf %794, %791 : vector<8x256xf32>
    %796 = arith.addf %777, %795 : vector<8x256xf32>
    %c-1_i32_328 = arith.constant -1 : i32
    %797 = vector.broadcast %c-1_i32_328 : i32 to vector<8x256xi32>
    %798 = arith.cmpi sge, %8, %797 : vector<8x256xi32>
    %c15_i32_329 = arith.constant 15 : i32
    %799 = vector.broadcast %c15_i32_329 : i32 to vector<8x256xi32>
    %800 = arith.cmpi slt, %8, %799 : vector<8x256xi32>
    %801 = arith.andi %798, %800 : vector<8x256xi1>
    %c3_i32_330 = arith.constant 3 : i32
    %802 = vector.broadcast %c3_i32_330 : i32 to vector<8x256xi32>
    %803 = arith.cmpi sge, %6, %802 : vector<8x256xi32>
    %804 = arith.andi %801, %803 : vector<8x256xi1>
    %c19_i32_331 = arith.constant 19 : i32
    %805 = vector.broadcast %c19_i32_331 : i32 to vector<8x256xi32>
    %806 = arith.cmpi slt, %6, %805 : vector<8x256xi32>
    %807 = arith.andi %804, %806 : vector<8x256xi1>
    %c243_i32_332 = arith.constant 243 : i32
    %808 = tpu.dynamic_rotate %3 by %c243_i32_332 dim 1 : vector<8x256xf32>, i32 -> vector<8x256xf32>
    %cst_333 = arith.constant 0.000000e+00 : f32
    %809 = vector.broadcast %cst_333 : f32 to vector<8x256xf32>
    %810 = arith.select %807, %808, %809 : vector<8x256xi1>, vector<8x256xf32>
    %c28 = arith.constant 28 : index
    %c0_334 = arith.constant 0 : index
    %c0_335 = arith.constant 0 : index
    %811 = vector.load %arg7[%c28, %c0_334, %c0_335] : memref<49x8x1xf32, #tpu.memory_space<vmem>>, vector<1x8x1xf32>
    %812 = vector.shape_cast %811 : vector<1x8x1xf32> to vector<8x1xf32>
    %813 = vector.broadcast %812 : vector<8x1xf32> to vector<8x256xf32>
    %814 = arith.mulf %813, %810 : vector<8x256xf32>
    %815 = arith.addf %796, %814 : vector<8x256xf32>
    %c-1_i32_336 = arith.constant -1 : i32
    %816 = vector.broadcast %c-1_i32_336 : i32 to vector<8x256xi32>
    %817 = arith.cmpi sge, %8, %816 : vector<8x256xi32>
    %c15_i32_337 = arith.constant 15 : i32
    %818 = vector.broadcast %c15_i32_337 : i32 to vector<8x256xi32>
    %819 = arith.cmpi slt, %8, %818 : vector<8x256xi32>
    %820 = arith.andi %817, %819 : vector<8x256xi1>
    %c2_i32_338 = arith.constant 2 : i32
    %821 = vector.broadcast %c2_i32_338 : i32 to vector<8x256xi32>
    %822 = arith.cmpi sge, %6, %821 : vector<8x256xi32>
    %823 = arith.andi %820, %822 : vector<8x256xi1>
    %c18_i32_339 = arith.constant 18 : i32
    %824 = vector.broadcast %c18_i32_339 : i32 to vector<8x256xi32>
    %825 = arith.cmpi slt, %6, %824 : vector<8x256xi32>
    %826 = arith.andi %823, %825 : vector<8x256xi1>
    %c242_i32_340 = arith.constant 242 : i32
    %827 = tpu.dynamic_rotate %3 by %c242_i32_340 dim 1 : vector<8x256xf32>, i32 -> vector<8x256xf32>
    %cst_341 = arith.constant 0.000000e+00 : f32
    %828 = vector.broadcast %cst_341 : f32 to vector<8x256xf32>
    %829 = arith.select %826, %827, %828 : vector<8x256xi1>, vector<8x256xf32>
    %c29 = arith.constant 29 : index
    %c0_342 = arith.constant 0 : index
    %c0_343 = arith.constant 0 : index
    %830 = vector.load %arg7[%c29, %c0_342, %c0_343] : memref<49x8x1xf32, #tpu.memory_space<vmem>>, vector<1x8x1xf32>
    %831 = vector.shape_cast %830 : vector<1x8x1xf32> to vector<8x1xf32>
    %832 = vector.broadcast %831 : vector<8x1xf32> to vector<8x256xf32>
    %833 = arith.mulf %832, %829 : vector<8x256xf32>
    %834 = arith.addf %815, %833 : vector<8x256xf32>
    %c-1_i32_344 = arith.constant -1 : i32
    %835 = vector.broadcast %c-1_i32_344 : i32 to vector<8x256xi32>
    %836 = arith.cmpi sge, %8, %835 : vector<8x256xi32>
    %c15_i32_345 = arith.constant 15 : i32
    %837 = vector.broadcast %c15_i32_345 : i32 to vector<8x256xi32>
    %838 = arith.cmpi slt, %8, %837 : vector<8x256xi32>
    %839 = arith.andi %836, %838 : vector<8x256xi1>
    %c1_i32_346 = arith.constant 1 : i32
    %840 = vector.broadcast %c1_i32_346 : i32 to vector<8x256xi32>
    %841 = arith.cmpi sge, %6, %840 : vector<8x256xi32>
    %842 = arith.andi %839, %841 : vector<8x256xi1>
    %c17_i32_347 = arith.constant 17 : i32
    %843 = vector.broadcast %c17_i32_347 : i32 to vector<8x256xi32>
    %844 = arith.cmpi slt, %6, %843 : vector<8x256xi32>
    %845 = arith.andi %842, %844 : vector<8x256xi1>
    %c241_i32_348 = arith.constant 241 : i32
    %846 = tpu.dynamic_rotate %3 by %c241_i32_348 dim 1 : vector<8x256xf32>, i32 -> vector<8x256xf32>
    %cst_349 = arith.constant 0.000000e+00 : f32
    %847 = vector.broadcast %cst_349 : f32 to vector<8x256xf32>
    %848 = arith.select %845, %846, %847 : vector<8x256xi1>, vector<8x256xf32>
    %c30 = arith.constant 30 : index
    %c0_350 = arith.constant 0 : index
    %c0_351 = arith.constant 0 : index
    %849 = vector.load %arg7[%c30, %c0_350, %c0_351] : memref<49x8x1xf32, #tpu.memory_space<vmem>>, vector<1x8x1xf32>
    %850 = vector.shape_cast %849 : vector<1x8x1xf32> to vector<8x1xf32>
    %851 = vector.broadcast %850 : vector<8x1xf32> to vector<8x256xf32>
    %852 = arith.mulf %851, %848 : vector<8x256xf32>
    %853 = arith.addf %834, %852 : vector<8x256xf32>
    %c-1_i32_352 = arith.constant -1 : i32
    %854 = vector.broadcast %c-1_i32_352 : i32 to vector<8x256xi32>
    %855 = arith.cmpi sge, %8, %854 : vector<8x256xi32>
    %c15_i32_353 = arith.constant 15 : i32
    %856 = vector.broadcast %c15_i32_353 : i32 to vector<8x256xi32>
    %857 = arith.cmpi slt, %8, %856 : vector<8x256xi32>
    %858 = arith.andi %855, %857 : vector<8x256xi1>
    %c0_i32_354 = arith.constant 0 : i32
    %859 = vector.broadcast %c0_i32_354 : i32 to vector<8x256xi32>
    %860 = arith.cmpi sge, %6, %859 : vector<8x256xi32>
    %861 = arith.andi %858, %860 : vector<8x256xi1>
    %c16_i32_355 = arith.constant 16 : i32
    %862 = vector.broadcast %c16_i32_355 : i32 to vector<8x256xi32>
    %863 = arith.cmpi slt, %6, %862 : vector<8x256xi32>
    %864 = arith.andi %861, %863 : vector<8x256xi1>
    %c240_i32_356 = arith.constant 240 : i32
    %865 = tpu.dynamic_rotate %3 by %c240_i32_356 dim 1 : vector<8x256xf32>, i32 -> vector<8x256xf32>
    %cst_357 = arith.constant 0.000000e+00 : f32
    %866 = vector.broadcast %cst_357 : f32 to vector<8x256xf32>
    %867 = arith.select %864, %865, %866 : vector<8x256xi1>, vector<8x256xf32>
    %c31 = arith.constant 31 : index
    %c0_358 = arith.constant 0 : index
    %c0_359 = arith.constant 0 : index
    %868 = vector.load %arg7[%c31, %c0_358, %c0_359] : memref<49x8x1xf32, #tpu.memory_space<vmem>>, vector<1x8x1xf32>
    %869 = vector.shape_cast %868 : vector<1x8x1xf32> to vector<8x1xf32>
    %870 = vector.broadcast %869 : vector<8x1xf32> to vector<8x256xf32>
    %871 = arith.mulf %870, %867 : vector<8x256xf32>
    %872 = arith.addf %853, %871 : vector<8x256xf32>
    %c-1_i32_360 = arith.constant -1 : i32
    %873 = vector.broadcast %c-1_i32_360 : i32 to vector<8x256xi32>
    %874 = arith.cmpi sge, %8, %873 : vector<8x256xi32>
    %c15_i32_361 = arith.constant 15 : i32
    %875 = vector.broadcast %c15_i32_361 : i32 to vector<8x256xi32>
    %876 = arith.cmpi slt, %8, %875 : vector<8x256xi32>
    %877 = arith.andi %874, %876 : vector<8x256xi1>
    %c-1_i32_362 = arith.constant -1 : i32
    %878 = vector.broadcast %c-1_i32_362 : i32 to vector<8x256xi32>
    %879 = arith.cmpi sge, %6, %878 : vector<8x256xi32>
    %880 = arith.andi %877, %879 : vector<8x256xi1>
    %c15_i32_363 = arith.constant 15 : i32
    %881 = vector.broadcast %c15_i32_363 : i32 to vector<8x256xi32>
    %882 = arith.cmpi slt, %6, %881 : vector<8x256xi32>
    %883 = arith.andi %880, %882 : vector<8x256xi1>
    %c239_i32 = arith.constant 239 : i32
    %884 = tpu.dynamic_rotate %3 by %c239_i32 dim 1 : vector<8x256xf32>, i32 -> vector<8x256xf32>
    %cst_364 = arith.constant 0.000000e+00 : f32
    %885 = vector.broadcast %cst_364 : f32 to vector<8x256xf32>
    %886 = arith.select %883, %884, %885 : vector<8x256xi1>, vector<8x256xf32>
    %c32 = arith.constant 32 : index
    %c0_365 = arith.constant 0 : index
    %c0_366 = arith.constant 0 : index
    %887 = vector.load %arg7[%c32, %c0_365, %c0_366] : memref<49x8x1xf32, #tpu.memory_space<vmem>>, vector<1x8x1xf32>
    %888 = vector.shape_cast %887 : vector<1x8x1xf32> to vector<8x1xf32>
    %889 = vector.broadcast %888 : vector<8x1xf32> to vector<8x256xf32>
    %890 = arith.mulf %889, %886 : vector<8x256xf32>
    %891 = arith.addf %872, %890 : vector<8x256xf32>
    %c-1_i32_367 = arith.constant -1 : i32
    %892 = vector.broadcast %c-1_i32_367 : i32 to vector<8x256xi32>
    %893 = arith.cmpi sge, %8, %892 : vector<8x256xi32>
    %c15_i32_368 = arith.constant 15 : i32
    %894 = vector.broadcast %c15_i32_368 : i32 to vector<8x256xi32>
    %895 = arith.cmpi slt, %8, %894 : vector<8x256xi32>
    %896 = arith.andi %893, %895 : vector<8x256xi1>
    %c-2_i32_369 = arith.constant -2 : i32
    %897 = vector.broadcast %c-2_i32_369 : i32 to vector<8x256xi32>
    %898 = arith.cmpi sge, %6, %897 : vector<8x256xi32>
    %899 = arith.andi %896, %898 : vector<8x256xi1>
    %c14_i32_370 = arith.constant 14 : i32
    %900 = vector.broadcast %c14_i32_370 : i32 to vector<8x256xi32>
    %901 = arith.cmpi slt, %6, %900 : vector<8x256xi32>
    %902 = arith.andi %899, %901 : vector<8x256xi1>
    %c238_i32 = arith.constant 238 : i32
    %903 = tpu.dynamic_rotate %3 by %c238_i32 dim 1 : vector<8x256xf32>, i32 -> vector<8x256xf32>
    %cst_371 = arith.constant 0.000000e+00 : f32
    %904 = vector.broadcast %cst_371 : f32 to vector<8x256xf32>
    %905 = arith.select %902, %903, %904 : vector<8x256xi1>, vector<8x256xf32>
    %c33 = arith.constant 33 : index
    %c0_372 = arith.constant 0 : index
    %c0_373 = arith.constant 0 : index
    %906 = vector.load %arg7[%c33, %c0_372, %c0_373] : memref<49x8x1xf32, #tpu.memory_space<vmem>>, vector<1x8x1xf32>
    %907 = vector.shape_cast %906 : vector<1x8x1xf32> to vector<8x1xf32>
    %908 = vector.broadcast %907 : vector<8x1xf32> to vector<8x256xf32>
    %909 = arith.mulf %908, %905 : vector<8x256xf32>
    %910 = arith.addf %891, %909 : vector<8x256xf32>
    %c-1_i32_374 = arith.constant -1 : i32
    %911 = vector.broadcast %c-1_i32_374 : i32 to vector<8x256xi32>
    %912 = arith.cmpi sge, %8, %911 : vector<8x256xi32>
    %c15_i32_375 = arith.constant 15 : i32
    %913 = vector.broadcast %c15_i32_375 : i32 to vector<8x256xi32>
    %914 = arith.cmpi slt, %8, %913 : vector<8x256xi32>
    %915 = arith.andi %912, %914 : vector<8x256xi1>
    %c-3_i32_376 = arith.constant -3 : i32
    %916 = vector.broadcast %c-3_i32_376 : i32 to vector<8x256xi32>
    %917 = arith.cmpi sge, %6, %916 : vector<8x256xi32>
    %918 = arith.andi %915, %917 : vector<8x256xi1>
    %c13_i32_377 = arith.constant 13 : i32
    %919 = vector.broadcast %c13_i32_377 : i32 to vector<8x256xi32>
    %920 = arith.cmpi slt, %6, %919 : vector<8x256xi32>
    %921 = arith.andi %918, %920 : vector<8x256xi1>
    %c237_i32 = arith.constant 237 : i32
    %922 = tpu.dynamic_rotate %3 by %c237_i32 dim 1 : vector<8x256xf32>, i32 -> vector<8x256xf32>
    %cst_378 = arith.constant 0.000000e+00 : f32
    %923 = vector.broadcast %cst_378 : f32 to vector<8x256xf32>
    %924 = arith.select %921, %922, %923 : vector<8x256xi1>, vector<8x256xf32>
    %c34 = arith.constant 34 : index
    %c0_379 = arith.constant 0 : index
    %c0_380 = arith.constant 0 : index
    %925 = vector.load %arg7[%c34, %c0_379, %c0_380] : memref<49x8x1xf32, #tpu.memory_space<vmem>>, vector<1x8x1xf32>
    %926 = vector.shape_cast %925 : vector<1x8x1xf32> to vector<8x1xf32>
    %927 = vector.broadcast %926 : vector<8x1xf32> to vector<8x256xf32>
    %928 = arith.mulf %927, %924 : vector<8x256xf32>
    %929 = arith.addf %910, %928 : vector<8x256xf32>
    %c-2_i32_381 = arith.constant -2 : i32
    %930 = vector.broadcast %c-2_i32_381 : i32 to vector<8x256xi32>
    %931 = arith.cmpi sge, %8, %930 : vector<8x256xi32>
    %c14_i32_382 = arith.constant 14 : i32
    %932 = vector.broadcast %c14_i32_382 : i32 to vector<8x256xi32>
    %933 = arith.cmpi slt, %8, %932 : vector<8x256xi32>
    %934 = arith.andi %931, %933 : vector<8x256xi1>
    %c3_i32_383 = arith.constant 3 : i32
    %935 = vector.broadcast %c3_i32_383 : i32 to vector<8x256xi32>
    %936 = arith.cmpi sge, %6, %935 : vector<8x256xi32>
    %937 = arith.andi %934, %936 : vector<8x256xi1>
    %c19_i32_384 = arith.constant 19 : i32
    %938 = vector.broadcast %c19_i32_384 : i32 to vector<8x256xi32>
    %939 = arith.cmpi slt, %6, %938 : vector<8x256xi32>
    %940 = arith.andi %937, %939 : vector<8x256xi1>
    %c227_i32 = arith.constant 227 : i32
    %941 = tpu.dynamic_rotate %3 by %c227_i32 dim 1 : vector<8x256xf32>, i32 -> vector<8x256xf32>
    %cst_385 = arith.constant 0.000000e+00 : f32
    %942 = vector.broadcast %cst_385 : f32 to vector<8x256xf32>
    %943 = arith.select %940, %941, %942 : vector<8x256xi1>, vector<8x256xf32>
    %c35 = arith.constant 35 : index
    %c0_386 = arith.constant 0 : index
    %c0_387 = arith.constant 0 : index
    %944 = vector.load %arg7[%c35, %c0_386, %c0_387] : memref<49x8x1xf32, #tpu.memory_space<vmem>>, vector<1x8x1xf32>
    %945 = vector.shape_cast %944 : vector<1x8x1xf32> to vector<8x1xf32>
    %946 = vector.broadcast %945 : vector<8x1xf32> to vector<8x256xf32>
    %947 = arith.mulf %946, %943 : vector<8x256xf32>
    %948 = arith.addf %929, %947 : vector<8x256xf32>
    %c-2_i32_388 = arith.constant -2 : i32
    %949 = vector.broadcast %c-2_i32_388 : i32 to vector<8x256xi32>
    %950 = arith.cmpi sge, %8, %949 : vector<8x256xi32>
    %c14_i32_389 = arith.constant 14 : i32
    %951 = vector.broadcast %c14_i32_389 : i32 to vector<8x256xi32>
    %952 = arith.cmpi slt, %8, %951 : vector<8x256xi32>
    %953 = arith.andi %950, %952 : vector<8x256xi1>
    %c2_i32_390 = arith.constant 2 : i32
    %954 = vector.broadcast %c2_i32_390 : i32 to vector<8x256xi32>
    %955 = arith.cmpi sge, %6, %954 : vector<8x256xi32>
    %956 = arith.andi %953, %955 : vector<8x256xi1>
    %c18_i32_391 = arith.constant 18 : i32
    %957 = vector.broadcast %c18_i32_391 : i32 to vector<8x256xi32>
    %958 = arith.cmpi slt, %6, %957 : vector<8x256xi32>
    %959 = arith.andi %956, %958 : vector<8x256xi1>
    %c226_i32 = arith.constant 226 : i32
    %960 = tpu.dynamic_rotate %3 by %c226_i32 dim 1 : vector<8x256xf32>, i32 -> vector<8x256xf32>
    %cst_392 = arith.constant 0.000000e+00 : f32
    %961 = vector.broadcast %cst_392 : f32 to vector<8x256xf32>
    %962 = arith.select %959, %960, %961 : vector<8x256xi1>, vector<8x256xf32>
    %c36 = arith.constant 36 : index
    %c0_393 = arith.constant 0 : index
    %c0_394 = arith.constant 0 : index
    %963 = vector.load %arg7[%c36, %c0_393, %c0_394] : memref<49x8x1xf32, #tpu.memory_space<vmem>>, vector<1x8x1xf32>
    %964 = vector.shape_cast %963 : vector<1x8x1xf32> to vector<8x1xf32>
    %965 = vector.broadcast %964 : vector<8x1xf32> to vector<8x256xf32>
    %966 = arith.mulf %965, %962 : vector<8x256xf32>
    %967 = arith.addf %948, %966 : vector<8x256xf32>
    %c-2_i32_395 = arith.constant -2 : i32
    %968 = vector.broadcast %c-2_i32_395 : i32 to vector<8x256xi32>
    %969 = arith.cmpi sge, %8, %968 : vector<8x256xi32>
    %c14_i32_396 = arith.constant 14 : i32
    %970 = vector.broadcast %c14_i32_396 : i32 to vector<8x256xi32>
    %971 = arith.cmpi slt, %8, %970 : vector<8x256xi32>
    %972 = arith.andi %969, %971 : vector<8x256xi1>
    %c1_i32_397 = arith.constant 1 : i32
    %973 = vector.broadcast %c1_i32_397 : i32 to vector<8x256xi32>
    %974 = arith.cmpi sge, %6, %973 : vector<8x256xi32>
    %975 = arith.andi %972, %974 : vector<8x256xi1>
    %c17_i32_398 = arith.constant 17 : i32
    %976 = vector.broadcast %c17_i32_398 : i32 to vector<8x256xi32>
    %977 = arith.cmpi slt, %6, %976 : vector<8x256xi32>
    %978 = arith.andi %975, %977 : vector<8x256xi1>
    %c225_i32 = arith.constant 225 : i32
    %979 = tpu.dynamic_rotate %3 by %c225_i32 dim 1 : vector<8x256xf32>, i32 -> vector<8x256xf32>
    %cst_399 = arith.constant 0.000000e+00 : f32
    %980 = vector.broadcast %cst_399 : f32 to vector<8x256xf32>
    %981 = arith.select %978, %979, %980 : vector<8x256xi1>, vector<8x256xf32>
    %c37 = arith.constant 37 : index
    %c0_400 = arith.constant 0 : index
    %c0_401 = arith.constant 0 : index
    %982 = vector.load %arg7[%c37, %c0_400, %c0_401] : memref<49x8x1xf32, #tpu.memory_space<vmem>>, vector<1x8x1xf32>
    %983 = vector.shape_cast %982 : vector<1x8x1xf32> to vector<8x1xf32>
    %984 = vector.broadcast %983 : vector<8x1xf32> to vector<8x256xf32>
    %985 = arith.mulf %984, %981 : vector<8x256xf32>
    %986 = arith.addf %967, %985 : vector<8x256xf32>
    %c-2_i32_402 = arith.constant -2 : i32
    %987 = vector.broadcast %c-2_i32_402 : i32 to vector<8x256xi32>
    %988 = arith.cmpi sge, %8, %987 : vector<8x256xi32>
    %c14_i32_403 = arith.constant 14 : i32
    %989 = vector.broadcast %c14_i32_403 : i32 to vector<8x256xi32>
    %990 = arith.cmpi slt, %8, %989 : vector<8x256xi32>
    %991 = arith.andi %988, %990 : vector<8x256xi1>
    %c0_i32_404 = arith.constant 0 : i32
    %992 = vector.broadcast %c0_i32_404 : i32 to vector<8x256xi32>
    %993 = arith.cmpi sge, %6, %992 : vector<8x256xi32>
    %994 = arith.andi %991, %993 : vector<8x256xi1>
    %c16_i32_405 = arith.constant 16 : i32
    %995 = vector.broadcast %c16_i32_405 : i32 to vector<8x256xi32>
    %996 = arith.cmpi slt, %6, %995 : vector<8x256xi32>
    %997 = arith.andi %994, %996 : vector<8x256xi1>
    %c224_i32_406 = arith.constant 224 : i32
    %998 = tpu.dynamic_rotate %3 by %c224_i32_406 dim 1 : vector<8x256xf32>, i32 -> vector<8x256xf32>
    %cst_407 = arith.constant 0.000000e+00 : f32
    %999 = vector.broadcast %cst_407 : f32 to vector<8x256xf32>
    %1000 = arith.select %997, %998, %999 : vector<8x256xi1>, vector<8x256xf32>
    %c38 = arith.constant 38 : index
    %c0_408 = arith.constant 0 : index
    %c0_409 = arith.constant 0 : index
    %1001 = vector.load %arg7[%c38, %c0_408, %c0_409] : memref<49x8x1xf32, #tpu.memory_space<vmem>>, vector<1x8x1xf32>
    %1002 = vector.shape_cast %1001 : vector<1x8x1xf32> to vector<8x1xf32>
    %1003 = vector.broadcast %1002 : vector<8x1xf32> to vector<8x256xf32>
    %1004 = arith.mulf %1003, %1000 : vector<8x256xf32>
    %1005 = arith.addf %986, %1004 : vector<8x256xf32>
    %c-2_i32_410 = arith.constant -2 : i32
    %1006 = vector.broadcast %c-2_i32_410 : i32 to vector<8x256xi32>
    %1007 = arith.cmpi sge, %8, %1006 : vector<8x256xi32>
    %c14_i32_411 = arith.constant 14 : i32
    %1008 = vector.broadcast %c14_i32_411 : i32 to vector<8x256xi32>
    %1009 = arith.cmpi slt, %8, %1008 : vector<8x256xi32>
    %1010 = arith.andi %1007, %1009 : vector<8x256xi1>
    %c-1_i32_412 = arith.constant -1 : i32
    %1011 = vector.broadcast %c-1_i32_412 : i32 to vector<8x256xi32>
    %1012 = arith.cmpi sge, %6, %1011 : vector<8x256xi32>
    %1013 = arith.andi %1010, %1012 : vector<8x256xi1>
    %c15_i32_413 = arith.constant 15 : i32
    %1014 = vector.broadcast %c15_i32_413 : i32 to vector<8x256xi32>
    %1015 = arith.cmpi slt, %6, %1014 : vector<8x256xi32>
    %1016 = arith.andi %1013, %1015 : vector<8x256xi1>
    %c223_i32 = arith.constant 223 : i32
    %1017 = tpu.dynamic_rotate %3 by %c223_i32 dim 1 : vector<8x256xf32>, i32 -> vector<8x256xf32>
    %cst_414 = arith.constant 0.000000e+00 : f32
    %1018 = vector.broadcast %cst_414 : f32 to vector<8x256xf32>
    %1019 = arith.select %1016, %1017, %1018 : vector<8x256xi1>, vector<8x256xf32>
    %c39 = arith.constant 39 : index
    %c0_415 = arith.constant 0 : index
    %c0_416 = arith.constant 0 : index
    %1020 = vector.load %arg7[%c39, %c0_415, %c0_416] : memref<49x8x1xf32, #tpu.memory_space<vmem>>, vector<1x8x1xf32>
    %1021 = vector.shape_cast %1020 : vector<1x8x1xf32> to vector<8x1xf32>
    %1022 = vector.broadcast %1021 : vector<8x1xf32> to vector<8x256xf32>
    %1023 = arith.mulf %1022, %1019 : vector<8x256xf32>
    %1024 = arith.addf %1005, %1023 : vector<8x256xf32>
    %c-2_i32_417 = arith.constant -2 : i32
    %1025 = vector.broadcast %c-2_i32_417 : i32 to vector<8x256xi32>
    %1026 = arith.cmpi sge, %8, %1025 : vector<8x256xi32>
    %c14_i32_418 = arith.constant 14 : i32
    %1027 = vector.broadcast %c14_i32_418 : i32 to vector<8x256xi32>
    %1028 = arith.cmpi slt, %8, %1027 : vector<8x256xi32>
    %1029 = arith.andi %1026, %1028 : vector<8x256xi1>
    %c-2_i32_419 = arith.constant -2 : i32
    %1030 = vector.broadcast %c-2_i32_419 : i32 to vector<8x256xi32>
    %1031 = arith.cmpi sge, %6, %1030 : vector<8x256xi32>
    %1032 = arith.andi %1029, %1031 : vector<8x256xi1>
    %c14_i32_420 = arith.constant 14 : i32
    %1033 = vector.broadcast %c14_i32_420 : i32 to vector<8x256xi32>
    %1034 = arith.cmpi slt, %6, %1033 : vector<8x256xi32>
    %1035 = arith.andi %1032, %1034 : vector<8x256xi1>
    %c222_i32 = arith.constant 222 : i32
    %1036 = tpu.dynamic_rotate %3 by %c222_i32 dim 1 : vector<8x256xf32>, i32 -> vector<8x256xf32>
    %cst_421 = arith.constant 0.000000e+00 : f32
    %1037 = vector.broadcast %cst_421 : f32 to vector<8x256xf32>
    %1038 = arith.select %1035, %1036, %1037 : vector<8x256xi1>, vector<8x256xf32>
    %c40 = arith.constant 40 : index
    %c0_422 = arith.constant 0 : index
    %c0_423 = arith.constant 0 : index
    %1039 = vector.load %arg7[%c40, %c0_422, %c0_423] : memref<49x8x1xf32, #tpu.memory_space<vmem>>, vector<1x8x1xf32>
    %1040 = vector.shape_cast %1039 : vector<1x8x1xf32> to vector<8x1xf32>
    %1041 = vector.broadcast %1040 : vector<8x1xf32> to vector<8x256xf32>
    %1042 = arith.mulf %1041, %1038 : vector<8x256xf32>
    %1043 = arith.addf %1024, %1042 : vector<8x256xf32>
    %c-2_i32_424 = arith.constant -2 : i32
    %1044 = vector.broadcast %c-2_i32_424 : i32 to vector<8x256xi32>
    %1045 = arith.cmpi sge, %8, %1044 : vector<8x256xi32>
    %c14_i32_425 = arith.constant 14 : i32
    %1046 = vector.broadcast %c14_i32_425 : i32 to vector<8x256xi32>
    %1047 = arith.cmpi slt, %8, %1046 : vector<8x256xi32>
    %1048 = arith.andi %1045, %1047 : vector<8x256xi1>
    %c-3_i32_426 = arith.constant -3 : i32
    %1049 = vector.broadcast %c-3_i32_426 : i32 to vector<8x256xi32>
    %1050 = arith.cmpi sge, %6, %1049 : vector<8x256xi32>
    %1051 = arith.andi %1048, %1050 : vector<8x256xi1>
    %c13_i32_427 = arith.constant 13 : i32
    %1052 = vector.broadcast %c13_i32_427 : i32 to vector<8x256xi32>
    %1053 = arith.cmpi slt, %6, %1052 : vector<8x256xi32>
    %1054 = arith.andi %1051, %1053 : vector<8x256xi1>
    %c221_i32 = arith.constant 221 : i32
    %1055 = tpu.dynamic_rotate %3 by %c221_i32 dim 1 : vector<8x256xf32>, i32 -> vector<8x256xf32>
    %cst_428 = arith.constant 0.000000e+00 : f32
    %1056 = vector.broadcast %cst_428 : f32 to vector<8x256xf32>
    %1057 = arith.select %1054, %1055, %1056 : vector<8x256xi1>, vector<8x256xf32>
    %c41 = arith.constant 41 : index
    %c0_429 = arith.constant 0 : index
    %c0_430 = arith.constant 0 : index
    %1058 = vector.load %arg7[%c41, %c0_429, %c0_430] : memref<49x8x1xf32, #tpu.memory_space<vmem>>, vector<1x8x1xf32>
    %1059 = vector.shape_cast %1058 : vector<1x8x1xf32> to vector<8x1xf32>
    %1060 = vector.broadcast %1059 : vector<8x1xf32> to vector<8x256xf32>
    %1061 = arith.mulf %1060, %1057 : vector<8x256xf32>
    %1062 = arith.addf %1043, %1061 : vector<8x256xf32>
    %c-3_i32_431 = arith.constant -3 : i32
    %1063 = vector.broadcast %c-3_i32_431 : i32 to vector<8x256xi32>
    %1064 = arith.cmpi sge, %8, %1063 : vector<8x256xi32>
    %c13_i32_432 = arith.constant 13 : i32
    %1065 = vector.broadcast %c13_i32_432 : i32 to vector<8x256xi32>
    %1066 = arith.cmpi slt, %8, %1065 : vector<8x256xi32>
    %1067 = arith.andi %1064, %1066 : vector<8x256xi1>
    %c3_i32_433 = arith.constant 3 : i32
    %1068 = vector.broadcast %c3_i32_433 : i32 to vector<8x256xi32>
    %1069 = arith.cmpi sge, %6, %1068 : vector<8x256xi32>
    %1070 = arith.andi %1067, %1069 : vector<8x256xi1>
    %c19_i32_434 = arith.constant 19 : i32
    %1071 = vector.broadcast %c19_i32_434 : i32 to vector<8x256xi32>
    %1072 = arith.cmpi slt, %6, %1071 : vector<8x256xi32>
    %1073 = arith.andi %1070, %1072 : vector<8x256xi1>
    %c211_i32 = arith.constant 211 : i32
    %1074 = tpu.dynamic_rotate %3 by %c211_i32 dim 1 : vector<8x256xf32>, i32 -> vector<8x256xf32>
    %cst_435 = arith.constant 0.000000e+00 : f32
    %1075 = vector.broadcast %cst_435 : f32 to vector<8x256xf32>
    %1076 = arith.select %1073, %1074, %1075 : vector<8x256xi1>, vector<8x256xf32>
    %c42 = arith.constant 42 : index
    %c0_436 = arith.constant 0 : index
    %c0_437 = arith.constant 0 : index
    %1077 = vector.load %arg7[%c42, %c0_436, %c0_437] : memref<49x8x1xf32, #tpu.memory_space<vmem>>, vector<1x8x1xf32>
    %1078 = vector.shape_cast %1077 : vector<1x8x1xf32> to vector<8x1xf32>
    %1079 = vector.broadcast %1078 : vector<8x1xf32> to vector<8x256xf32>
    %1080 = arith.mulf %1079, %1076 : vector<8x256xf32>
    %1081 = arith.addf %1062, %1080 : vector<8x256xf32>
    %c-3_i32_438 = arith.constant -3 : i32
    %1082 = vector.broadcast %c-3_i32_438 : i32 to vector<8x256xi32>
    %1083 = arith.cmpi sge, %8, %1082 : vector<8x256xi32>
    %c13_i32_439 = arith.constant 13 : i32
    %1084 = vector.broadcast %c13_i32_439 : i32 to vector<8x256xi32>
    %1085 = arith.cmpi slt, %8, %1084 : vector<8x256xi32>
    %1086 = arith.andi %1083, %1085 : vector<8x256xi1>
    %c2_i32_440 = arith.constant 2 : i32
    %1087 = vector.broadcast %c2_i32_440 : i32 to vector<8x256xi32>
    %1088 = arith.cmpi sge, %6, %1087 : vector<8x256xi32>
    %1089 = arith.andi %1086, %1088 : vector<8x256xi1>
    %c18_i32_441 = arith.constant 18 : i32
    %1090 = vector.broadcast %c18_i32_441 : i32 to vector<8x256xi32>
    %1091 = arith.cmpi slt, %6, %1090 : vector<8x256xi32>
    %1092 = arith.andi %1089, %1091 : vector<8x256xi1>
    %c210_i32 = arith.constant 210 : i32
    %1093 = tpu.dynamic_rotate %3 by %c210_i32 dim 1 : vector<8x256xf32>, i32 -> vector<8x256xf32>
    %cst_442 = arith.constant 0.000000e+00 : f32
    %1094 = vector.broadcast %cst_442 : f32 to vector<8x256xf32>
    %1095 = arith.select %1092, %1093, %1094 : vector<8x256xi1>, vector<8x256xf32>
    %c43 = arith.constant 43 : index
    %c0_443 = arith.constant 0 : index
    %c0_444 = arith.constant 0 : index
    %1096 = vector.load %arg7[%c43, %c0_443, %c0_444] : memref<49x8x1xf32, #tpu.memory_space<vmem>>, vector<1x8x1xf32>
    %1097 = vector.shape_cast %1096 : vector<1x8x1xf32> to vector<8x1xf32>
    %1098 = vector.broadcast %1097 : vector<8x1xf32> to vector<8x256xf32>
    %1099 = arith.mulf %1098, %1095 : vector<8x256xf32>
    %1100 = arith.addf %1081, %1099 : vector<8x256xf32>
    %c-3_i32_445 = arith.constant -3 : i32
    %1101 = vector.broadcast %c-3_i32_445 : i32 to vector<8x256xi32>
    %1102 = arith.cmpi sge, %8, %1101 : vector<8x256xi32>
    %c13_i32_446 = arith.constant 13 : i32
    %1103 = vector.broadcast %c13_i32_446 : i32 to vector<8x256xi32>
    %1104 = arith.cmpi slt, %8, %1103 : vector<8x256xi32>
    %1105 = arith.andi %1102, %1104 : vector<8x256xi1>
    %c1_i32_447 = arith.constant 1 : i32
    %1106 = vector.broadcast %c1_i32_447 : i32 to vector<8x256xi32>
    %1107 = arith.cmpi sge, %6, %1106 : vector<8x256xi32>
    %1108 = arith.andi %1105, %1107 : vector<8x256xi1>
    %c17_i32_448 = arith.constant 17 : i32
    %1109 = vector.broadcast %c17_i32_448 : i32 to vector<8x256xi32>
    %1110 = arith.cmpi slt, %6, %1109 : vector<8x256xi32>
    %1111 = arith.andi %1108, %1110 : vector<8x256xi1>
    %c209_i32 = arith.constant 209 : i32
    %1112 = tpu.dynamic_rotate %3 by %c209_i32 dim 1 : vector<8x256xf32>, i32 -> vector<8x256xf32>
    %cst_449 = arith.constant 0.000000e+00 : f32
    %1113 = vector.broadcast %cst_449 : f32 to vector<8x256xf32>
    %1114 = arith.select %1111, %1112, %1113 : vector<8x256xi1>, vector<8x256xf32>
    %c44 = arith.constant 44 : index
    %c0_450 = arith.constant 0 : index
    %c0_451 = arith.constant 0 : index
    %1115 = vector.load %arg7[%c44, %c0_450, %c0_451] : memref<49x8x1xf32, #tpu.memory_space<vmem>>, vector<1x8x1xf32>
    %1116 = vector.shape_cast %1115 : vector<1x8x1xf32> to vector<8x1xf32>
    %1117 = vector.broadcast %1116 : vector<8x1xf32> to vector<8x256xf32>
    %1118 = arith.mulf %1117, %1114 : vector<8x256xf32>
    %1119 = arith.addf %1100, %1118 : vector<8x256xf32>
    %c-3_i32_452 = arith.constant -3 : i32
    %1120 = vector.broadcast %c-3_i32_452 : i32 to vector<8x256xi32>
    %1121 = arith.cmpi sge, %8, %1120 : vector<8x256xi32>
    %c13_i32_453 = arith.constant 13 : i32
    %1122 = vector.broadcast %c13_i32_453 : i32 to vector<8x256xi32>
    %1123 = arith.cmpi slt, %8, %1122 : vector<8x256xi32>
    %1124 = arith.andi %1121, %1123 : vector<8x256xi1>
    %c0_i32_454 = arith.constant 0 : i32
    %1125 = vector.broadcast %c0_i32_454 : i32 to vector<8x256xi32>
    %1126 = arith.cmpi sge, %6, %1125 : vector<8x256xi32>
    %1127 = arith.andi %1124, %1126 : vector<8x256xi1>
    %c16_i32_455 = arith.constant 16 : i32
    %1128 = vector.broadcast %c16_i32_455 : i32 to vector<8x256xi32>
    %1129 = arith.cmpi slt, %6, %1128 : vector<8x256xi32>
    %1130 = arith.andi %1127, %1129 : vector<8x256xi1>
    %c208_i32_456 = arith.constant 208 : i32
    %1131 = tpu.dynamic_rotate %3 by %c208_i32_456 dim 1 : vector<8x256xf32>, i32 -> vector<8x256xf32>
    %cst_457 = arith.constant 0.000000e+00 : f32
    %1132 = vector.broadcast %cst_457 : f32 to vector<8x256xf32>
    %1133 = arith.select %1130, %1131, %1132 : vector<8x256xi1>, vector<8x256xf32>
    %c45 = arith.constant 45 : index
    %c0_458 = arith.constant 0 : index
    %c0_459 = arith.constant 0 : index
    %1134 = vector.load %arg7[%c45, %c0_458, %c0_459] : memref<49x8x1xf32, #tpu.memory_space<vmem>>, vector<1x8x1xf32>
    %1135 = vector.shape_cast %1134 : vector<1x8x1xf32> to vector<8x1xf32>
    %1136 = vector.broadcast %1135 : vector<8x1xf32> to vector<8x256xf32>
    %1137 = arith.mulf %1136, %1133 : vector<8x256xf32>
    %1138 = arith.addf %1119, %1137 : vector<8x256xf32>
    %c-3_i32_460 = arith.constant -3 : i32
    %1139 = vector.broadcast %c-3_i32_460 : i32 to vector<8x256xi32>
    %1140 = arith.cmpi sge, %8, %1139 : vector<8x256xi32>
    %c13_i32_461 = arith.constant 13 : i32
    %1141 = vector.broadcast %c13_i32_461 : i32 to vector<8x256xi32>
    %1142 = arith.cmpi slt, %8, %1141 : vector<8x256xi32>
    %1143 = arith.andi %1140, %1142 : vector<8x256xi1>
    %c-1_i32_462 = arith.constant -1 : i32
    %1144 = vector.broadcast %c-1_i32_462 : i32 to vector<8x256xi32>
    %1145 = arith.cmpi sge, %6, %1144 : vector<8x256xi32>
    %1146 = arith.andi %1143, %1145 : vector<8x256xi1>
    %c15_i32_463 = arith.constant 15 : i32
    %1147 = vector.broadcast %c15_i32_463 : i32 to vector<8x256xi32>
    %1148 = arith.cmpi slt, %6, %1147 : vector<8x256xi32>
    %1149 = arith.andi %1146, %1148 : vector<8x256xi1>
    %c207_i32 = arith.constant 207 : i32
    %1150 = tpu.dynamic_rotate %3 by %c207_i32 dim 1 : vector<8x256xf32>, i32 -> vector<8x256xf32>
    %cst_464 = arith.constant 0.000000e+00 : f32
    %1151 = vector.broadcast %cst_464 : f32 to vector<8x256xf32>
    %1152 = arith.select %1149, %1150, %1151 : vector<8x256xi1>, vector<8x256xf32>
    %c46 = arith.constant 46 : index
    %c0_465 = arith.constant 0 : index
    %c0_466 = arith.constant 0 : index
    %1153 = vector.load %arg7[%c46, %c0_465, %c0_466] : memref<49x8x1xf32, #tpu.memory_space<vmem>>, vector<1x8x1xf32>
    %1154 = vector.shape_cast %1153 : vector<1x8x1xf32> to vector<8x1xf32>
    %1155 = vector.broadcast %1154 : vector<8x1xf32> to vector<8x256xf32>
    %1156 = arith.mulf %1155, %1152 : vector<8x256xf32>
    %1157 = arith.addf %1138, %1156 : vector<8x256xf32>
    %c-3_i32_467 = arith.constant -3 : i32
    %1158 = vector.broadcast %c-3_i32_467 : i32 to vector<8x256xi32>
    %1159 = arith.cmpi sge, %8, %1158 : vector<8x256xi32>
    %c13_i32_468 = arith.constant 13 : i32
    %1160 = vector.broadcast %c13_i32_468 : i32 to vector<8x256xi32>
    %1161 = arith.cmpi slt, %8, %1160 : vector<8x256xi32>
    %1162 = arith.andi %1159, %1161 : vector<8x256xi1>
    %c-2_i32_469 = arith.constant -2 : i32
    %1163 = vector.broadcast %c-2_i32_469 : i32 to vector<8x256xi32>
    %1164 = arith.cmpi sge, %6, %1163 : vector<8x256xi32>
    %1165 = arith.andi %1162, %1164 : vector<8x256xi1>
    %c14_i32_470 = arith.constant 14 : i32
    %1166 = vector.broadcast %c14_i32_470 : i32 to vector<8x256xi32>
    %1167 = arith.cmpi slt, %6, %1166 : vector<8x256xi32>
    %1168 = arith.andi %1165, %1167 : vector<8x256xi1>
    %c206_i32 = arith.constant 206 : i32
    %1169 = tpu.dynamic_rotate %3 by %c206_i32 dim 1 : vector<8x256xf32>, i32 -> vector<8x256xf32>
    %cst_471 = arith.constant 0.000000e+00 : f32
    %1170 = vector.broadcast %cst_471 : f32 to vector<8x256xf32>
    %1171 = arith.select %1168, %1169, %1170 : vector<8x256xi1>, vector<8x256xf32>
    %c47 = arith.constant 47 : index
    %c0_472 = arith.constant 0 : index
    %c0_473 = arith.constant 0 : index
    %1172 = vector.load %arg7[%c47, %c0_472, %c0_473] : memref<49x8x1xf32, #tpu.memory_space<vmem>>, vector<1x8x1xf32>
    %1173 = vector.shape_cast %1172 : vector<1x8x1xf32> to vector<8x1xf32>
    %1174 = vector.broadcast %1173 : vector<8x1xf32> to vector<8x256xf32>
    %1175 = arith.mulf %1174, %1171 : vector<8x256xf32>
    %1176 = arith.addf %1157, %1175 : vector<8x256xf32>
    %c-3_i32_474 = arith.constant -3 : i32
    %1177 = vector.broadcast %c-3_i32_474 : i32 to vector<8x256xi32>
    %1178 = arith.cmpi sge, %8, %1177 : vector<8x256xi32>
    %c13_i32_475 = arith.constant 13 : i32
    %1179 = vector.broadcast %c13_i32_475 : i32 to vector<8x256xi32>
    %1180 = arith.cmpi slt, %8, %1179 : vector<8x256xi32>
    %1181 = arith.andi %1178, %1180 : vector<8x256xi1>
    %c-3_i32_476 = arith.constant -3 : i32
    %1182 = vector.broadcast %c-3_i32_476 : i32 to vector<8x256xi32>
    %1183 = arith.cmpi sge, %6, %1182 : vector<8x256xi32>
    %1184 = arith.andi %1181, %1183 : vector<8x256xi1>
    %c13_i32_477 = arith.constant 13 : i32
    %1185 = vector.broadcast %c13_i32_477 : i32 to vector<8x256xi32>
    %1186 = arith.cmpi slt, %6, %1185 : vector<8x256xi32>
    %1187 = arith.andi %1184, %1186 : vector<8x256xi1>
    %c205_i32 = arith.constant 205 : i32
    %1188 = tpu.dynamic_rotate %3 by %c205_i32 dim 1 : vector<8x256xf32>, i32 -> vector<8x256xf32>
    %cst_478 = arith.constant 0.000000e+00 : f32
    %1189 = vector.broadcast %cst_478 : f32 to vector<8x256xf32>
    %1190 = arith.select %1187, %1188, %1189 : vector<8x256xi1>, vector<8x256xf32>
    %c48 = arith.constant 48 : index
    %c0_479 = arith.constant 0 : index
    %c0_480 = arith.constant 0 : index
    %1191 = vector.load %arg7[%c48, %c0_479, %c0_480] : memref<49x8x1xf32, #tpu.memory_space<vmem>>, vector<1x8x1xf32>
    %1192 = vector.shape_cast %1191 : vector<1x8x1xf32> to vector<8x1xf32>
    %1193 = vector.broadcast %1192 : vector<8x1xf32> to vector<8x256xf32>
    %1194 = arith.mulf %1193, %1190 : vector<8x256xf32>
    %1195 = arith.addf %1176, %1194 : vector<8x256xf32>
    %c0_481 = arith.constant 0 : index
    %c0_482 = arith.constant 0 : index
    %1196 = vector.load %arg8[%c0_481, %c0_482] : memref<8x1xf32, #tpu.memory_space<vmem>>, vector<8x1xf32>
    %1197 = vector.broadcast %1196 : vector<8x1xf32> to vector<8x256xf32>
    %1198 = arith.addf %1195, %1197 : vector<8x256xf32>
    %1199 = tpu.concatenate %264, %1198 in 0 : vector<8x256xf32>, vector<8x256xf32> -> vector<16x256xf32>
    %cst_483 = arith.constant dense<0.000000e+00> : vector<256xf32>
    %1200 = vector.multi_reduction <add>, %1199, %cst_483 [0] : vector<16x256xf32> to vector<256xf32>
    %1201 = vector.shape_cast %1200 : vector<256xf32> to vector<1x256xf32>
    %cst_484 = arith.constant 6.250000e-02 : f32
    %1202 = vector.broadcast %cst_484 : f32 to vector<1x256xf32>
    %1203 = arith.mulf %1201, %1202 : vector<1x256xf32>
    %1204 = vector.broadcast %1203 : vector<1x256xf32> to vector<16x256xf32>
    %1205 = arith.subf %1199, %1204 : vector<16x256xf32>
    %1206 = arith.mulf %1205, %1205 : vector<16x256xf32>
    %cst_485 = arith.constant dense<0.000000e+00> : vector<256xf32>
    %1207 = vector.multi_reduction <add>, %1206, %cst_485 [0] : vector<16x256xf32> to vector<256xf32>
    %1208 = vector.shape_cast %1207 : vector<256xf32> to vector<1x256xf32>
    %cst_486 = arith.constant 6.250000e-02 : f32
    %1209 = vector.broadcast %cst_486 : f32 to vector<1x256xf32>
    %1210 = arith.mulf %1208, %1209 : vector<1x256xf32>
    %cst_487 = arith.constant 9.99999997E-7 : f32
    %1211 = vector.broadcast %cst_487 : f32 to vector<1x256xf32>
    %1212 = arith.addf %1210, %1211 : vector<1x256xf32>
    %1213 = math.rsqrt %1212 : vector<1x256xf32>
    %1214 = vector.broadcast %1213 : vector<1x256xf32> to vector<16x256xf32>
    %1215 = arith.mulf %1205, %1214 : vector<16x256xf32>
    %c0_488 = arith.constant 0 : index
    %c0_489 = arith.constant 0 : index
    %1216 = vector.load %arg9[%c0_488, %c0_489] : memref<64x16xf32, #tpu.memory_space<vmem>>, vector<64x16xf32>
    %cst_490 = arith.constant dense<0.000000e+00> : vector<64x256xf32>
    %1217 = tpu.matmul %1216, %1215, %cst_490 {dimension_numbers = #tpu.dot_dimension_numbers<[1], [0], [0], [1], [0, 0, 1, 1], [], []>} : vector<64x16xf32>, vector<16x256xf32>, vector<64x256xf32> -> vector<64x256xf32>
    %c0_491 = arith.constant 0 : index
    %c0_492 = arith.constant 0 : index
    %1218 = vector.load %arg10[%c0_491, %c0_492] : memref<64x1xf32, #tpu.memory_space<vmem>>, vector<64x1xf32>
    %1219 = vector.broadcast %1218 : vector<64x1xf32> to vector<64x256xf32>
    %1220 = arith.addf %1217, %1219 : vector<64x256xf32>
    %cst_493 = arith.constant 5.000000e-01 : f32
    %1221 = vector.broadcast %cst_493 : f32 to vector<64x256xf32>
    %1222 = arith.mulf %1221, %1220 : vector<64x256xf32>
    %1223 = arith.mulf %1220, %1220 : vector<64x256xf32>
    %1224 = arith.mulf %1223, %1220 : vector<64x256xf32>
    %cst_494 = arith.constant 4.471500e-02 : f32
    %1225 = vector.broadcast %cst_494 : f32 to vector<64x256xf32>
    %1226 = arith.mulf %1225, %1224 : vector<64x256xf32>
    %1227 = arith.addf %1220, %1226 : vector<64x256xf32>
    %cst_495 = arith.constant 0.797884583 : f32
    %1228 = vector.broadcast %cst_495 : f32 to vector<64x256xf32>
    %1229 = arith.mulf %1228, %1227 : vector<64x256xf32>
    %1230 = math.tanh %1229 : vector<64x256xf32>
    %cst_496 = arith.constant 1.000000e+00 : f32
    %1231 = vector.broadcast %cst_496 : f32 to vector<64x256xf32>
    %1232 = arith.addf %1231, %1230 : vector<64x256xf32>
    %1233 = arith.mulf %1222, %1232 : vector<64x256xf32>
    %c0_497 = arith.constant 0 : index
    %c0_498 = arith.constant 0 : index
    %1234 = vector.load %arg11[%c0_497, %c0_498] : memref<16x64xf32, #tpu.memory_space<vmem>>, vector<16x64xf32>
    %cst_499 = arith.constant dense<0.000000e+00> : vector<16x256xf32>
    %1235 = tpu.matmul %1234, %1233, %cst_499 {dimension_numbers = #tpu.dot_dimension_numbers<[1], [0], [0], [1], [0, 0, 1, 1], [], []>} : vector<16x64xf32>, vector<64x256xf32>, vector<16x256xf32> -> vector<16x256xf32>
    %c0_500 = arith.constant 0 : index
    %c0_501 = arith.constant 0 : index
    %1236 = vector.load %arg12[%c0_500, %c0_501] : memref<16x1xf32, #tpu.memory_space<vmem>>, vector<16x1xf32>
    %1237 = vector.broadcast %1236 : vector<16x1xf32> to vector<16x256xf32>
    %1238 = arith.addf %1235, %1237 : vector<16x256xf32>
    %1239 = tpu.concatenate %1, %3 in 0 : vector<8x256xf32>, vector<8x256xf32> -> vector<16x256xf32>
    %1240 = arith.addf %1239, %1238 : vector<16x256xf32>
    %c0_502 = arith.constant 0 : index
    %c0_503 = arith.constant 0 : index
    %c0_504 = arith.constant 0 : index
    %1241 = vector.load %arg13[%c0_502, %c0_503, %c0_504] : memref<1x16x256xf32, #tpu.memory_space<vmem>>, vector<1x16x256xf32>
    %1242 = vector.shape_cast %1241 : vector<1x16x256xf32> to vector<16x256xf32>
    %1243 = vector.shape_cast %1240 : vector<16x256xf32> to vector<1x16x256xf32>
    tpu.vector_store %arg13[%c0_502, %c0_503, %c0_504], %1243 {strides = array<i32>} : memref<1x16x256xf32, #tpu.memory_space<vmem>>, vector<1x16x256xf32>,
    return
  }
  func.func @transform_0(%arg0: i32) -> (i32, i32, i32) {
    %c0_i32 = arith.constant 0 : i32
    %c0_i32_0 = arith.constant 0 : i32
    %c0_i32_1 = arith.constant 0 : i32
    return %arg0, %c0_i32, %c0_i32_0 : i32, i32, i32
  }
  func.func @transform_1(%arg0: i32) -> (i32, i32, i32) {
    %c1_i32 = arith.constant 1 : i32
    %c0_i32 = arith.constant 0 : i32
    %c0_i32_0 = arith.constant 0 : i32
    return %arg0, %c1_i32, %c0_i32 : i32, i32, i32
  }
  func.func @transform_2(%arg0: i32) -> (i32, i32) {
    %c0_i32 = arith.constant 0 : i32
    %c0_i32_0 = arith.constant 0 : i32
    %c0_i32_1 = arith.constant 0 : i32
    return %c0_i32, %c0_i32_0 : i32, i32
  }
  func.func @transform_3(%arg0: i32) -> (i32, i32, i32) {
    %c0_i32 = arith.constant 0 : i32
    %c0_i32_0 = arith.constant 0 : i32
    %c0_i32_1 = arith.constant 0 : i32
    %c0_i32_2 = arith.constant 0 : i32
    return %c0_i32, %c0_i32_0, %c0_i32_1 : i32, i32, i32
  }
  func.func @transform_4(%arg0: i32) -> (i32, i32, i32) {
    %c0_i32 = arith.constant 0 : i32
    %c0_i32_0 = arith.constant 0 : i32
    %c0_i32_1 = arith.constant 0 : i32
    %c0_i32_2 = arith.constant 0 : i32
    return %c0_i32, %c0_i32_0, %c0_i32_1 : i32, i32, i32
  }
  func.func @transform_5(%arg0: i32) -> (i32, i32) {
    %c0_i32 = arith.constant 0 : i32
    %c0_i32_0 = arith.constant 0 : i32
    %c0_i32_1 = arith.constant 0 : i32
    return %c0_i32, %c0_i32_0 : i32, i32
  }
  func.func @transform_6(%arg0: i32) -> (i32, i32, i32) {
    %c0_i32 = arith.constant 0 : i32
    %c0_i32_0 = arith.constant 0 : i32
    %c0_i32_1 = arith.constant 0 : i32
    %c0_i32_2 = arith.constant 0 : i32
    return %c0_i32, %c0_i32_0, %c0_i32_1 : i32, i32, i32
  }
  func.func @transform_7(%arg0: i32) -> (i32, i32) {
    %c0_i32 = arith.constant 0 : i32
    %c0_i32_0 = arith.constant 0 : i32
    %c0_i32_1 = arith.constant 0 : i32
    return %c0_i32, %c0_i32_0 : i32, i32
  }
  func.func @transform_8(%arg0: i32) -> (i32, i32) {
    %c0_i32 = arith.constant 0 : i32
    %c0_i32_0 = arith.constant 0 : i32
    %c0_i32_1 = arith.constant 0 : i32
    return %c0_i32, %c0_i32_0 : i32, i32
  }
  func.func @transform_9(%arg0: i32) -> (i32, i32) {
    %c0_i32 = arith.constant 0 : i32
    %c0_i32_0 = arith.constant 0 : i32
    %c0_i32_1 = arith.constant 0 : i32
    return %c0_i32, %c0_i32_0 : i32, i32
  }
  func.func @transform_10(%arg0: i32) -> (i32, i32) {
    %c0_i32 = arith.constant 0 : i32
    %c0_i32_0 = arith.constant 0 : i32
    %c0_i32_1 = arith.constant 0 : i32
    return %c0_i32, %c0_i32_0 : i32, i32
  }
  func.func @transform_11(%arg0: i32) -> (i32, i32) {
    %c0_i32 = arith.constant 0 : i32
    %c0_i32_0 = arith.constant 0 : i32
    %c0_i32_1 = arith.constant 0 : i32
    return %c0_i32, %c0_i32_0 : i32, i32
  }
  func.func @transform_12(%arg0: i32) -> (i32, i32, i32) {
    %c0_i32 = arith.constant 0 : i32
    %c0_i32_0 = arith.constant 0 : i32
    %c0_i32_1 = arith.constant 0 : i32
    return %arg0, %c0_i32, %c0_i32_0 : i32, i32, i32
  }
}

</mosaic_0001>

<bundles_post_ra>
// kernel: gcc_cvx_lg_block.1
= control target key start
LH: loop header
LB: loop body
LE: loop exit
PB: predicated region body
PF: predicated region fallthrough
CT: control target
= control target key end

     0   :  { %s3254_s21 = smov 0   ;;  %s5770_s0 = inlined_call_operand.vmem [shape: f32[2,16,256], index: 0, kind: input, shape index: {}, may-alias: {0,1}]   ;;  %s5771_s1 = inlined_call_operand.vmem [shape: f32[2,16,256], index: 1, kind: input, shape index: {}, may-alias: {0,1}]   ;;  %s5772_s2 = inlined_call_operand.vmem [shape: f32[8,256], index: 2, kind: input, shape index: {}]   ;;  %s5773_s3 = inlined_call_operand.vmem [shape: f32[16,8,1], index: 3, kind: input, shape index: {}]   ;;  %s5774_s4 = inlined_call_operand.vmem [shape: f32[16,8,1], index: 4, kind: input, shape index: {}]   ;;  %s5775_s5 = inlined_call_operand.vmem [shape: f32[8,1], index: 5, kind: input, shape index: {}]   ;;  %s5776_s6 = inlined_call_operand.vmem [shape: f32[49,8,1], index: 6, kind: input, shape index: {}]   ;;  %s5777_s7 = inlined_call_operand.vmem [shape: f32[8,1], index: 7, kind: input, shape index: {}]   ;;  %s5778_s8 = inlined_call_operand.vmem [shape: f32[64,16], index: 8, kind: input, shape index: {}]   ;;  %s5779_s9 = inlined_call_operand.vmem [shape: f32[64,1], index: 9, kind: input, shape index: {}]   ;;  %s5780_s10 = inlined_call_operand.vmem [shape: f32[16,64], index: 10, kind: input, shape index: {}]   ;;  %s5781_s11 = inlined_call_operand.vmem [shape: f32[16,1], index: 11, kind: input, shape index: {}]   ;;  %s5782_s12 = inlined_call_operand.vmem [shape: f32[2,16,256], index: 12, kind: output, shape index: {}]  }
   0x1 LB: > { %s2872_s22 = sadd.s32 4294967295, %s3119_s21   ;;  %p2876_p0 = scmp.ge.s32.totalorder %s3119_s21, 1  ;;  %s3119_s21 = sphi %s3254_s21, %s22_s21  }
   0x2   : > { %p373_p1 = scmp.lt.s32.totalorder %s3119_s21, 3 }
   0x4   : > { %p374_p2 = pnand %p2876_p0, %p373_p1 }
   0x6   : > { %377 = sbr.rel (%p374_p2) target bundleno = 1213 (0x4bd), region = 68 }
   0xb   : > { %v2885_v0 = vld [vmem:[%s5773_s3 + $0x8] sm:$0xff]  ;;  %v452_v1 = vld [vmem:[%s5773_s3] sm:$0xff]  ;;  %p421_p3 = scmp.lt.s32.totalorder %s2872_s22, 1  ;;  %v3121_v2 = vmov 0   ;;  %s5787_s17 = smov 112   ;;  %v2887_v11 = vld [vmem:[%s5773_s3 + $0x10] sm:$0xff] }
   0xc   : > { %3069 = vset.pattern.permute.xlu2 %v3121_v2  ;;  %3068 = vset.pattern.permute.xlu0 %v3121_v2  ;;  %v448_v3 = vld [vmem:[%s5772_s2] sm:$0xff]  ;;  %s5801_s18 = smov 127   ;;  %v449_v8 = vld [vmem:[%s5772_s2 + $0x8] sm:$0xff]  ;;  %s5785_s25 = smov 96   ;;  %v2888_v12 = vld [vmem:[%s5774_s4 + $0x10] sm:$0xff] }
   0xd   : > { %483 = vperm.xlu2 %3069, %v2885_v0   ;;  %455 = vperm.xlu0 %3068, %v452_v1   ;;  %s6257_s22 = smov (!%p421_p3, %s2872_s22), 1  ;;  %v462_v6 = vld [vmem:[%s5774_s4] sm:$0xff]  ;;  %v2886_v10 = vld [vmem:[%s5774_s4 + $0x8] sm:$0xff]  ;;  %s5799_s29 = smov 126   ;;  %v2889_v13 = vld [vmem:[%s5773_s3 + $0x18] sm:$0xff] }
   0xe   : > { %3070 = vset.pattern.permute.xlu1 %v3121_v2  ;;  %s3268_s27 = sshll.u32 %s6257_s22, 5  ;;  %s3124_s22 = smov 15   ;;  %v2890_v14 = vld [vmem:[%s5774_s4 + $0x18] sm:$0xff]  ;;  %v2891_v15 = vld [vmem:[%s5773_s3 + $0x20] sm:$0xff]  ;;  %v2893_v18 = vld [vmem:[%s5773_s3 + $0x28] sm:$0xff] }
   0xf   : > { %s3277_s14 = scalar_lea.vmem %s5770_s0, %s3268_s27  ;;  %s3127_s15 = smov 14   ;;  %v2892_v16 = vld [vmem:[%s5774_s4 + $0x20] sm:$0xff]  ;;  %v2894_v20 = vld [vmem:[%s5774_s4 + $0x28] sm:$0xff]  ;;  %v2895_v22 = vld [vmem:[%s5773_s3 + $0x30] sm:$0xff] }
  0x10   : > { %v437_v4 = vld [vmem:[%s3277_s14] sm:$0xff]  ;;  %v438_v7 = vld [vmem:[%s3277_s14 + $0x8] sm:$0xff]  ;;  %s5783_s20 = smov 80   ;;  %s5791_s23 = smov 125   ;;  %v2896_v31 = vld [vmem:[%s5774_s4 + $0x30] sm:$0xff] }
  0x11   : > { %v3280_v5 = vadd.f32 %v448_v3, %v437_v4  ;;  %v3293_v9 = vadd.f32 %v449_v8, %v438_v7  ;;  %s3130_s24 = smov 13   ;;  %s3131_s26 = smov 64   ;;  %v2897_v35 = vld [vmem:[%s5773_s3 + $0x38] sm:$0xff]  ;;  %v2899_v43 = vld [vmem:[%s5773_s3 + $0x40] sm:$0xff]  ;;  %v2901_v51 = vld [vmem:[%s5773_s3 + $0x48] sm:$0xff] }
  0x12   : > { %s3132_s13 = smov 124   ;;  %s3137_s28 = smov 32   ;;  %v2898_v39 = vld [vmem:[%s5774_s4 + $0x38] sm:$0xff]  ;;  %v2900_v47 = vld [vmem:[%s5774_s4 + $0x40] sm:$0xff]  ;;  %v2902_v55 = vld [vmem:[%s5774_s4 + $0x48] sm:$0xff] }
  0x13   : > { %474 = vrot.lane.b32.xlu1 %v3280_v5, %s5787_s17  ;;  %s3138_s30 = smov 122   ;;  %s3141_s16 = smov 121   ;;  %v2903_v59 = vld [vmem:[%s5773_s3 + $0x50] sm:$0xff]  ;;  %v2905_v3 = vld [vmem:[%s5773_s3 + $0x58] sm:$0xff] }
  0x14   : > { %s3143_s19 = smov 120   ;;  %v2904_v63 = vld [vmem:[%s5774_s4 + $0x50] sm:$0xff]  ;;  %v2906_v8 = vld [vmem:[%s5774_s4 + $0x58] sm:$0xff] }
  0x15   : > { %465 = vperm.xlu0 %3068, %v462_v6   ;;  %492 = vrot.lane.b32.xlu2 %v3280_v5, %s5801_s18 }
  0x1b   : > { %476 = vrot.lane.b32.xlu1 %v3293_v9, %s5787_s17  ;;  %s3140_s17 = smov 16  }
  0x1d   : > { %494 = vrot.lane.b32.xlu0 %v3293_v9, %s5801_s18  ;;  %501 = vrot.lane.b32.xlu2 %v3293_v9, %s3124_s22  ;;  %s3617_s18 = scalar_lea.vmem %s5771_s1, %s3268_s27 }
  0x23   : > { %499 = vrot.lane.b32.xlu1 %v3280_v5, %s3124_s22 }
  0x25   : > { %512 = vperm.xlu0 %3068, %v2886_v10   ;;  %523 = vrot.lane.b32.xlu2 %v3293_v9, %s5785_s25 }
  0x2b   : > { %521 = vrot.lane.b32.xlu1 %v3280_v5, %s5785_s25  ;;  %s3144_s25 = smov 8  }
  0x2d   : > { %530 = vperm.xlu0 %3068, %v2887_v11   ;;  %541 = vrot.lane.b32.xlu2 %v3293_v9, %s5799_s29 }
  0x33   : > { %539 = vrot.lane.b32.xlu1 %v3280_v5, %s5799_s29  ;;  %s3161_s29 = smov 49  }
  0x35   : > { %546 = vrot.lane.b32.xlu0 %v3280_v5, %s3127_s15  ;;  %559 = vperm.xlu2 %3069, %v2888_v12  }
  0x3b   : > { %548 = vrot.lane.b32.xlu1 %v3293_v9, %s3127_s15 }
  0x3d   : > { %568 = vrot.lane.b32.xlu0 %v3280_v5, %s5783_s20  ;;  %577 = vperm.xlu2 %3069, %v2889_v13   ;;  %v2907_v13 = vld [vmem:[%s5773_s3 + $0x60] sm:$0xff] }
  0x43   : > { %570 = vrot.lane.b32.xlu1 %v3293_v9, %s5783_s20  ;;  %s3133_s20 = smov 12  }
  0x45   : > { %586 = vrot.lane.b32.xlu0 %v3280_v5, %s5791_s23  ;;  %593 = vrot.lane.b32.xlu2 %v3280_v5, %s3130_s24 }
  0x4b   : > { %588 = vrot.lane.b32.xlu1 %v3293_v9, %s5791_s23  ;;  %s5813_s23 = smov 1  }
  0x4d   : > { %595 = vrot.lane.b32.xlu0 %v3293_v9, %s3130_s24  ;;  %615 = vrot.lane.b32.xlu2 %v3280_v5, %s3131_s26 }
  0x53   : > { %606 = vperm.xlu1 %3070, %v2890_v14  }
  0x55   : > { %617 = vrot.lane.b32.xlu0 %v3293_v9, %s3131_s26  ;;  %633 = vrot.lane.b32.xlu2 %v3280_v5, %s3132_s13  ;;  %s3134_s26 = smov 48  }
  0x5b   : > { %624 = vperm.xlu1 %3070, %v2891_v15  }
  0x5d   : > { %635 = vrot.lane.b32.xlu0 %v3293_v9, %s3132_s13  ;;  %642 = vrot.lane.b32.xlu2 %v3293_v9, %s3133_s20  ;;  %s3135_s13 = smov 123  }
  0x63   : > { %640 = vrot.lane.b32.xlu1 %v3280_v5, %s3133_s20  ;;  %s3136_s20 = smov 11  }
  0x65   : > { %653 = vperm.xlu0 %3068, %v2892_v16   ;;  %664 = vrot.lane.b32.xlu2 %v3293_v9, %s3134_s26 }
  0x67   : > { %v3356_v17 = vpop.permute.xlu2 %483 }
  0x6b   : > { %662 = vrot.lane.b32.xlu1 %v3280_v5, %s3134_s26 }
  0x6d   : > { %671 = vperm.xlu0 %3068, %v2893_v18   ;;  %682 = vrot.lane.b32.xlu2 %v3293_v9, %s3135_s13  ;;  %v2908_v18 = vld [vmem:[%s5774_s4 + $0x60] sm:$0xff] }
  0x6f   : > { %v3364_v19 = vpop.permute.xlu2 %492 }
  0x73   : > { %680 = vrot.lane.b32.xlu1 %v3280_v5, %s3135_s13  ;;  %s3139_s13 = smov 10  }
  0x75   : > { %687 = vrot.lane.b32.xlu0 %v3280_v5, %s3136_s20  ;;  %700 = vperm.xlu2 %3069, %v2894_v20  }
  0x77   : > { %v3371_v21 = vpop.permute.xlu2 %501 }
  0x7b   : > { %689 = vrot.lane.b32.xlu1 %v3293_v9, %s3136_s20  ;;  %s3163_s20 = smov 46  }
  0x7d   : > { %709 = vrot.lane.b32.xlu0 %v3280_v5, %s3137_s28  ;;  %718 = vperm.xlu2 %3069, %v2895_v22  }
  0x7f   : > { %v3379_v23 = vpop.permute.xlu0 %455  ;;  %v3381_v24 = vpop.permute.xlu2 %523 }
  0x83   : > { %711 = vrot.lane.b32.xlu1 %v3293_v9, %s3137_s28 }
  0x85   : > { %727 = vrot.lane.b32.xlu0 %v3280_v5, %s3138_s30  ;;  %734 = vrot.lane.b32.xlu2 %v3280_v5, %s3139_s13  ;;  %v3387_v25 = vpop.permute.xlu1 %474 }
  0x87   : > { %v3389_v26 = vpop.permute.xlu0 %465  ;;  %v3391_v27 = vpop.permute.xlu2 %541 }
  0x8b   : > { %729 = vrot.lane.b32.xlu1 %v3293_v9, %s3138_s30  ;;  %s3162_s30 = smov 47  }
  0x8d   : > { %736 = vrot.lane.b32.xlu0 %v3293_v9, %s3139_s13  ;;  %756 = vrot.lane.b32.xlu2 %v3280_v5, %s3140_s17  ;;  %v3397_v28 = vpop.permute.xlu1 %476  ;;  %s3142_s13 = smov 9  }
  0x8f   : > { %v3399_v29 = vpop.permute.xlu0 %494  ;;  %v3401_v30 = vpop.permute.xlu2 %559 }
  0x93   : > { %747 = vperm.xlu1 %3070, %v2896_v31  }
  0x95   : > { %758 = vrot.lane.b32.xlu0 %v3293_v9, %s3140_s17  ;;  %774 = vrot.lane.b32.xlu2 %v3280_v5, %s3141_s16  ;;  %v3409_v32 = vpop.permute.xlu1 %499 }
  0x97   : > { %v3411_v33 = vpop.permute.xlu0 %512  ;;  %v3413_v34 = vpop.permute.xlu2 %577 }
  0x98   : > { %5914 = vst [vmem:[#allocation2_spill] sm:$0xff] %v3413_v34 }
  0x9b   : > { %765 = vperm.xlu1 %3070, %v2897_v35   ;;  %v2909_v35 = vld [vmem:[%s5773_s3 + $0x68] sm:$0xff] }
  0x9d   : > { %776 = vrot.lane.b32.xlu0 %v3293_v9, %s3141_s16  ;;  %783 = vrot.lane.b32.xlu2 %v3293_v9, %s3142_s13  ;;  %v3420_v36 = vpop.permute.xlu1 %521  ;;  %s3145_s16 = smov 119  }
  0x9f   : > { %v3422_v37 = vpop.permute.xlu0 %530  ;;  %v3424_v38 = vpop.permute.xlu2 %593 }
  0xa3   : > { %781 = vrot.lane.b32.xlu1 %v3280_v5, %s3142_s13  ;;  %s3146_s13 = smov 7  }
  0xa5   : > { %794 = vperm.xlu0 %3068, %v2898_v39   ;;  %814 = vrot.lane.b32.xlu2 %v3280_v5, %s3143_s19  ;;  %v3431_v40 = vpop.permute.xlu1 %539 }
  0xa7   : > { %v3433_v41 = vpop.permute.xlu0 %546  ;;  %v3435_v42 = vpop.permute.xlu2 %615 }
  0xa8   : > { %5915 = vst [vmem:[#allocation3_spill] sm:$0xff] %v3435_v42 }
  0xab   : > { %805 = vperm.xlu1 %3070, %v2899_v43  }
  0xad   : > { %816 = vrot.lane.b32.xlu0 %v3293_v9, %s3143_s19  ;;  %823 = vrot.lane.b32.xlu2 %v3293_v9, %s3144_s25  ;;  %v3442_v44 = vpop.permute.xlu1 %548  ;;  %s3147_s19 = smov 118  }
  0xaf   : > { %v3444_v45 = vpop.permute.xlu0 %568  ;;  %v3446_v46 = vpop.permute.xlu2 %633 }
  0xb0   : > { %5916 = vst [vmem:[#allocation4_spill] sm:$0xff] %v3446_v46 }
  0xb3   : > { %821 = vrot.lane.b32.xlu1 %v3280_v5, %s3144_s25  ;;  %s3148_s25 = smov 6  }
  0xb5   : > { %834 = vperm.xlu0 %3068, %v2900_v47   ;;  %854 = vrot.lane.b32.xlu2 %v3280_v5, %s3145_s16  ;;  %v3453_v48 = vpop.permute.xlu1 %570 }
  0xb7   : > { %v3455_v49 = vpop.permute.xlu0 %586  ;;  %v3457_v50 = vpop.permute.xlu2 %642 }
  0xb8   : > { %5917 = vst [vmem:[#allocation5_spill] sm:$0xff] %v3457_v50 }
  0xbb   : > { %845 = vperm.xlu1 %3070, %v2901_v51   ;;  %v2910_v51 = vld [vmem:[%s5774_s4 + $0x68] sm:$0xff] }
  0xbd   : > { %856 = vrot.lane.b32.xlu0 %v3293_v9, %s3145_s16  ;;  %863 = vrot.lane.b32.xlu2 %v3293_v9, %s3146_s13  ;;  %v3464_v52 = vpop.permute.xlu1 %588  ;;  %s3149_s16 = smov 117  }
  0xbf   : > { %v3466_v53 = vpop.permute.xlu0 %595  ;;  %v3468_v54 = vpop.permute.xlu2 %664 }
  0xc0   : > { %5918 = vst [vmem:[#allocation6_spill] sm:$0xff] %v3466_v53 }
  0xc1   : > { %5919 = vst [vmem:[#allocation7_spill] sm:$0xff] %v3468_v54 }
  0xc3   : > { %861 = vrot.lane.b32.xlu1 %v3280_v5, %s3146_s13  ;;  %s3150_s13 = smov 5  }
  0xc5   : > { %874 = vperm.xlu0 %3068, %v2902_v55   ;;  %894 = vrot.lane.b32.xlu2 %v3280_v5, %s3147_s19  ;;  %v3475_v56 = vpop.permute.xlu1 %606 }
  0xc6   : > { %5920 = vst [vmem:[#allocation8_spill] sm:$0xff] %v3475_v56 }
  0xc7   : > { %v3477_v57 = vpop.permute.xlu0 %617  ;;  %v3479_v58 = vpop.permute.xlu2 %682 }
  0xc8   : > { %5921 = vst [vmem:[#allocation9_spill] sm:$0xff] %v3477_v57 }
  0xc9   : > { %5922 = vst [vmem:[#allocation10_spill] sm:$0xff] %v3479_v58 }
  0xcb   : > { %885 = vperm.xlu1 %3070, %v2903_v59  }
  0xcd   : > { %896 = vrot.lane.b32.xlu0 %v3293_v9, %s3147_s19  ;;  %903 = vrot.lane.b32.xlu2 %v3293_v9, %s3148_s25  ;;  %v3486_v60 = vpop.permute.xlu1 %624  ;;  %s3151_s19 = smov 116  }
  0xce   : > { %5923 = vst [vmem:[#allocation11_spill] sm:$0xff] %v3486_v60 }
  0xcf   : > { %v3488_v61 = vpop.permute.xlu0 %635  ;;  %v3490_v62 = vpop.permute.xlu2 %700 }
  0xd0   : > { %5924 = vst [vmem:[#allocation12_spill] sm:$0xff] %v3488_v61 }
  0xd1   : > { %5925 = vst [vmem:[#allocation13_spill] sm:$0xff] %v3490_v62 }
  0xd3   : > { %901 = vrot.lane.b32.xlu1 %v3280_v5, %s3148_s25  ;;  %s3152_s25 = smov 4  }
  0xd5   : > { %914 = vperm.xlu0 %3068, %v2904_v63   ;;  %934 = vrot.lane.b32.xlu2 %v3280_v5, %s3149_s16  ;;  %v3497_v0 = vpop.permute.xlu1 %640 }
  0xd6   : > { %5926 = vst [vmem:[#allocation14_spill] sm:$0xff] %v3497_v0 }
  0xd7   : > { %v3499_v1 = vpop.permute.xlu0 %653  ;;  %v3501_v2 = vpop.permute.xlu2 %718 }
  0xd8   : > { %5927 = vst [vmem:[#allocation15_spill] sm:$0xff] %v3499_v1 }
  0xd9   : > { %5928 = vst [vmem:[#allocation16_spill] sm:$0xff] %v3501_v2 }
  0xdb   : > { %925 = vperm.xlu1 %3070, %v2905_v3   ;;  %v2911_v3 = vld [vmem:[%s5773_s3 + $0x70] sm:$0xff] }
  0xdd   : > { %936 = vrot.lane.b32.xlu0 %v3293_v9, %s3149_s16  ;;  %943 = vrot.lane.b32.xlu2 %v3293_v9, %s3150_s13  ;;  %v3508_v4 = vpop.permute.xlu1 %662  ;;  %s5789_s16 = smov 115  }
  0xde   : > { %5929 = vst [vmem:[#allocation17_spill] sm:$0xff] %v3508_v4 }
  0xdf   : > { %v3510_v6 = vpop.permute.xlu0 %671  ;;  %v3512_v7 = vpop.permute.xlu2 %734 }
  0xe0   : > { %5930 = vst [vmem:[#allocation18_spill] sm:$0xff] %v3510_v6 }
  0xe1   : > { %5931 = vst [vmem:[#allocation19_spill] sm:$0xff] %v3512_v7 }
  0xe3   : > { %941 = vrot.lane.b32.xlu1 %v3280_v5, %s3150_s13  ;;  %s3156_s13 = smov 2  }
  0xe5   : > { %954 = vperm.xlu0 %3068, %v2906_v8   ;;  %974 = vrot.lane.b32.xlu2 %v3280_v5, %s3151_s19  ;;  %v3519_v10 = vpop.permute.xlu1 %680 }
  0xe6   : > { %5932 = vst [vmem:[#allocation20_spill] sm:$0xff] %v3519_v10 }
  0xe7   : > { %v3521_v11 = vpop.permute.xlu0 %687  ;;  %v3523_v12 = vpop.permute.xlu2 %756 }
  0xe8   : > { %5933 = vst [vmem:[#allocation21_spill] sm:$0xff] %v3521_v11  ;;  %v2931_v11 = vld [vmem:[%s5776_s6 + $0x88] sm:$0xff] }
  0xe9   : > { %5934 = vst [vmem:[#allocation22_spill] sm:$0xff] %v3523_v12  ;;  %v3638_v12 = vld [vmem:[%s3617_s18 + $0x18] sm:$0xff] }
  0xeb   : > { %965 = vperm.xlu1 %3070, %v2907_v13  }
  0xed   : > { %976 = vrot.lane.b32.xlu0 %v3293_v9, %s3151_s19  ;;  %983 = vrot.lane.b32.xlu2 %v3293_v9, %s3152_s25  ;;  %v3530_v14 = vpop.permute.xlu1 %689  ;;  %s5794_s19 = smov 114  }
  0xee   : > { %5935 = vst [vmem:[#allocation23_spill] sm:$0xff] %v3530_v14 }
  0xef   : > { %v3532_v15 = vpop.permute.xlu0 %709  ;;  %v3534_v16 = vpop.permute.xlu2 %774 }
  0xf0   : > { %5936 = vst [vmem:[#allocation24_spill] sm:$0xff] %v3532_v15 }
  0xf1   : > { %5937 = vst [vmem:[#allocation25_spill] sm:$0xff] %v3534_v16 }
  0xf3   : > { %981 = vrot.lane.b32.xlu1 %v3280_v5, %s3152_s25  ;;  %s3154_s25 = smov 3  }
  0xf5   : > { %994 = vperm.xlu0 %3068, %v2908_v18   ;;  %1014 = vrot.lane.b32.xlu2 %v3280_v5, %s5789_s16  ;;  %v3542_v20 = vpop.permute.xlu1 %711 }
  0xf6   : > { %5938 = vst [vmem:[#allocation26_spill] sm:$0xff] %v3542_v20 }
  0xf7   : > { %v3544_v22 = vpop.permute.xlu0 %727  ;;  %v3546_v31 = vpop.permute.xlu2 %783 }
  0xf8   : > { %5939 = vst [vmem:[#allocation27_spill] sm:$0xff] %v3544_v22 }
  0xf9   : > { %5940 = vst [vmem:[#allocation28_spill] sm:$0xff] %v3546_v31 }
  0xfb   : > { %1005 = vperm.xlu1 %3070, %v2909_v35   ;;  %v2912_v35 = vld [vmem:[%s5774_s4 + $0x70] sm:$0xff] }
  0xfd   : > { %1016 = vrot.lane.b32.xlu0 %v3293_v9, %s5789_s16  ;;  %1023 = vrot.lane.b32.xlu2 %v3293_v9, %s3154_s25  ;;  %v3555_v39 = vpop.permute.xlu1 %729  ;;  %s5804_s16 = smov 113  }
  0xfe   : > { %5941 = vst [vmem:[#allocation29_spill] sm:$0xff] %v3555_v39 }
  0xff   : > { %v3557_v43 = vpop.permute.xlu0 %736  ;;  %v3559_v47 = vpop.permute.xlu2 %814 }
 0x100   : > { %5942 = vst [vmem:[#allocation30_spill] sm:$0xff] %v3557_v43 }
 0x101   : > { %5943 = vst [vmem:[#allocation31_spill] sm:$0xff] %v3559_v47 }
 0x103   : > { %1021 = vrot.lane.b32.xlu1 %v3280_v5, %s3154_s25 }
 0x105   : > { %1034 = vperm.xlu0 %3068, %v2910_v51   ;;  %1054 = vrot.lane.b32.xlu2 %v3280_v5, %s5794_s19  ;;  %v3568_v55 = vpop.permute.xlu1 %747 }
 0x106   : > { %5944 = vst [vmem:[#allocation32_spill] sm:$0xff] %v3568_v55 }
 0x107   : > { %v3570_v59 = vpop.permute.xlu0 %758  ;;  %v3572_v63 = vpop.permute.xlu2 %823 }
 0x108   : > { %5945 = vst [vmem:[#allocation33_spill] sm:$0xff] %v3570_v59 }
 0x109   : > { %5946 = vst [vmem:[#allocation34_spill] sm:$0xff] %v3572_v63 }
 0x10b   : > { %1045 = vperm.xlu1 %3070, %v2911_v3  }
 0x10d   : > { %1056 = vrot.lane.b32.xlu0 %v3293_v9, %s5794_s19  ;;  %1063 = vrot.lane.b32.xlu2 %v3293_v9, %s3156_s13  ;;  %v3581_v8 = vpop.permute.xlu1 %765  ;;  %s3160_s19 = smov 50  }
 0x10e   : > { %5947 = vst [vmem:[#allocation35_spill] sm:$0xff] %v3581_v8 }
 0x10f   : > { %v3583_v13 = vpop.permute.xlu0 %776  ;;  %v3585_v18 = vpop.permute.xlu2 %854 }
 0x110   : > { %5948 = vst [vmem:[#allocation36_spill] sm:$0xff] %v3583_v13 }
 0x111   : > { %5949 = vst [vmem:[#allocation37_spill] sm:$0xff] %v3585_v18  ;;  %v2913_v18 = vld [vmem:[%s5773_s3 + $0x78] sm:$0xff] }
 0x113   : > { %1061 = vrot.lane.b32.xlu1 %v3280_v5, %s3156_s13 }
 0x115   : > { %1074 = vperm.xlu0 %3068, %v2912_v35   ;;  %1094 = vrot.lane.b32.xlu2 %v3280_v5, %s5804_s16  ;;  %v3594_v51 = vpop.permute.xlu1 %781 }
 0x116   : > { %5950 = vst [vmem:[#allocation38_spill] sm:$0xff] %v3594_v51 }
 0x117   : > { %v3596_v3 = vpop.permute.xlu0 %794  ;;  %v3598_v47 = vpop.permute.xlu2 %863 }
 0x118   : > { %5951 = vst [vmem:[#allocation39_spill] sm:$0xff] %v3596_v3  ;;  %v1121_v3 = vld [vmem:[%s5775_s5] sm:$0xff] }
 0x119   : > { %5952 = vst [vmem:[#allocation40_spill] sm:$0xff] %v3598_v47  ;;  %v3623_v47 = vld [vmem:[%s3617_s18 + $0x10] sm:$0xff] }
 0x11b   : > { %1085 = vperm.xlu1 %3070, %v2913_v18   ;;  %v2914_v18 = vld [vmem:[%s5774_s4 + $0x78] sm:$0xff] }
 0x11d   : > { %1096 = vrot.lane.b32.xlu0 %v3293_v9, %s5804_s16  ;;  %1103 = vrot.lane.b32.xlu2 %v3293_v9, %s5813_s23  ;;  %v3607_v35 = vpop.permute.xlu1 %805  ;;  %s3159_s16 = smov 51  }
 0x11e   : > { %5953 = vst [vmem:[#allocation41_spill] sm:$0xff] %v3607_v35 }
 0x11f   : > { %v3609_v63 = vpop.permute.xlu0 %816  ;;  %v3611_v8 = vpop.permute.xlu2 %894 }
 0x120   : > { %5954 = vst [vmem:[#allocation42_spill] sm:$0xff] %v3609_v63 }
 0x121   : > { %5955 = vst [vmem:[#allocation43_spill] sm:$0xff] %v3611_v8 }
 0x123   : > { %1101 = vrot.lane.b32.xlu1 %v3280_v5, %s5813_s23  ;;  %s3166_s23 = smov 34  }
 0x125   : > { %1114 = vperm.xlu0 %3068, %v2914_v18   ;;  %1143 = vrot.lane.b32.xlu2 %v3623_v47, %s3159_s16  ;;  %v3628_v8 = vpop.permute.xlu1 %821 }
 0x126   : > { %5956 = vst [vmem:[#allocation44_spill] sm:$0xff] %v3628_v8 }
 0x127   : > { %v3630_v35 = vpop.permute.xlu0 %834  ;;  %v3632_v63 = vpop.permute.xlu2 %903 }
 0x128   : > { %5957 = vst [vmem:[#allocation45_spill] sm:$0xff] %v3630_v35 }
 0x129   : > { %5958 = vst [vmem:[#allocation46_spill] sm:$0xff] %v3632_v63  ;;  %v1152_v63 = vld [vmem:[%s5776_s6] sm:$0xff] }
 0x12b   : > { %1124 = vperm.xlu1 %3070, %v1121_v3  }
 0x12d   : > { %1145 = vrot.lane.b32.xlu0 %v3638_v12, %s3159_s16  ;;  %1170 = vrot.lane.b32.xlu2 %v3623_v47, %s3160_s19  ;;  %v3642_v18 = vpop.permute.xlu1 %845  ;;  %s3165_s16 = smov 35  }
 0x12e   : > { %5959 = vst [vmem:[#allocation47_spill] sm:$0xff] %v3642_v18 }
 0x12f   : > { %v3644_v59 = vpop.permute.xlu0 %856  ;;  %v3646_v8 = vpop.permute.xlu2 %934 }
 0x130   : > { %5960 = vst [vmem:[#allocation48_spill] sm:$0xff] %v3644_v59 }
 0x131   : > { %5961 = vst [vmem:[#allocation49_spill] sm:$0xff] %v3646_v8  ;;  %v2915_v8 = vld [vmem:[%s5776_s6 + $0x8] sm:$0xff] }
 0x133   : > { %1155 = vperm.xlu1 %3070, %v1152_v63  }
 0x135   : > { %1172 = vrot.lane.b32.xlu0 %v3638_v12, %s3160_s19  ;;  %1198 = vrot.lane.b32.xlu2 %v3623_v47, %s3161_s29  ;;  %v3653_v3 = vpop.permute.xlu1 %861  ;;  %s3164_s19 = smov 45  }
 0x136   : > { %5962 = vst [vmem:[#allocation50_spill] sm:$0xff] %v3653_v3 }
 0x137   : > { %v3655_v35 = vpop.permute.xlu0 %874  ;;  %v3657_v16 = vpop.permute.xlu2 %943 }
 0x138   : > { %5963 = vst [vmem:[#allocation51_spill] sm:$0xff] %v3655_v35 }
 0x139   : > { %5964 = vst [vmem:[#allocation52_spill] sm:$0xff] %v3657_v16  ;;  %v2916_v16 = vld [vmem:[%s5776_s6 + $0x10] sm:$0xff] }
 0x13b   : > { %1183 = vperm.xlu1 %3070, %v2915_v8  }
 0x13d   : > { %1200 = vrot.lane.b32.xlu0 %v3638_v12, %s3161_s29  ;;  %1226 = vrot.lane.b32.xlu2 %v3623_v47, %s3134_s26  ;;  %v3665_v63 = vpop.permute.xlu1 %885  ;;  %s3167_s29 = smov 33  }
 0x13e   : > { %5965 = vst [vmem:[#allocation53_spill] sm:$0xff] %v3665_v63 }
 0x13f   : > { %v3667_v18 = vpop.permute.xlu0 %896  ;;  %v3669_v59 = vpop.permute.xlu2 %974 }
 0x140   : > { %5966 = vst [vmem:[#allocation54_spill] sm:$0xff] %v3667_v18 }
 0x141   : > { %5967 = vst [vmem:[#allocation55_spill] sm:$0xff] %v3669_v59  ;;  %v2917_v59 = vld [vmem:[%s5776_s6 + $0x18] sm:$0xff] }
 0x143   : > { %1211 = vperm.xlu1 %3070, %v2916_v16  }
 0x145   : > { %1228 = vrot.lane.b32.xlu0 %v3638_v12, %s3134_s26  ;;  %1251 = vrot.lane.b32.xlu2 %v3623_v47, %s3162_s30  ;;  %v3677_v8 = vpop.permute.xlu1 %901  ;;  %s3170_s26 = smov 29  }
 0x146   : > { %5968 = vst [vmem:[#allocation56_spill] sm:$0xff] %v3677_v8 }
 0x147   : > { %v3679_v35 = vpop.permute.xlu0 %914  ;;  %v3681_v63 = vpop.permute.xlu2 %983 }
 0x148   : > { %5969 = vst [vmem:[#allocation57_spill] sm:$0xff] %v3679_v35 }
 0x149   : > { %5970 = vst [vmem:[#allocation58_spill] sm:$0xff] %v3681_v63  ;;  %v2918_v63 = vld [vmem:[%s5776_s6 + $0x20] sm:$0xff] }
 0x14b   : > { %1238 = vperm.xlu1 %3070, %v2917_v59  }
 0x14d   : > { %1253 = vrot.lane.b32.xlu0 %v3638_v12, %s3162_s30  ;;  %1277 = vrot.lane.b32.xlu2 %v3623_v47, %s3163_s20  ;;  %v3688_v16 = vpop.permute.xlu1 %925  ;;  %s3171_s30 = smov 19  }
 0x14e   : > { %5971 = vst [vmem:[#allocation59_spill] sm:$0xff] %v3688_v16 }
 0x14f   : > { %v3690_v18 = vpop.permute.xlu0 %936  ;;  %v3692_v3 = vpop.permute.xlu2 %1014 }
 0x150   : > { %5972 = vst [vmem:[#allocation60_spill] sm:$0xff] %v3690_v18 }
 0x151   : > { %5973 = vst [vmem:[#allocation61_spill] sm:$0xff] %v3692_v3  ;;  %v2919_v3 = vld [vmem:[%s5776_s6 + $0x28] sm:$0xff] }
 0x153   : > { %1264 = vperm.xlu1 %3070, %v2918_v63  }
 0x155   : > { %1279 = vrot.lane.b32.xlu0 %v3638_v12, %s3163_s20  ;;  %1303 = vrot.lane.b32.xlu2 %v3623_v47, %s3164_s19  ;;  %v3699_v59 = vpop.permute.xlu1 %941  ;;  %s6028_s20 = smov 114  }
 0x156   : > { %5974 = vst [vmem:[#allocation62_spill] sm:$0xff] %v3699_v59 }
 0x157   : > { %v3701_v35 = vpop.permute.xlu0 %954  ;;  %v3703_v8 = vpop.permute.xlu2 %1023 }
 0x158   : > { %5975 = vst [vmem:[#allocation63_spill] sm:$0xff] %v3701_v35 }
 0x159   : > { %5976 = vst [vmem:[#allocation64_spill] sm:$0xff] %v3703_v8  ;;  %v2920_v8 = vld [vmem:[%s5776_s6 + $0x30] sm:$0xff] }
 0x15b   : > { %1290 = vperm.xlu1 %3070, %v2919_v3  }
 0x15d   : > { %1305 = vrot.lane.b32.xlu0 %v3638_v12, %s3164_s19  ;;  %1333 = vrot.lane.b32.xlu2 %v3623_v47, %s3165_s16  ;;  %v3710_v63 = vpop.permute.xlu1 %965  ;;  %s3168_s19 = smov 31  }
 0x15e   : > { %5977 = vst [vmem:[#allocation65_spill] sm:$0xff] %v3710_v63 }
 0x15f   : > { %v3712_v16 = vpop.permute.xlu0 %976  ;;  %v3714_v18 = vpop.permute.xlu2 %1054 }
 0x160   : > { %5978 = vst [vmem:[#allocation66_spill] sm:$0xff] %v3712_v16 }
 0x161   : > { %5979 = vst [vmem:[#allocation67_spill] sm:$0xff] %v3714_v18  ;;  %v2921_v18 = vld [vmem:[%s5776_s6 + $0x38] sm:$0xff] }
 0x163   : > { %1316 = vperm.xlu1 %3070, %v2920_v8  }
 0x165   : > { %1335 = vrot.lane.b32.xlu0 %v3638_v12, %s3165_s16  ;;  %1357 = vrot.lane.b32.xlu2 %v3623_v47, %s3166_s23  ;;  %v3721_v3 = vpop.permute.xlu1 %981  ;;  %s3169_s16 = smov 30  }
 0x166   : > { %5980 = vst [vmem:[#allocation68_spill] sm:$0xff] %v3721_v3 }
 0x167   : > { %v3723_v35 = vpop.permute.xlu0 %994  ;;  %v3725_v59 = vpop.permute.xlu2 %1063 }
 0x168   : > { %5981 = vst [vmem:[#allocation69_spill] sm:$0xff] %v3723_v35 }
 0x169   : > { %5982 = vst [vmem:[#allocation70_spill] sm:$0xff] %v3725_v59  ;;  %v2922_v59 = vld [vmem:[%s5776_s6 + $0x40] sm:$0xff] }
 0x16b   : > { %1346 = vperm.xlu1 %3070, %v2921_v18  }
 0x16d   : > { %1359 = vrot.lane.b32.xlu0 %v3638_v12, %s3166_s23  ;;  %1381 = vrot.lane.b32.xlu2 %v3623_v47, %s3167_s29  ;;  %v3732_v8 = vpop.permute.xlu1 %1005  ;;  %s3173_s23 = smov 17  }
 0x16e   : > { %5983 = vst [vmem:[#allocation71_spill] sm:$0xff] %v3732_v8 }
 0x16f   : > { %v3734_v63 = vpop.permute.xlu0 %1016  ;;  %v3736_v16 = vpop.permute.xlu2 %1094 }
 0x170   : > { %5984 = vst [vmem:[#allocation72_spill] sm:$0xff] %v3734_v63 }
 0x171   : > { %5985 = vst [vmem:[#allocation73_spill] sm:$0xff] %v3736_v16  ;;  %v2923_v16 = vld [vmem:[%s5776_s6 + $0x48] sm:$0xff] }
 0x173   : > { %1370 = vperm.xlu1 %3070, %v2922_v59  }
 0x175   : > { %1383 = vrot.lane.b32.xlu0 %v3638_v12, %s3167_s29  ;;  %1405 = vrot.lane.b32.xlu2 %v3623_v47, %s3137_s28  ;;  %v3744_v18 = vpop.permute.xlu1 %1021  ;;  %s3174_s29 = smov 111  }
 0x176   : > { %5986 = vst [vmem:[#allocation74_spill] sm:$0xff] %v3744_v18 }
 0x177   : > { %v3746_v35 = vpop.permute.xlu0 %1034  ;;  %v3748_v3 = vpop.permute.xlu2 %1103 }
 0x178   : > { %5987 = vst [vmem:[#allocation75_spill] sm:$0xff] %v3746_v35 }
 0x179   : > { %5988 = vst [vmem:[#allocation76_spill] sm:$0xff] %v3748_v3  ;;  %v2924_v3 = vld [vmem:[%s5776_s6 + $0x50] sm:$0xff] }
 0x17b   : > { %1394 = vperm.xlu1 %3070, %v2923_v16  }
 0x17d   : > { %1407 = vrot.lane.b32.xlu0 %v3638_v12, %s3137_s28  ;;  %1428 = vrot.lane.b32.xlu2 %v3623_v47, %s3168_s19  ;;  %v3756_v59 = vpop.permute.xlu1 %1045  ;;  %s3172_s28 = smov 18  }
 0x17e   : > { %5989 = vst [vmem:[#allocation77_spill] sm:$0xff] %v3756_v59 }
 0x17f   : > { %v3758_v8 = vpop.permute.xlu0 %1056  ;;  %v3760_v63 = vpop.permute.xlu2 %1143 }
 0x180   : > { %5990 = vst [vmem:[#allocation78_spill] sm:$0xff] %v3758_v8  ;;  %v2925_v8 = vld [vmem:[%s5776_s6 + $0x58] sm:$0xff] }
 0x183   : > { %1417 = vperm.xlu1 %3070, %v2924_v3  }
 0x185   : > { %1430 = vrot.lane.b32.xlu0 %v3638_v12, %s3168_s19  ;;  %1452 = vrot.lane.b32.xlu2 %v3623_v47, %s3169_s16  ;;  %v3767_v16 = vpop.permute.xlu1 %1061  ;;  %s6034_s19 = smov 112  }
 0x186   : > { %5991 = vst [vmem:[#allocation79_spill] sm:$0xff] %v3767_v16 }
 0x187   : > { %v3769_v35 = vpop.permute.xlu0 %1074  ;;  %v3771_v18 = vpop.permute.xlu2 %1170 }
 0x188   : > { %5992 = vst [vmem:[#allocation80_spill] sm:$0xff] %v3769_v35  ;;  %v2926_v35 = vld [vmem:[%s5776_s6 + $0x60] sm:$0xff] }
 0x18b   : > { %1441 = vperm.xlu1 %3070, %v2925_v8  }
 0x18d   : > { %1454 = vrot.lane.b32.xlu0 %v3638_v12, %s3169_s16  ;;  %1476 = vrot.lane.b32.xlu2 %v3623_v47, %s3170_s26  ;;  %v3778_v3 = vpop.permute.xlu1 %1085  ;;  %s3179_s16 = smov 97  }
 0x18e   : > { %5993 = vst [vmem:[#allocation81_spill] sm:$0xff] %v3778_v3  ;;  %v2927_v3 = vld [vmem:[%s5776_s6 + $0x68] sm:$0xff] }
 0x18f   : > { %v3780_v59 = vpop.permute.xlu0 %1096  ;;  %v3782_v13 = vpop.permute.xlu2 %1198 }
 0x190   : > { %5994 = vst [vmem:[#allocation82_spill] sm:$0xff] %v3780_v59 }
 0x193   : > { %1465 = vperm.xlu1 %3070, %v2926_v35  }
 0x195   : > { %1478 = vrot.lane.b32.xlu0 %v3638_v12, %s3170_s26  ;;  %1506 = vrot.lane.b32.xlu2 %v3623_v47, %s3171_s30  ;;  %v3789_v8 = vpop.permute.xlu1 %1101  ;;  %s6020_s26 = smov 127  }
 0x196   : > { %5995 = vst [vmem:[#allocation83_spill] sm:$0xff] %v3789_v8  ;;  %v441_v8 = vlaneseq }
 0x197   : > { %v3791_v16 = vpop.permute.xlu0 %1114  ;;  %v1227_v55 = vpop.permute.xlu2 %1226 }
 0x198   : > { %5996 = vst [vmem:[#allocation84_spill] sm:$0xff] %v3791_v16  ;;  %v2928_v16 = vld [vmem:[%s5776_s6 + $0x70] sm:$0xff]  ;;  %v3814_v43 = vand.u32 127, %v441_v8  ;;  %v2930_v8 = vld [vmem:[%s5776_s6 + $0x80] sm:$0xff] }
 0x19a   : > { %v3821_v22 = vshra.s32 %v3814_v43, 4  ;;  %vm5880_vm8 = vcmp.lt.s32.totalorder %v3814_v43, 48  ;;  %vm1147_vm9 = vcmp.lt.s32.totalorder %v3814_v43, 51  ;;  %vm1174_vm12 = vcmp.lt.s32.totalorder %v3814_v43, 50 }
 0x19b   : > { %1489 = vperm.xlu1 %3070, %v2927_v3  }
 0x19c   : > { %vm1129_vm0 = vcmp.ge.s32.totalorder %v3821_v22, 3  ;;  %vm1131_vm1 = vcmp.lt.s32.totalorder %v3821_v22, 19 }
 0x19d   : > { %1508 = vrot.lane.b32.xlu0 %v3638_v12, %s3171_s30  ;;  %1530 = vrot.lane.b32.xlu2 %v3623_v47, %s3172_s28  ;;  %v3798_v35 = vpop.permute.xlu1 %1124  ;;  %vm3839_vm4 = vmand %vm1129_vm0, %vm1131_vm1  ;;  %vm1202_vm1 = vcmp.lt.s32.totalorder %v3814_v43, 49  ;;  %s6018_s30 = smov 1  }
 0x19e   : > { %5997 = vst [vmem:[#allocation85_spill] sm:$0xff] %v3798_v35  ;;  %v2929_v35 = vld [vmem:[%s5776_s6 + $0x78] sm:$0xff] }
 0x19f   : > { %v1146_v59 = vpop.permute.xlu0 %1145  ;;  %v3800_v31 = vpop.permute.xlu2 %1251 }
 0x1a0   : > { %v1148_v60 = vsel %vm1147_vm9, %v3760_v63, %v1146_v59  ;;  %v1149_v42 = vsel %vm1147_vm9, %v1146_v59, %v3760_v63 }
 0x1a3   : > { %1519 = vperm.xlu1 %3070, %v2928_v16   ;;  %v443_v16 = vadd.s32 128, %v3814_v43 }
 0x1a5   : > { %1532 = vrot.lane.b32.xlu0 %v3638_v12, %s3172_s28  ;;  %1554 = vrot.lane.b32.xlu2 %v3623_v47, %s3173_s23  ;;  %v3807_v3 = vpop.permute.xlu1 %1155  ;;  %v3823_v2 = vshra.s32 %v443_v16, 4  ;;  %v3837_v20 = vand.u32 15, %v443_v16  ;;  %s3175_s28 = smov 110  }
 0x1a7   : > { %v1173_v51 = vpop.permute.xlu0 %1172  ;;  %v3809_v7 = vpop.permute.xlu2 %1277  ;;  %vm1130_vm2 = vcmp.ge.s32.totalorder %v3823_v2, 3  ;;  %vm1132_vm3 = vcmp.lt.s32.totalorder %v3823_v2, 19  ;;  %vm5913_vm7 = vcmp.ge.s32.totalorder %v3837_v20, 3  ;;  %vm5908_vm13 = vcmp.ge.s32.totalorder %v3837_v20, 2 }
 0x1a8   : > { %vm3848_vm6 = vmand %vm1130_vm2, %vm1132_vm3  ;;  %vm5907_vm2 = vcmp.ge.s32.totalorder %v3837_v20, 1  ;;  %v1176_v57 = vsel %vm1174_vm12, %v1173_v51, %v3771_v18 }
 0x1a9   : > { %vm3876_vm14 = vmand %vm3848_vm6, %vm5913_vm7 }
 0x1aa   : > { %vm3902_vm3 = vmand %vm3848_vm6, %vm5908_vm13 }
 0x1ab   : > { %1543 = vperm.xlu1 %3070, %v2929_v35   ;;  %v3833_v35 = vand.u32 15, %v3814_v43 }
 0x1ad   : > { %1556 = vrot.lane.b32.xlu0 %v3638_v12, %s3173_s23  ;;  %1578 = vrot.lane.b32.xlu2 %v3623_v47, %s3140_s17  ;;  %v1184_v39 = vpop.permute.xlu1 %1183  ;;  %vm1135_vm5 = vcmp.ge.s32.totalorder %v3833_v35, 3  ;;  %vm5912_vm10 = vcmp.ge.s32.totalorder %v3833_v35, 2  ;;  %vm5883_vm15 = vcmp.ge.s32.totalorder %v3833_v35, 1  ;;  %vm5911_vm9 = vcmp.lt.s32.totalorder %v3833_v35, 15  ;;  %s3177_s23 = smov 99  }
 0x1ae   : > { %vm3862_vm11 = vmand %vm3839_vm4, %vm1135_vm5 }
 0x1af   : > { %v1201_v62 = vpop.permute.xlu0 %1200  ;;  %v3825_v15 = vpop.permute.xlu2 %1303  ;;  %vm3890_vm0 = vmand %vm3839_vm4, %vm5912_vm10 }
 0x1b0   : > { %v1203_v46 = vsel %vm1202_vm1, %v3782_v13, %v1201_v62  ;;  %v1204_v61 = vsel %vm1202_vm1, %v1201_v62, %v3782_v13  ;;  %vm5889_vm1 = vcmp.lt.s32.totalorder %v3837_v20, 14 }
 0x1b3   : > { %1567 = vperm.xlu1 %3070, %v2930_v8  }
 0x1b5   : > { %1580 = vrot.lane.b32.xlu0 %v3638_v12, %s3140_s17  ;;  %1601 = vrot.lane.b32.xlu2 %v3623_v47, %s3124_s22  ;;  %v1212_v16 = vpop.permute.xlu1 %1211  ;;  %s6025_s17 = smov 115  }
 0x1b7   : > { %v1229_v8 = vpop.permute.xlu0 %1228  ;;  %v3856_v58 = vpop.permute.xlu2 %1333 }
 0x1b8   : > { %v1230_v54 = vsel %vm5880_vm8, %v1227_v55, %v1229_v8  ;;  %v1231_v1 = vsel %vm5880_vm8, %v1229_v8, %v1227_v55  ;;  %v1175_v8 = vsel %vm1174_vm12, %v3771_v18, %v1173_v51  ;;  %vm3911_vm8 = vmand %vm3839_vm4, %vm5883_vm15  ;;  %vm1255_vm12 = vcmp.lt.s32.totalorder %v3814_v43, 47 }
 0x1b9   : > { %v1150_v51 = vsel %vm3862_vm11, %v1149_v42, 0.0  ;;  %v1151_v18 = vsel %vm3876_vm14, %v1148_v60, 0.0  ;;  %vm3926_vm15 = vmand %vm3848_vm6, %vm5907_vm2  ;;  %v1177_v42 = vsel %vm3890_vm0, %v1176_v57, 0.0  ;;  %v1178_v60 = vsel %vm3902_vm3, %v1175_v8, 0.0 }
 0x1ba   : > { %v1232_v62 = vsel %vm3839_vm4, %v1231_v1, 0.0  ;;  %v1233_v4 = vsel %vm3848_vm6, %v1230_v54, 0.0  ;;  %v1186_v14 = vmul.f32 %v1184_v39, %v1177_v42  ;;  %v1187_v13 = vmul.f32 %v1184_v39, %v1178_v60  ;;  %vm1249_vm11 = vmand %vm3839_vm4, %vm5911_vm9 }
 0x1bb   : > { %1590 = vperm.xlu1 %3070, %v2931_v11   ;;  %v1205_v57 = vsel %vm3911_vm8, %v1204_v61, 0.0  ;;  %v1206_v55 = vsel %vm3926_vm15, %v1203_v46, 0.0  ;;  %v1158_v39 = vmul.f32 %v3807_v3, %v1150_v51  ;;  %v1159_v8 = vmul.f32 %v3807_v3, %v1151_v18  ;;  %v2932_v61 = vld [vmem:[%s5776_s6 + $0x90] sm:$0xff] }
 0x1bc   : > { %v1214_v63 = vmul.f32 %v1212_v16, %v1205_v57  ;;  %v1215_v42 = vmul.f32 %v1212_v16, %v1206_v55  ;;  %vm5910_vm8 = vcmp.lt.s32.totalorder %v3837_v20, 15  ;;  %vm1281_vm15 = vcmp.lt.s32.totalorder %v3814_v43, 46 }
 0x1bd   : > { %1603 = vrot.lane.b32.xlu0 %v3638_v12, %s3124_s22  ;;  %1624 = vrot.lane.b32.xlu2 %v3623_v47, %s3127_s15  ;;  %v1239_v11 = vpop.permute.xlu1 %1238  ;;  %v1188_v46 = vadd.f32 %v1186_v14, %v1158_v39  ;;  %v1189_v50 = vadd.f32 %v1187_v13, %v1159_v8  ;;  %vm1250_vm14 = vmand %vm3848_vm6, %vm5910_vm8  ;;  %vm5890_vm0 = vcmp.lt.s32.totalorder %v3833_v35, 14  ;;  %s6044_s22 = smov 96  }
 0x1be   : > { %v1241_v0 = vmul.f32 %v1239_v11, %v1232_v62  ;;  %v1242_v56 = vmul.f32 %v1239_v11, %v1233_v4  ;;  %vm1275_vm3 = vmand %vm3839_vm4, %vm5890_vm0  ;;  %vm1337_vm0 = vcmp.lt.s32.totalorder %v3814_v43, 35 }
 0x1bf   : > { %v1254_v34 = vpop.permute.xlu0 %1253  ;;  %v3942_v53 = vpop.permute.xlu2 %1357 }
 0x1c0   : > { %v1256_v1 = vsel %vm1255_vm12, %v3800_v31, %v1254_v34  ;;  %v1257_v54 = vsel %vm1255_vm12, %v1254_v34, %v3800_v31  ;;  %v1216_v34 = vadd.f32 %v1214_v63, %v1188_v46  ;;  %v1217_v31 = vadd.f32 %v1215_v42, %v1189_v50  ;;  %vm1276_vm12 = vmand %vm3848_vm6, %vm5889_vm1 }
 0x1c1   : > { %v1258_v3 = vsel %vm1249_vm11, %v1257_v54, 0.0  ;;  %v1259_v16 = vsel %vm1250_vm14, %v1256_v1, 0.0  ;;  %v2933_v1 = vld [vmem:[%s5776_s6 + $0x98] sm:$0xff]  ;;  %vm1307_vm11 = vcmp.lt.s32.totalorder %v3814_v43, 45  ;;  %vm5891_vm14 = vcmp.lt.s32.totalorder %v3833_v35, 13 }
 0x1c2   : > { %v1243_v51 = vadd.f32 %v1241_v0, %v1216_v34  ;;  %v1244_v18 = vadd.f32 %v1242_v56, %v1217_v31  ;;  %v2934_v34 = vld [vmem:[%s5776_s6 + $0xa0] sm:$0xff]  ;;  %vm1325_vm1 = vcmp.lt.s32.totalorder %v3821_v22, 18 }
 0x1c3   : > { %1613 = vperm.xlu1 %3070, %v2932_v61  }
 0x1c5   : > { %1626 = vrot.lane.b32.xlu0 %v3638_v12, %s3127_s15  ;;  %1647 = vrot.lane.b32.xlu2 %v3623_v47, %s3130_s24  ;;  %v1265_v59 = vpop.permute.xlu1 %1264  ;;  %s3176_s15 = smov 109  }
 0x1c6   : > { %v1267_v60 = vmul.f32 %v1265_v59, %v1258_v3  ;;  %v1268_v62 = vmul.f32 %v1265_v59, %v1259_v16 }
 0x1c7   : > { %v1280_v4 = vpop.permute.xlu0 %1279  ;;  %v3973_v11 = vpop.permute.xlu2 %1381 }
 0x1c8   : > { %v1282_v14 = vsel %vm1281_vm15, %v3809_v7, %v1280_v4  ;;  %v1283_v13 = vsel %vm1281_vm15, %v1280_v4, %v3809_v7  ;;  %v1269_v57 = vadd.f32 %v1267_v60, %v1243_v51  ;;  %v1270_v55 = vadd.f32 %v1268_v62, %v1244_v18 }
 0x1c9   : > { %v1284_v56 = vsel %vm1275_vm3, %v1283_v13, 0.0  ;;  %v1285_v0 = vsel %vm1276_vm12, %v1282_v14, 0.0  ;;  %vm5892_vm15 = vcmp.lt.s32.totalorder %v3837_v20, 13  ;;  %vm1301_vm3 = vmand %vm3839_vm4, %vm5891_vm14  ;;  %vm1324_vm4 = vcmp.ge.s32.totalorder %v3823_v2, 2  ;;  %v2935_v13 = vld [vmem:[%s5776_s6 + $0xa8] sm:$0xff] }
 0x1ca   : > { %vm1302_vm12 = vmand %vm3848_vm6, %vm5892_vm15  ;;  %vm1326_vm14 = vcmp.lt.s32.totalorder %v3823_v2, 18 }
 0x1cb   : > { %1636 = vperm.xlu1 %3070, %v2933_v1   ;;  %vm4029_vm15 = vmand %vm1324_vm4, %vm1326_vm14  ;;  %vm1361_vm14 = vcmp.lt.s32.totalorder %v3814_v43, 34  ;;  %vm6019_vm4 = vcmp.ge.s32.totalorder %v3833_v35, 1 }
 0x1cd   : > { %1649 = vrot.lane.b32.xlu0 %v3638_v12, %s3130_s24  ;;  %1676 = vrot.lane.b32.xlu2 %v3623_v47, %s3154_s25  ;;  %v1291_v7 = vpop.permute.xlu1 %1290  ;;  %s6033_s24 = smov 113  }
 0x1ce   : > { %v1293_v54 = vmul.f32 %v1291_v7, %v1284_v56  ;;  %v1294_v39 = vmul.f32 %v1291_v7, %v1285_v0 }
 0x1cf   : > { %v1306_v8 = vpop.permute.xlu0 %1305  ;;  %v3995_v63 = vpop.permute.xlu2 %1405 }
 0x1d0   : > { %v1308_v42 = vsel %vm1307_vm11, %v3825_v15, %v1306_v8  ;;  %v1309_v61 = vsel %vm1307_vm11, %v1306_v8, %v3825_v15  ;;  %v1295_v46 = vadd.f32 %v1293_v54, %v1269_v57  ;;  %v1296_v50 = vadd.f32 %v1294_v39, %v1270_v55 }
 0x1d1   : > { %vm1323_vm11 = vcmp.ge.s32.totalorder %v3821_v22, 2  ;;  %v1310_v6 = vsel %vm1301_vm3, %v1309_v61, 0.0  ;;  %v1311_v10 = vsel %vm1302_vm12, %v1308_v42, 0.0  ;;  %v2936_v61 = vld [vmem:[%s5776_s6 + $0xb0] sm:$0xff]  ;;  %vm1354_vm12 = vmand %vm4029_vm15, %vm5908_vm13 }
 0x1d2   : > { %vm4023_vm6 = vmand %vm1323_vm11, %vm1325_vm1  ;;  %vm1385_vm11 = vcmp.lt.s32.totalorder %v3814_v43, 33 }
 0x1d3   : > { %1659 = vperm.xlu1 %3070, %v2934_v34   ;;  %vm1329_vm1 = vmand %vm4023_vm6, %vm1135_vm5 }
 0x1d4   : > { %vm1353_vm3 = vmand %vm4023_vm6, %vm5912_vm10 }
 0x1d5   : > { %1678 = vrot.lane.b32.xlu0 %v3638_v12, %s3154_s25  ;;  %1699 = vrot.lane.b32.xlu2 %v3623_v47, %s3156_s13  ;;  %v1317_v15 = vpop.permute.xlu1 %1316  ;;  %s6021_s25 = smov 126  }
 0x1d6   : > { %v1319_v31 = vmul.f32 %v1317_v15, %v1310_v6  ;;  %v1320_v3 = vmul.f32 %v1317_v15, %v1311_v10 }
 0x1d7   : > { %v1336_v16 = vpop.permute.xlu0 %1335  ;;  %v4021_v59 = vpop.permute.xlu2 %1428 }
 0x1d8   : > { %v1338_v18 = vsel %vm1337_vm0, %v3856_v58, %v1336_v16  ;;  %v1339_v60 = vsel %vm1337_vm0, %v1336_v16, %v3856_v58  ;;  %v1321_v4 = vadd.f32 %v1319_v31, %v1295_v46  ;;  %v1322_v14 = vadd.f32 %v1320_v3, %v1296_v50  ;;  %vm1330_vm0 = vmand %vm4029_vm15, %vm5913_vm7  ;;  %v2938_v46 = vld [vmem:[%s5776_s6 + $0xc0] sm:$0xff] }
 0x1d9   : > { %v1340_v58 = vsel %vm1329_vm1, %v1339_v60, 0.0  ;;  %v1341_v57 = vsel %vm1330_vm0, %v1338_v18, 0.0  ;;  %vm1377_vm1 = vmand %vm4023_vm6, %vm6019_vm4  ;;  %vm1456_vm4 = vcmp.lt.s32.totalorder %v3814_v43, 30 }
 0x1da   : > { %vm1378_vm0 = vmand %vm4029_vm15, %vm5907_vm2 }
 0x1db   : > { %1688 = vperm.xlu1 %3070, %v2935_v13  }
 0x1dd   : > { %1701 = vrot.lane.b32.xlu0 %v3638_v12, %s3156_s13  ;;  %1722 = vrot.lane.b32.xlu2 %v3623_v47, %s6018_s30  ;;  %v1347_v55 = vpop.permute.xlu1 %1346  ;;  %s6022_s13 = smov 125  }
 0x1de   : > { %v1349_v1 = vmul.f32 %v1347_v55, %v1340_v58  ;;  %v1350_v56 = vmul.f32 %v1347_v55, %v1341_v57 }
 0x1df   : > { %v1360_v0 = vpop.permute.xlu0 %1359  ;;  %v4049_v7 = vpop.permute.xlu2 %1452 }
 0x1e0   : > { %v1362_v54 = vsel %vm1361_vm14, %v3942_v53, %v1360_v0  ;;  %v1363_v39 = vsel %vm1361_vm14, %v1360_v0, %v3942_v53  ;;  %v1351_v8 = vadd.f32 %v1349_v1, %v1321_v4  ;;  %v1352_v42 = vadd.f32 %v1350_v56, %v1322_v14  ;;  %v2937_v4 = vld [vmem:[%s5776_s6 + $0xb8] sm:$0xff]  ;;  %v2939_v14 = vld [vmem:[%s5776_s6 + $0xc8] sm:$0xff] }
 0x1e1   : > { %v1364_v53 = vsel %vm1353_vm3, %v1363_v39, 0.0  ;;  %v1365_v50 = vsel %vm1354_vm12, %v1362_v54, 0.0  ;;  %vm5893_vm14 = vcmp.lt.s32.totalorder %v3814_v43, 32  ;;  %vm1432_vm3 = vcmp.lt.s32.totalorder %v3814_v43, 31  ;;  %vm1426_vm12 = vmand %vm4023_vm6, %vm5911_vm9 }
 0x1e3   : > { %1711 = vperm.xlu1 %3070, %v2936_v61  }
 0x1e5   : > { %1724 = vrot.lane.b32.xlu0 %v3638_v12, %s6018_s30  ;;  %1751 = vperm.xlu2 %3069, %v2938_v46   ;;  %v1371_v34 = vpop.permute.xlu1 %1370  ;;  %s3178_s30 = smov 98  }
 0x1e6   : > { %v1373_v6 = vmul.f32 %v1371_v34, %v1364_v53  ;;  %v1374_v10 = vmul.f32 %v1371_v34, %v1365_v50 }
 0x1e7   : > { %v1384_v15 = vpop.permute.xlu0 %1383  ;;  %v4070_v31 = vpop.permute.xlu2 %1476 }
 0x1e8   : > { %v1386_v3 = vsel %vm1385_vm11, %v3973_v11, %v1384_v15  ;;  %v1387_v16 = vsel %vm1385_vm11, %v1384_v15, %v3973_v11  ;;  %v1375_v18 = vadd.f32 %v1373_v6, %v1351_v8  ;;  %v1376_v60 = vadd.f32 %v1374_v10, %v1352_v42  ;;  %v2940_v42 = vld [vmem:[%s5776_s6 + $0xd0] sm:$0xff]  ;;  %vm1427_vm11 = vmand %vm4029_vm15, %vm5910_vm8 }
 0x1e9   : > { %v1388_v11 = vsel %vm1377_vm1, %v1387_v16, 0.0  ;;  %v1389_v13 = vsel %vm1378_vm0, %v1386_v3, 0.0  ;;  %vm6023_vm1 = vcmp.lt.s32.totalorder %v3833_v35, 14 }
 0x1ea   : > { %vm1450_vm0 = vmand %vm4023_vm6, %vm6023_vm1 }
 0x1eb   : > { %1734 = vperm.xlu1 %3070, %v2937_v4  }
 0x1ed   : > { %1762 = vrot.lane.b32.xlu0 %v3623_v47, %s6020_s26  ;;  %1774 = vperm.xlu2 %3069, %v2939_v14   ;;  %v1395_v58 = vpop.permute.xlu1 %1394 }
 0x1ee   : > { %v1397_v57 = vmul.f32 %v1395_v58, %v1388_v11  ;;  %v1398_v55 = vmul.f32 %v1395_v58, %v1389_v13 }
 0x1ef   : > { %v1408_v1 = vpop.permute.xlu0 %1407  ;;  %v4091_v56 = vpop.permute.xlu2 %1506 }
 0x1f0   : > { %v1409_v0 = vsel %vm5893_vm14, %v3995_v63, %v1408_v1  ;;  %v1410_v54 = vsel %vm5893_vm14, %v1408_v1, %v3995_v63  ;;  %v1399_v39 = vadd.f32 %v1397_v57, %v1375_v18  ;;  %v1400_v8 = vadd.f32 %v1398_v55, %v1376_v60  ;;  %v2941_v18 = vld [vmem:[%s5776_s6 + $0xd8] sm:$0xff] }
 0x1f1   : > { %v1411_v61 = vsel %vm4023_vm6, %v1410_v54, 0.0  ;;  %v1412_v63 = vsel %vm4029_vm15, %v1409_v0, 0.0  ;;  %v2942_v54 = vld [vmem:[%s5776_s6 + $0xe0] sm:$0xff]  ;;  %vm1510_vm14 = vcmp.lt.s32.totalorder %v3814_v43, 19 }
 0x1f3   : > { %1764 = vrot.lane.b32.xlu1 %v3638_v12, %s6020_s26  ;;  %s3180_s26 = smov 95  }
 0x1f5   : > { %1785 = vrot.lane.b32.xlu0 %v3623_v47, %s6021_s25  ;;  %1797 = vperm.xlu2 %3069, %v2940_v42   ;;  %v1418_v46 = vpop.permute.xlu1 %1417 }
 0x1f6   : > { %v1420_v53 = vmul.f32 %v1418_v46, %v1411_v61  ;;  %v1421_v50 = vmul.f32 %v1418_v46, %v1412_v63 }
 0x1f7   : > { %v1431_v34 = vpop.permute.xlu0 %1430  ;;  %v4111_v6 = vpop.permute.xlu2 %1530 }
 0x1f8   : > { %v1433_v10 = vsel %vm1432_vm3, %v4021_v59, %v1431_v34  ;;  %v1434_v15 = vsel %vm1432_vm3, %v1431_v34, %v4021_v59  ;;  %v1422_v3 = vadd.f32 %v1420_v53, %v1399_v39  ;;  %v1423_v16 = vadd.f32 %v1421_v50, %v1400_v8 }
 0x1f9   : > { %v1435_v59 = vsel %vm1426_vm12, %v1434_v15, 0.0  ;;  %v1436_v60 = vsel %vm1427_vm11, %v1433_v10, 0.0  ;;  %vm6024_vm3 = vcmp.lt.s32.totalorder %v3837_v20, 14  ;;  %vm1480_vm11 = vcmp.lt.s32.totalorder %v3814_v43, 29  ;;  %v2943_v15 = vld [vmem:[%s5776_s6 + $0xe8] sm:$0xff] }
 0x1fa   : > { %vm1451_vm12 = vmand %vm4029_vm15, %vm6024_vm3 }
 0x1fb   : > { %1787 = vrot.lane.b32.xlu1 %v3638_v12, %s6021_s25  ;;  %s3181_s25 = smov 94  }
 0x1fd   : > { %1808 = vrot.lane.b32.xlu0 %v3623_v47, %s6022_s13  ;;  %1820 = vperm.xlu2 %3069, %v2941_v18   ;;  %v1442_v4 = vpop.permute.xlu1 %1441 }
 0x1fe   : > { %v1444_v14 = vmul.f32 %v1442_v4, %v1435_v59  ;;  %v1445_v11 = vmul.f32 %v1442_v4, %v1436_v60 }
 0x1ff   : > { %v1455_v13 = vpop.permute.xlu0 %1454  ;;  %v4131_v58 = vpop.permute.xlu2 %1554 }
 0x200   : > { %v1457_v57 = vsel %vm1456_vm4, %v4049_v7, %v1455_v13  ;;  %v1458_v55 = vsel %vm1456_vm4, %v1455_v13, %v4049_v7  ;;  %v1446_v1 = vadd.f32 %v1444_v14, %v1422_v3  ;;  %v1447_v0 = vadd.f32 %v1445_v11, %v1423_v16 }
 0x201   : > { %v1459_v7 = vsel %vm1450_vm0, %v1458_v55, 0.0  ;;  %v1460_v39 = vsel %vm1451_vm12, %v1457_v57, 0.0  ;;  %vm6026_vm4 = vcmp.lt.s32.totalorder %v3833_v35, 13  ;;  %vm6027_vm0 = vcmp.lt.s32.totalorder %v3837_v20, 13  ;;  %v2944_v55 = vld [vmem:[%s5776_s6 + $0xf0] sm:$0xff] }
 0x202   : > { %vm1474_vm1 = vmand %vm4023_vm6, %vm6026_vm4  ;;  %vm1496_vm12 = vcmp.ge.s32.totalorder %v3821_v22, 1  ;;  %vm1497_vm6 = vcmp.ge.s32.totalorder %v3823_v2, 1  ;;  %vm1499_vm4 = vcmp.lt.s32.totalorder %v3823_v2, 17 }
 0x203   : > { %1810 = vrot.lane.b32.xlu1 %v3638_v12, %s6022_s13  ;;  %vm1475_vm3 = vmand %vm4029_vm15, %vm6027_vm0  ;;  %s3182_s13 = smov 93  }
 0x204   : > { %vm4183_vm0 = vmand %vm1497_vm6, %vm1499_vm4  ;;  %vm1558_vm6 = vcmp.lt.s32.totalorder %v3814_v43, 17  ;;  %vm6035_vm4 = vcmp.ge.s32.totalorder %v3833_v35, 1 }
 0x205   : > { %1837 = vrot.lane.b32.xlu0 %v3623_v47, %s6025_s17  ;;  %1849 = vperm.xlu2 %3069, %v2942_v54   ;;  %v1466_v8 = vpop.permute.xlu1 %1465 }
 0x206   : > { %v1468_v42 = vmul.f32 %v1466_v8, %v1459_v7  ;;  %v1469_v61 = vmul.f32 %v1466_v8, %v1460_v39 }
 0x207   : > { %v1479_v63 = vpop.permute.xlu0 %1478  ;;  %v4151_v46 = vpop.permute.xlu2 %1578 }
 0x208   : > { %v1481_v53 = vsel %vm1480_vm11, %v4070_v31, %v1479_v63  ;;  %v1482_v50 = vsel %vm1480_vm11, %v1479_v63, %v4070_v31  ;;  %v1470_v34 = vadd.f32 %v1468_v42, %v1446_v1  ;;  %v1471_v10 = vadd.f32 %v1469_v61, %v1447_v0 }
 0x209   : > { %vm1498_vm11 = vcmp.lt.s32.totalorder %v3821_v22, 17  ;;  %v1483_v51 = vsel %vm1474_vm1, %v1482_v50, 0.0  ;;  %v1484_v62 = vsel %vm1475_vm3, %v1481_v53, 0.0  ;;  %vm1534_vm3 = vcmp.lt.s32.totalorder %v3814_v43, 18  ;;  %v2945_v50 = vld [vmem:[%s5776_s6 + $0xf8] sm:$0xff] }
 0x20a   : > { %vm4177_vm15 = vmand %vm1496_vm12, %vm1498_vm11 }
 0x20b   : > { %1839 = vrot.lane.b32.xlu1 %v3638_v12, %s6025_s17  ;;  %vm1502_vm1 = vmand %vm4177_vm15, %vm1135_vm5  ;;  %s3183_s17 = smov 83  }
 0x20c   : > { %vm1526_vm12 = vmand %vm4177_vm15, %vm5912_vm10 }
 0x20d   : > { %1860 = vrot.lane.b32.xlu0 %v3623_v47, %s6028_s20  ;;  %1872 = vperm.xlu2 %3069, %v2943_v15   ;;  %v1490_v31 = vpop.permute.xlu1 %1489  ;;  %vm1527_vm11 = vmand %vm4183_vm0, %vm5908_vm13 }
 0x20e   : > { %v1492_v3 = vmul.f32 %v1490_v31, %v1483_v51  ;;  %v1493_v16 = vmul.f32 %v1490_v31, %v1484_v62 }
 0x20f   : > { %v1509_v18 = vpop.permute.xlu0 %1508  ;;  %v4175_v59 = vpop.permute.xlu2 %1601 }
 0x210   : > { %v1511_v4 = vsel %vm1510_vm14, %v4091_v56, %v1509_v18  ;;  %v1512_v14 = vsel %vm1510_vm14, %v1509_v18, %v4091_v56  ;;  %v1494_v13 = vadd.f32 %v1492_v3, %v1470_v34  ;;  %v1495_v57 = vadd.f32 %v1493_v16, %v1471_v10  ;;  %vm1503_vm14 = vmand %vm4183_vm0, %vm5913_vm7 }
 0x211   : > { %v1513_v56 = vsel %vm1502_vm1, %v1512_v14, 0.0  ;;  %v1514_v1 = vsel %vm1503_vm14, %v1511_v4, 0.0  ;;  %v2946_v14 = vld [vmem:[%s5776_s6 + $0x100] sm:$0xff]  ;;  %vm1550_vm1 = vmand %vm4177_vm15, %vm6035_vm4  ;;  %vm5896_vm4 = vcmp.lt.s32.totalorder %v3814_v43, 14 }
 0x212   : > { %vm1551_vm14 = vmand %vm4183_vm0, %vm5907_vm2 }
 0x213   : > { %1862 = vrot.lane.b32.xlu1 %v3638_v12, %s6028_s20  ;;  %s3184_s20 = smov 82  }
 0x215   : > { %1883 = vrot.lane.b32.xlu0 %v3623_v47, %s6033_s24  ;;  %1895 = vperm.xlu2 %3069, %v2944_v55   ;;  %v1520_v0 = vpop.permute.xlu1 %1519 }
 0x216   : > { %v1522_v54 = vmul.f32 %v1520_v0, %v1513_v56  ;;  %v1523_v7 = vmul.f32 %v1520_v0, %v1514_v1 }
 0x217   : > { %v1533_v39 = vpop.permute.xlu0 %1532  ;;  %v4203_v8 = vpop.permute.xlu2 %1624 }
 0x218   : > { %v1535_v42 = vsel %vm1534_vm3, %v4111_v6, %v1533_v39  ;;  %v1536_v61 = vsel %vm1534_vm3, %v1533_v39, %v4111_v6  ;;  %v1524_v63 = vadd.f32 %v1522_v54, %v1494_v13  ;;  %v1525_v53 = vadd.f32 %v1523_v7, %v1495_v57 }
 0x219   : > { %v1537_v6 = vsel %vm1526_vm12, %v1536_v61, 0.0  ;;  %v1538_v34 = vsel %vm1527_vm11, %v1535_v42, 0.0  ;;  %vm5894_vm3 = vcmp.lt.s32.totalorder %v3814_v43, 16  ;;  %v2947_v61 = vld [vmem:[%s5776_s6 + $0x108] sm:$0xff]  ;;  %vm5897_vm12 = vcmp.lt.s32.totalorder %v3814_v43, 15  ;;  %vm1599_vm11 = vmand %vm4177_vm15, %vm5911_vm9 }
 0x21b   : > { %1885 = vrot.lane.b32.xlu1 %v3638_v12, %s6033_s24  ;;  %s3185_s24 = smov 81  }
 0x21d   : > { %1906 = vrot.lane.b32.xlu0 %v3623_v47, %s6034_s19  ;;  %1918 = vperm.xlu2 %3069, %v2945_v50   ;;  %v1544_v10 = vpop.permute.xlu1 %1543 }
 0x21e   : > { %v1546_v15 = vmul.f32 %v1544_v10, %v1537_v6  ;;  %v1547_v51 = vmul.f32 %v1544_v10, %v1538_v34 }
 0x21f   : > { %v1557_v62 = vpop.permute.xlu0 %1556  ;;  %v4223_v31 = vpop.permute.xlu2 %1647 }
 0x220   : > { %v1559_v3 = vsel %vm1558_vm6, %v4131_v58, %v1557_v62  ;;  %v1560_v16 = vsel %vm1558_vm6, %v1557_v62, %v4131_v58  ;;  %v1548_v18 = vadd.f32 %v1546_v15, %v1524_v63  ;;  %v1549_v4 = vadd.f32 %v1547_v51, %v1525_v53  ;;  %vm1600_vm6 = vmand %vm4183_vm0, %vm5910_vm8 }
 0x221   : > { %v1561_v58 = vsel %vm1550_vm1, %v1560_v16, 0.0  ;;  %v1562_v13 = vsel %vm1551_vm14, %v1559_v3, 0.0  ;;  %v2948_v16 = vld [vmem:[%s5776_s6 + $0x110] sm:$0xff]  ;;  %vm6036_vm1 = vcmp.lt.s32.totalorder %v3833_v35, 14 }
 0x222   : > { %vm1622_vm14 = vmand %vm4177_vm15, %vm6036_vm1  ;;  %vm6038_vm1 = vcmp.lt.s32.totalorder %v3833_v35, 13 }
 0x223   : > { %1908 = vrot.lane.b32.xlu1 %v3638_v12, %s6034_s19  ;;  %s6057_s19 = smov 80  }
 0x225   : > { %1929 = vrot.lane.b32.xlu0 %v3623_v47, %s3174_s29  ;;  %1942 = vperm.xlu2 %3069, %v2946_v14   ;;  %v1568_v57 = vpop.permute.xlu1 %1567 }
 0x226   : > { %v1570_v55 = vmul.f32 %v1568_v57, %v1561_v58  ;;  %v1571_v56 = vmul.f32 %v1568_v57, %v1562_v13 }
 0x227   : > { %v1581_v1 = vpop.permute.xlu0 %1580  ;;  %v4242_v0 = vpop.permute.xlu2 %1676 }
 0x228   : > { %v1582_v54 = vsel %vm5894_vm3, %v4151_v46, %v1581_v1  ;;  %v1583_v7 = vsel %vm5894_vm3, %v1581_v1, %v4151_v46  ;;  %v1572_v39 = vadd.f32 %v1570_v55, %v1548_v18  ;;  %v1573_v42 = vadd.f32 %v1571_v56, %v1549_v4 }
 0x229   : > { %v1584_v63 = vsel %vm4177_vm15, %v1583_v7, 0.0  ;;  %v1585_v53 = vsel %vm4183_vm0, %v1582_v54, 0.0  ;;  %v2949_v54 = vld [vmem:[%s5776_s6 + $0x118] sm:$0xff]  ;;  %v4303_v7 = vld [vmem:[%s3617_s18 + $0x10] sm:$0xff]  ;;  %vm5895_vm3 = vcmp.lt.s32.totalorder %v3814_v43, 13 }
 0x22b   : > { %1931 = vrot.lane.b32.xlu1 %v3638_v12, %s3174_s29  ;;  %s3186_s29 = smov 79  }
 0x22d   : > { %1953 = vrot.lane.b32.xlu0 %v3623_v47, %s3175_s28  ;;  %1966 = vperm.xlu2 %3069, %v2947_v61   ;;  %v1591_v50 = vpop.permute.xlu1 %1590 }
 0x22e   : > { %v1593_v46 = vmul.f32 %v1591_v50, %v1584_v63  ;;  %v1594_v6 = vmul.f32 %v1591_v50, %v1585_v53 }
 0x22f   : > { %v1604_v34 = vpop.permute.xlu0 %1603  ;;  %v4260_v10 = vpop.permute.xlu2 %1699 }
 0x230   : > { %v1605_v15 = vsel %vm5897_vm12, %v4175_v59, %v1604_v34  ;;  %v1606_v51 = vsel %vm5897_vm12, %v1604_v34, %v4175_v59  ;;  %v1595_v62 = vadd.f32 %v1593_v46, %v1572_v39  ;;  %v1596_v3 = vadd.f32 %v1594_v6, %v1573_v42 }
 0x231   : > { %v1607_v59 = vsel %vm1599_vm11, %v1606_v51, 0.0  ;;  %v1608_v18 = vsel %vm1600_vm6, %v1605_v15, 0.0  ;;  %vm6037_vm11 = vcmp.lt.s32.totalorder %v3837_v20, 14  ;;  %v2950_v15 = vld [vmem:[%s5776_s6 + $0x120] sm:$0xff]  ;;  %v4327_v51 = vld [vmem:[%s3617_s18 + $0x18] sm:$0xff]  ;;  %vm1667_vm12 = vcmp.ge.s32.totalorder %v3823_v2, 0 }
 0x232   : > { %vm1623_vm6 = vmand %vm4183_vm0, %vm6037_vm11  ;;  %vm6039_vm11 = vcmp.lt.s32.totalorder %v3837_v20, 13 }
 0x233   : > { %1955 = vrot.lane.b32.xlu1 %v3638_v12, %s3175_s28  ;;  %s3187_s28 = smov 78  }
 0x235   : > { %1977 = vrot.lane.b32.xlu0 %v3623_v47, %s3176_s15  ;;  %1990 = vperm.xlu2 %3069, %v2948_v16   ;;  %v1614_v4 = vpop.permute.xlu1 %1613 }
 0x236   : > { %v1616_v14 = vmul.f32 %v1614_v4, %v1607_v59  ;;  %v1617_v58 = vmul.f32 %v1614_v4, %v1608_v18 }
 0x237   : > { %v1627_v13 = vpop.permute.xlu0 %1626  ;;  %v4282_v57 = vpop.permute.xlu2 %1722 }
 0x238   : > { %v1628_v55 = vsel %vm5896_vm4, %v4203_v8, %v1627_v13  ;;  %v1629_v47 = vsel %vm5896_vm4, %v1627_v13, %v4203_v8  ;;  %v1618_v56 = vadd.f32 %v1616_v14, %v1595_v62  ;;  %v1619_v1 = vadd.f32 %v1617_v58, %v1596_v3 }
 0x239   : > { %v1630_v8 = vsel %vm1622_vm14, %v1629_v47, 0.0  ;;  %v1631_v39 = vsel %vm1623_vm6, %v1628_v55, 0.0  ;;  %vm1645_vm14 = vmand %vm4177_vm15, %vm6038_vm1  ;;  %vm1668_vm4 = vcmp.lt.s32.totalorder %v3821_v22, 16  ;;  %vm1669_vm15 = vcmp.lt.s32.totalorder %v3823_v2, 16  ;;  %v2951_v47 = vld [vmem:[%s5776_s6 + $0x128] sm:$0xff] }
 0x23a   : > { %vm1646_vm6 = vmand %vm4183_vm0, %vm6039_vm11  ;;  %vm5900_vm0 = vcmp.lt.s32.totalorder %v3814_v43, 3 }
 0x23b   : > { %1979 = vrot.lane.b32.xlu1 %v3638_v12, %s3176_s15  ;;  %s3188_s15 = smov 77  }
 0x23d   : > { %2007 = vrot.lane.b32.xlu0 %v4303_v7, %s3177_s23  ;;  %2020 = vperm.xlu2 %3069, %v2949_v54   ;;  %v1637_v42 = vpop.permute.xlu1 %1636 }
 0x23e   : > { %v1639_v61 = vmul.f32 %v1637_v42, %v1630_v8  ;;  %v1640_v63 = vmul.f32 %v1637_v42, %v1631_v39 }
 0x23f   : > { %v1650_v53 = vpop.permute.xlu0 %1649  ;;  %v4307_v50 = vpop.permute.xlu2 %1751 }
 0x240   : > { %v1651_v12 = vsel %vm5895_vm3, %v4223_v31, %v1650_v53  ;;  %v1652_v46 = vsel %vm5895_vm3, %v1650_v53, %v4223_v31  ;;  %v1641_v6 = vadd.f32 %v1639_v61, %v1618_v56  ;;  %v1642_v34 = vadd.f32 %v1640_v63, %v1619_v1 }
 0x241   : > { %vm1666_vm3 = vcmp.ge.s32.totalorder %v3821_v22, 0  ;;  %v1653_v60 = vsel %vm1645_vm14, %v1652_v46, 0.0  ;;  %v1654_v31 = vsel %vm1646_vm6, %v1651_v12, 0.0  ;;  %vm4350_vm14 = vmand %vm1667_vm12, %vm1669_vm15  ;;  %vm5899_vm12 = vcmp.lt.s32.totalorder %v3814_v43, 2  ;;  %v2952_v46 = vld [vmem:[%s5776_s6 + $0x130] sm:$0xff] }
 0x242   : > { %vm4340_vm1 = vmand %vm1666_vm3, %vm1668_vm4  ;;  %vm5898_vm15 = vcmp.lt.s32.totalorder %v3814_v43, 1 }
 0x243   : > { %2009 = vrot.lane.b32.xlu1 %v4327_v51, %s3177_s23  ;;  %vm1672_vm3 = vmand %vm4340_vm1, %vm1135_vm5  ;;  %s436_s23 = scalar_lea.vmem %s5782_s12, %s3268_s27 }
 0x244   : > { %vm1673_vm4 = vmand %vm4350_vm14, %vm5913_vm7 }
 0x245   : > { %2031 = vrot.lane.b32.xlu0 %v4303_v7, %s3178_s30  ;;  %2044 = vperm.xlu2 %3069, %v2950_v15   ;;  %v1660_v11 = vpop.permute.xlu1 %1659  ;;  %vm1695_vm11 = vmand %vm4340_vm1, %vm5912_vm10 }
 0x246   : > { %v1662_v62 = vmul.f32 %v1660_v11, %v1653_v60  ;;  %v1663_v3 = vmul.f32 %v1660_v11, %v1654_v31  ;;  %vm1696_vm6 = vmand %vm4350_vm14, %vm5908_vm13 }
 0x247   : > { %v1679_v16 = vpop.permute.xlu0 %1678  ;;  %v4336_v59 = vpop.permute.xlu2 %1774 }
 0x248   : > { %v1680_v4 = vsel %vm5900_vm0, %v4242_v0, %v1679_v16  ;;  %v1681_v14 = vsel %vm5900_vm0, %v1679_v16, %v4242_v0  ;;  %v1664_v13 = vadd.f32 %v1662_v62, %v1641_v6  ;;  %v1665_v55 = vadd.f32 %v1663_v3, %v1642_v34 }
 0x249   : > { %v1682_v0 = vsel %vm1672_vm3, %v1681_v14, 0.0  ;;  %v1683_v56 = vsel %vm1673_vm4, %v1680_v4, 0.0  ;;  %v2953_v14 = vld [vmem:[%s5776_s6 + $0x138] sm:$0xff]  ;;  %vm6045_vm3 = vcmp.ge.s32.totalorder %v3833_v35, 1  ;;  %vm5906_vm0 = vcmp.lt.s32.totalorder %v3814_v43, 125 }
 0x24a   : > { %vm1718_vm4 = vmand %vm4340_vm1, %vm6045_vm3 }
 0x24b   : > { %2033 = vrot.lane.b32.xlu1 %v4327_v51, %s3178_s30  ;;  %vm1761_vm3 = vmand %vm4350_vm14, %vm5910_vm8 }
 0x24d   : > { %2055 = vrot.lane.b32.xlu0 %v4303_v7, %s3179_s16  ;;  %2068 = vperm.xlu2 %3069, %v2951_v47   ;;  %v1689_v1 = vpop.permute.xlu1 %1688 }
 0x24e   : > { %v1691_v54 = vmul.f32 %v1689_v1, %v1682_v0  ;;  %v1692_v8 = vmul.f32 %v1689_v1, %v1683_v56 }
 0x24f   : > { %v1702_v39 = vpop.permute.xlu0 %1701  ;;  %v4368_v42 = vpop.permute.xlu2 %1797 }
 0x250   : > { %v1703_v61 = vsel %vm5899_vm12, %v4260_v10, %v1702_v39  ;;  %v1704_v63 = vsel %vm5899_vm12, %v1702_v39, %v4260_v10  ;;  %v1693_v53 = vadd.f32 %v1691_v54, %v1664_v13  ;;  %v1694_v12 = vadd.f32 %v1692_v8, %v1665_v55 }
 0x251   : > { %v1705_v10 = vsel %vm1695_vm11, %v1704_v63, 0.0  ;;  %v1706_v6 = vsel %vm1696_vm6, %v1703_v61, 0.0  ;;  %vm1719_vm11 = vmand %vm4350_vm14, %vm5907_vm2  ;;  %v1746_v13 = vsel %vm4350_vm14, %v4327_v51, 0.0  ;;  %vm5901_vm12 = vcmp.lt.s32.totalorder %v3814_v43, 126 }
 0x252   : > { %v1755_v61 = vmul.f32 %v4307_v50, %v1746_v13  ;;  %vm1760_vm6 = vmand %vm4340_vm1, %vm5911_vm9 }
 0x253   : > { %2057 = vrot.lane.b32.xlu1 %v4327_v51, %s3179_s16 }
 0x255   : > { %2079 = vrot.lane.b32.xlu0 %v4303_v7, %s6044_s22  ;;  %2091 = vperm.xlu2 %3069, %v2952_v46   ;;  %v1712_v34 = vpop.permute.xlu1 %1711 }
 0x256   : > { %v1714_v15 = vmul.f32 %v1712_v34, %v1705_v10  ;;  %v1715_v60 = vmul.f32 %v1712_v34, %v1706_v6 }
 0x257   : > { %v1725_v31 = vpop.permute.xlu0 %1724  ;;  %v4391_v11 = vpop.permute.xlu2 %1820 }
 0x258   : > { %v1726_v62 = vsel %vm5898_vm15, %v4282_v57, %v1725_v31  ;;  %v1727_v3 = vsel %vm5898_vm15, %v1725_v31, %v4282_v57  ;;  %v1716_v16 = vadd.f32 %v1714_v15, %v1693_v53  ;;  %v1717_v4 = vadd.f32 %v1715_v60, %v1694_v12  ;;  %v2954_v12 = vld [vmem:[%s5776_s6 + $0x140] sm:$0xff] }
 0x259   : > { %v1745_v57 = vsel %vm4340_vm1, %v4303_v7, 0.0  ;;  %v1728_v55 = vsel %vm1718_vm4, %v1727_v3, 0.0  ;;  %v1729_v47 = vsel %vm1719_vm11, %v1726_v62, 0.0  ;;  %vm5902_vm4 = vcmp.lt.s32.totalorder %v3814_v43, 127 }
 0x25a   : > { %v1754_v39 = vmul.f32 %v4307_v50, %v1745_v57  ;;  %vm6046_vm11 = vcmp.lt.s32.totalorder %v3833_v35, 14 }
 0x25b   : > { %2081 = vrot.lane.b32.xlu1 %v4327_v51, %s6044_s22  ;;  %vm1783_vm15 = vmand %vm4340_vm1, %vm6046_vm11  ;;  %vm6048_vm11 = vcmp.lt.s32.totalorder %v3833_v35, 13 }
 0x25d   : > { %2102 = vrot.lane.b32.xlu0 %v4303_v7, %s3180_s26  ;;  %2115 = vperm.xlu2 %3069, %v2953_v14   ;;  %v1735_v0 = vpop.permute.xlu1 %1734 }
 0x25e   : > { %v1737_v56 = vmul.f32 %v1735_v0, %v1728_v55  ;;  %v1738_v1 = vmul.f32 %v1735_v0, %v1729_v47 }
 0x25f   : > { %v1763_v54 = vpop.permute.xlu0 %1762  ;;  %v4419_v8 = vpop.permute.xlu2 %1849 }
 0x260   : > { %v1739_v63 = vadd.f32 %v1737_v56, %v1716_v16  ;;  %v1740_v53 = vadd.f32 %v1738_v1, %v1717_v4  ;;  %v2955_v4 = vld [vmem:[%s5776_s6 + $0x148] sm:$0xff] }
 0x262   : > { %v1756_v46 = vadd.f32 %v1754_v39, %v1739_v63  ;;  %v1757_v10 = vadd.f32 %v1755_v61, %v1740_v53  ;;  %v2956_v61 = vld [vmem:[%s5776_s6 + $0x150] sm:$0xff] }
 0x263   : > { %2104 = vrot.lane.b32.xlu1 %v4327_v51, %s3180_s26 }
 0x265   : > { %2126 = vrot.lane.b32.xlu0 %v4303_v7, %s3181_s25  ;;  %2139 = vperm.xlu2 %3069, %v2954_v12   ;;  %v1765_v50 = vpop.permute.xlu1 %1764 }
 0x266   : > { %v1766_v6 = vsel %vm5902_vm4, %v1763_v54, %v1765_v50  ;;  %v1767_v34 = vsel %vm5902_vm4, %v1765_v50, %v1763_v54  ;;  %vm1829_vm4 = vcmp.lt.s32.totalorder %v3821_v22, 15 }
 0x267   : > { %v1786_v15 = vpop.permute.xlu0 %1785  ;;  %v4441_v60 = vpop.permute.xlu2 %1872  ;;  %v1768_v31 = vsel %vm1760_vm6, %v1766_v6, 0.0  ;;  %v1769_v62 = vsel %vm1761_vm3, %v1767_v34, 0.0  ;;  %vm6047_vm6 = vcmp.lt.s32.totalorder %v3837_v20, 14 }
 0x268   : > { %v1777_v3 = vmul.f32 %v4336_v59, %v1768_v31  ;;  %v1778_v16 = vmul.f32 %v4336_v59, %v1769_v62  ;;  %vm1784_vm3 = vmand %vm4350_vm14, %vm6047_vm6  ;;  %v2957_v62 = vld [vmem:[%s5776_s6 + $0x158] sm:$0xff] }
 0x269   : > { %vm4475_vm6 = vmand %vm4340_vm1, %vm6048_vm11  ;;  %vm1828_vm1 = vcmp.ge.s32.totalorder %v3823_v2, 4294967295 }
 0x26a   : > { %v1779_v14 = vadd.f32 %v1777_v3, %v1756_v46  ;;  %v1780_v57 = vadd.f32 %v1778_v16, %v1757_v10  ;;  %v2432_v3 = vld [vmem:[%s5779_s9 + $0x38] sm:$0xff] }
 0x26b   : > { %2128 = vrot.lane.b32.xlu1 %v4327_v51, %s3181_s25 }
 0x26d   : > { %2150 = vrot.lane.b32.xlu0 %v4303_v7, %s3182_s13  ;;  %2163 = vperm.xlu2 %3069, %v2955_v4   ;;  %v1788_v59 = vpop.permute.xlu1 %1787 }
 0x26e   : > { %v1789_v13 = vsel %vm5901_vm12, %v1786_v15, %v1788_v59  ;;  %v1790_v55 = vsel %vm5901_vm12, %v1788_v59, %v1786_v15  ;;  %vm1827_vm12 = vcmp.ge.s32.totalorder %v3821_v22, 4294967295 }
 0x26f   : > { %v1809_v47 = vpop.permute.xlu0 %1808  ;;  %v4463_v0 = vpop.permute.xlu2 %1895  ;;  %v1791_v56 = vsel %vm1783_vm15, %v1789_v13, 0.0  ;;  %v1792_v1 = vsel %vm1784_vm3, %v1790_v55, 0.0  ;;  %vm6051_vm15 = vcmp.lt.s32.totalorder %v3837_v20, 13  ;;  %vm4499_vm11 = vmand %vm1827_vm12, %vm1829_vm4 }
 0x270   : > { %v1800_v54 = vmul.f32 %v4368_v42, %v1791_v56  ;;  %v1801_v39 = vmul.f32 %v4368_v42, %v1792_v1  ;;  %vm1807_vm3 = vmand %vm4350_vm14, %vm6051_vm15  ;;  %vm1830_vm14 = vcmp.lt.s32.totalorder %v3823_v2, 15 }
 0x271   : > { %vm4506_vm15 = vmand %vm1828_vm1, %vm1830_vm14  ;;  %vm5904_vm14 = vcmp.lt.s32.totalorder %v3814_v43, 114 }
 0x272   : > { %v1802_v63 = vadd.f32 %v1800_v54, %v1779_v14  ;;  %v1803_v53 = vadd.f32 %v1801_v39, %v1780_v57  ;;  %vm1833_vm12 = vmand %vm4499_vm11, %vm1135_vm5  ;;  %v2958_v54 = vld [vmem:[%s5776_s6 + $0x160] sm:$0xff] }
 0x273   : > { %2152 = vrot.lane.b32.xlu1 %v4327_v51, %s3182_s13  ;;  %vm1834_vm4 = vmand %vm4506_vm15, %vm5913_vm7 }
 0x274   : > { %vm1857_vm1 = vmand %vm4506_vm15, %vm5908_vm13  ;;  %vm1998_vm13 = vcmp.ge.s32.totalorder %v3823_v2, 4294967294 }
 0x275   : > { %2180 = vrot.lane.b32.xlu0 %v4303_v7, %s3183_s17  ;;  %2193 = vperm.xlu2 %3069, %v2956_v61   ;;  %v1811_v42 = vpop.permute.xlu1 %1810 }
 0x276   : > { %v1812_v18 = vsel %vm5906_vm0, %v1809_v47, %v1811_v42  ;;  %v1813_v46 = vsel %vm5906_vm0, %v1811_v42, %v1809_v47  ;;  %vm1997_vm0 = vcmp.ge.s32.totalorder %v3821_v22, 4294967294 }
 0x277   : > { %v1838_v10 = vpop.permute.xlu0 %1837  ;;  %v4491_v50 = vpop.permute.xlu2 %1918  ;;  %v1814_v58 = vsel %vm4475_vm6, %v1812_v18, 0.0  ;;  %v1815_v6 = vsel %vm1807_vm3, %v1813_v46, 0.0  ;;  %vm5905_vm6 = vcmp.lt.s32.totalorder %v3814_v43, 115  ;;  %vm1856_vm3 = vmand %vm4499_vm11, %vm5912_vm10 }
 0x278   : > { %v1823_v34 = vmul.f32 %v4391_v11, %v1814_v58  ;;  %v1824_v15 = vmul.f32 %v4391_v11, %v1815_v6  ;;  %v2959_v6 = vld [vmem:[%s5776_s6 + $0x168] sm:$0xff] }
 0x27a   : > { %v1825_v16 = vadd.f32 %v1823_v34, %v1802_v63  ;;  %v1826_v4 = vadd.f32 %v1824_v15, %v1803_v53 }
 0x27b   : > { %2182 = vrot.lane.b32.xlu1 %v4327_v51, %s3183_s17 }
 0x27d   : > { %2204 = vrot.lane.b32.xlu0 %v4303_v7, %s3184_s20  ;;  %2217 = vperm.xlu2 %3069, %v2957_v62   ;;  %v1840_v11 = vpop.permute.xlu1 %1839 }
 0x27e   : > { %v1841_v14 = vsel %vm5905_vm6, %v1838_v10, %v1840_v11  ;;  %v1842_v57 = vsel %vm5905_vm6, %v1840_v11, %v1838_v10 }
 0x27f   : > { %v1861_v59 = vpop.permute.xlu0 %1860  ;;  %v1843_v13 = vsel %vm1833_vm12, %v1841_v14, 0.0  ;;  %v1844_v55 = vsel %vm1834_vm4, %v1842_v57, 0.0  ;;  %v4525_v47 = vpop.permute.xlu2 %1942  ;;  %vm6056_vm12 = vcmp.ge.s32.totalorder %v3833_v35, 1 }
 0x280   : > { %v1852_v56 = vmul.f32 %v4419_v8, %v1843_v13  ;;  %v1853_v1 = vmul.f32 %v4419_v8, %v1844_v55  ;;  %vm1879_vm4 = vmand %vm4499_vm11, %vm6056_vm12  ;;  %v2960_v13 = vld [vmem:[%s5776_s6 + $0x170] sm:$0xff]  ;;  %vm478_vm12 = vcmp.lt.s32.totalorder %v3814_v43, 112 }
 0x282   : > { %v1854_v39 = vadd.f32 %v1852_v56, %v1825_v16  ;;  %v1855_v61 = vadd.f32 %v1853_v1, %v1826_v4 }
 0x283   : > { %2206 = vrot.lane.b32.xlu1 %v4327_v51, %s3184_s20 }
 0x285   : > { %2228 = vrot.lane.b32.xlu0 %v4303_v7, %s3185_s24  ;;  %2241 = vperm.xlu2 %3069, %v2958_v54   ;;  %v1863_v8 = vpop.permute.xlu1 %1862 }
 0x286   : > { %v1864_v63 = vsel %vm5904_vm14, %v1861_v59, %v1863_v8  ;;  %v1865_v53 = vsel %vm5904_vm14, %v1863_v8, %v1861_v59  ;;  %vm6058_vm14 = vcmp.lt.s32.totalorder %v3833_v35, 14 }
 0x287   : > { %v1884_v12 = vpop.permute.xlu0 %1883  ;;  %v1866_v42 = vsel %vm1856_vm3, %v1864_v63, 0.0  ;;  %v1867_v18 = vsel %vm1857_vm1, %v1865_v53, 0.0  ;;  %v4549_v58 = vpop.permute.xlu2 %1966  ;;  %vm1880_vm3 = vmand %vm4506_vm15, %vm5907_vm2  ;;  %vm5903_vm1 = vcmp.lt.s32.totalorder %v3814_v43, 113  ;;  %vm1999_vm2 = vcmp.lt.s32.totalorder %v3821_v22, 14 }
 0x288   : > { %v1875_v46 = vmul.f32 %v4441_v60, %v1866_v42  ;;  %v1876_v10 = vmul.f32 %v4441_v60, %v1867_v18  ;;  %v2961_v42 = vld [vmem:[%s5776_s6 + $0x178] sm:$0xff] }
 0x28a   : > { %v1877_v34 = vadd.f32 %v1875_v46, %v1854_v39  ;;  %v1878_v15 = vadd.f32 %v1876_v10, %v1855_v61 }
 0x28b   : > { %2230 = vrot.lane.b32.xlu1 %v4327_v51, %s3185_s24 }
 0x28d   : > { %2252 = vrot.lane.b32.xlu0 %v4303_v7, %s6057_s19  ;;  %2264 = vperm.xlu2 %3069, %v2959_v6   ;;  %v1886_v60 = vpop.permute.xlu1 %1885 }
 0x28e   : > { %v1887_v62 = vsel %vm5903_vm1, %v1884_v12, %v1886_v60  ;;  %v1888_v16 = vsel %vm5903_vm1, %v1886_v60, %v1884_v12  ;;  %vm1928_vm1 = vmand %vm4506_vm15, %vm5910_vm8 }
 0x28f   : > { %v1907_v4 = vpop.permute.xlu0 %1906  ;;  %v1889_v11 = vsel %vm1879_vm4, %v1887_v62, 0.0  ;;  %v1890_v14 = vsel %vm1880_vm3, %v1888_v16, 0.0  ;;  %v4575_v1 = vpop.permute.xlu2 %1990  ;;  %vm1927_vm4 = vmand %vm4499_vm11, %vm5911_vm9  ;;  %vm1933_vm3 = vcmp.lt.s32.totalorder %v3814_v43, 111 }
 0x290   : > { %v1898_v57 = vmul.f32 %v4463_v0, %v1889_v11  ;;  %v1899_v59 = vmul.f32 %v4463_v0, %v1890_v14  ;;  %v2962_v11 = vld [vmem:[%s5776_s6 + $0x180] sm:$0xff] }
 0x292   : > { %v1900_v55 = vadd.f32 %v1898_v57, %v1877_v34  ;;  %v1901_v56 = vadd.f32 %v1899_v59, %v1878_v15 }
 0x293   : > { %2254 = vrot.lane.b32.xlu1 %v4327_v51, %s6057_s19 }
 0x295   : > { %2275 = vrot.lane.b32.xlu0 %v4303_v7, %s3186_s29  ;;  %2288 = vperm.xlu2 %3069, %v2960_v13   ;;  %v1909_v54 = vpop.permute.xlu1 %1908 }
 0x296   : > { %v1910_v0 = vsel %vm478_vm12, %v1907_v4, %v1909_v54  ;;  %v1911_v39 = vsel %vm478_vm12, %v1909_v54, %v1907_v4 }
 0x297   : > { %v1930_v61 = vpop.permute.xlu0 %1929  ;;  %v1912_v8 = vsel %vm4499_vm11, %v1910_v0, 0.0  ;;  %v1913_v63 = vsel %vm4506_vm15, %v1911_v39, 0.0 }
 0x298   : > { %v1921_v53 = vmul.f32 %v4491_v50, %v1912_v8  ;;  %v1922_v12 = vmul.f32 %v4491_v50, %v1913_v63  ;;  %v4605_v50 = vpop.permute.xlu2 %2020  ;;  %v2431_v8 = vld [vmem:[%s5779_s9 + $0x30] sm:$0xff] }
 0x29a   : > { %v1923_v18 = vadd.f32 %v1921_v53, %v1900_v55  ;;  %v1924_v46 = vadd.f32 %v1922_v12, %v1901_v56 }
 0x29b   : > { %2277 = vrot.lane.b32.xlu1 %v4327_v51, %s3186_s29 }
 0x29d   : > { %2299 = vrot.lane.b32.xlu0 %v4303_v7, %s3187_s28  ;;  %2312 = vperm.xlu2 %3069, %v2961_v42   ;;  %v1932_v10 = vpop.permute.xlu1 %1931 }
 0x29e   : > { %v1934_v6 = vsel %vm1933_vm3, %v1930_v61, %v1932_v10  ;;  %v1935_v34 = vsel %vm1933_vm3, %v1932_v10, %v1930_v61  ;;  %vm1951_vm3 = vmand %vm4499_vm11, %vm6058_vm14  ;;  %vm6060_vm14 = vcmp.lt.s32.totalorder %v3833_v35, 13 }
 0x29f   : > { %v1954_v15 = vpop.permute.xlu0 %1953  ;;  %v1936_v60 = vsel %vm1927_vm4, %v1934_v6, 0.0  ;;  %v1937_v62 = vsel %vm1928_vm1, %v1935_v34, 0.0  ;;  %vm1957_vm4 = vcmp.lt.s32.totalorder %v3814_v43, 110  ;;  %vm6059_vm1 = vcmp.lt.s32.totalorder %v3837_v20, 14 }
 0x2a0   : > { %v1945_v16 = vmul.f32 %v4525_v47, %v1936_v60  ;;  %v1946_v4 = vmul.f32 %v4525_v47, %v1937_v62  ;;  %vm1952_vm6 = vmand %vm4506_vm15, %vm6059_vm1  ;;  %v4623_v56 = vpop.permute.xlu2 %2044  ;;  %v2428_v60 = vld [vmem:[%s5779_s9 + $0x18] sm:$0xff] }
 0x2a2   : > { %v1947_v14 = vadd.f32 %v1945_v16, %v1923_v18  ;;  %v1948_v57 = vadd.f32 %v1946_v4, %v1924_v46 }
 0x2a3   : > { %2301 = vrot.lane.b32.xlu1 %v4327_v51, %s3187_s28 }
 0x2a5   : > { %2323 = vrot.lane.b32.xlu0 %v4303_v7, %s3188_s15  ;;  %2336 = vperm.xlu2 %3069, %v2962_v11   ;;  %v1956_v47 = vpop.permute.xlu1 %1955  ;;  %v2343_v7 = vld [vmem:[%s5777_s7] sm:$0xff] }
 0x2a6   : > { %v1958_v59 = vsel %vm1957_vm4, %v1954_v15, %v1956_v47  ;;  %v1959_v13 = vsel %vm1957_vm4, %v1956_v47, %v1954_v15  ;;  %vm6061_vm4 = vcmp.lt.s32.totalorder %v3837_v20, 13  ;;  %v2430_v15 = vld [vmem:[%s5779_s9 + $0x28] sm:$0xff]  ;;  %v468_v47 = vmul.f32 %v3389_v26, %v3280_v5 }
 0x2a7   : > { %v1978_v55 = vpop.permute.xlu0 %1977  ;;  %v1960_v54 = vsel %vm1951_vm3, %v1958_v59, 0.0  ;;  %v1961_v0 = vsel %vm1952_vm6, %v1959_v13, 0.0  ;;  %vm1975_vm6 = vmand %vm4499_vm11, %vm6060_vm14  ;;  %vm1981_vm3 = vcmp.lt.s32.totalorder %v3814_v43, 109  ;;  %vm2000_vm11 = vcmp.lt.s32.totalorder %v3823_v2, 14 }
 0x2a8   : > { %v1969_v39 = vmul.f32 %v4549_v58, %v1960_v54  ;;  %v1970_v61 = vmul.f32 %v4549_v58, %v1961_v0  ;;  %vm1976_vm1 = vmand %vm4506_vm15, %vm6061_vm4  ;;  %v4656_v34 = vpop.permute.xlu2 %2068  ;;  %v4698_v59 = vsel %vm478_vm12, %v3397_v28, %v3387_v25  ;;  %v469_v0 = vmul.f32 %v3389_v26, %v3293_v9 }
 0x2a9   : > { %vm4652_vm15 = vmand %vm1997_vm0, %vm1999_vm2  ;;  %vm2011_vm0 = vcmp.lt.s32.totalorder %v3814_v43, 99 }
 0x2aa   : > { %v1971_v63 = vadd.f32 %v1969_v39, %v1947_v14  ;;  %v1972_v53 = vadd.f32 %v1970_v61, %v1948_v57  ;;  %vm4664_vm14 = vmand %vm1998_vm13, %vm2000_vm11  ;;  %v4689_v14 = vsel %vm478_vm12, %v3387_v25, %v3397_v28  ;;  %v458_v25 = vmul.f32 %v3379_v23, %v3280_v5 }
 0x2ab   : > { %2325 = vrot.lane.b32.xlu1 %v4327_v51, %s3188_s15  ;;  %vm4672_vm2 = vmand %vm4652_vm15, %vm1135_vm5  ;;  %v486_v28 = vmul.f32 %v3356_v17, %v4689_v14  ;;  %vm6071_vm12 = vcmp.lt.s32.totalorder %v3814_v43, 127 }
 0x2ac   : > { %vm4681_vm13 = vmand %vm4664_vm14, %vm5913_vm7 }
 0x2ad   : > { %2346 = vperm.xlu0 %3068, %v2343_v7   ;;  %2465 = vperm.xlu2 %3069, %v2431_v8   ;;  %v1980_v58 = vpop.permute.xlu1 %1979  ;;  %vm4749_vm11 = vmand %vm4652_vm15, %vm5912_vm10  ;;  %vm2172_vm10 = vcmp.lt.s32.totalorder %v3821_v22, 13 }
 0x2ae   : > { %v1982_v51 = vsel %vm1981_vm3, %v1978_v55, %v1980_v58  ;;  %v1983_v12 = vsel %vm1981_vm3, %v1980_v58, %v1978_v55  ;;  %vm6070_vm3 = vcmp.lt.s32.totalorder %v3814_v43, 15  ;;  %v487_v58 = vmul.f32 %v3356_v17, %v4698_v59 }
 0x2af   : > { %v2008_v42 = vpop.permute.xlu0 %2007  ;;  %v1984_v31 = vsel %vm1975_vm6, %v1982_v51, 0.0  ;;  %v1985_v18 = vsel %vm1976_vm1, %v1983_v12, 0.0  ;;  %vm525_vm6 = vcmp.lt.s32.totalorder %v3814_v43, 96  ;;  %v505_v39 = vsel %vm6070_vm3, %v3371_v21, %v3409_v32  ;;  %vm6072_vm4 = vmmov %vm6070_vm3  ;;  %v2427_v12 = vld [vmem:[%s5779_s9 + $0x10] sm:$0xff] }
 0x2b0   : > { %v1993_v46 = vmul.f32 %v4575_v1, %v1984_v31  ;;  %v1994_v10 = vmul.f32 %v4575_v1, %v1985_v18  ;;  %v497_v51 = vsel %vm6071_vm12, %v3364_v19, %v3399_v29  ;;  %vm6073_vm1 = vmmov %vm6071_vm12  ;;  %vm5909_vm3 = vcmp.lt.s32.totalorder %v3814_v43, 80 }
 0x2b1   : > { %v506_v17 = vsel %vm5911_vm9, %v497_v51, %v505_v39  ;;  %vm6079_vm12 = vcmp.lt.s32.totalorder %v3814_v43, 14  ;;  %v4830_v51 = vsel %vm5909_vm3, %v3444_v45, %v3453_v48 }
 0x2b2   : > { %v1995_v62 = vadd.f32 %v1993_v46, %v1971_v63  ;;  %v1996_v16 = vadd.f32 %v1994_v10, %v1972_v53  ;;  %v2429_v63 = vld [vmem:[%s5779_s9 + $0x20] sm:$0xff]  ;;  %v459_v53 = vmul.f32 %v3379_v23, %v3293_v9  ;;  %v551_v11 = vsel %vm6079_vm12, %v3433_v41, %v3442_v44 }
 0x2b3   : > { %2470 = vperm.xlu1 %3070, %v2432_v3   ;;  %v2425_v23 = vld [vmem:[%s5779_s9] sm:$0xff] }
 0x2b4   : > { %v471_v46 = vadd.f32 %v469_v0, %v459_v53 }
 0x2b5   : > { %2460 = vperm.xlu0 %3068, %v2430_v15   ;;  %2450 = vperm.xlu2 %3069, %v2428_v60   ;;  %v2010_v57 = vpop.permute.xlu1 %2009 }
 0x2b6   : > { %v2012_v13 = vsel %vm2011_vm0, %v2008_v42, %v2010_v57  ;;  %v2013_v55 = vsel %vm2011_vm0, %v2010_v57, %v2008_v42  ;;  %v470_v42 = vadd.f32 %v468_v47, %v458_v25  ;;  %vm6076_vm0 = vcmp.ge.s32.totalorder %v3837_v20, 2 }
 0x2b7   : > { %v2032_v54 = vpop.permute.xlu0 %2031  ;;  %v2014_v61 = vsel %vm4672_vm2, %v2012_v13, 0.0  ;;  %v2015_v7 = vsel %vm4681_vm13, %v2013_v55, 0.0  ;;  %vm2035_vm2 = vcmp.lt.s32.totalorder %v3814_v43, 98  ;;  %vm4766_vm13 = vmand %vm4664_vm14, %vm6076_vm0  ;;  %v489_v60 = vadd.f32 %v487_v58, %v471_v46 }
 0x2b8   : > { %v2023_v8 = vmul.f32 %v4605_v50, %v2014_v61  ;;  %v2024_v26 = vmul.f32 %v4605_v50, %v2015_v7  ;;  %v504_v50 = vsel %vm6072_vm4, %v3409_v32, %v3371_v21  ;;  %v498_v21 = vsel %vm6073_vm1, %v3399_v29, %v3364_v19  ;;  %v4743_v32 = vpop.permute.xlu2 %2091  ;;  %vm6080_vm4 = vmmov %vm6079_vm12 }
 0x2b9   : > { %v488_v3 = vadd.f32 %v486_v28, %v470_v42  ;;  %v507_v15 = vsel %vm5910_vm8, %v498_v21, %v504_v50  ;;  %v4760_v19 = vsel %vm525_vm6, %v3420_v36, %v3381_v24  ;;  %v552_v57 = vsel %vm6080_vm4, %v3442_v44, %v3433_v41  ;;  %v6092_v42 = vld [vmem:[#allocation6_spill] sm:$0xff] }
 0x2ba   : > { %v2025_v31 = vadd.f32 %v2023_v8, %v1995_v62  ;;  %v2026_v18 = vadd.f32 %v2024_v26, %v1996_v16  ;;  %v515_v62 = vmul.f32 %v3411_v33, %v506_v17  ;;  %v4775_v16 = vsel %vm525_vm6, %v3381_v24, %v3420_v36  ;;  %v6094_v21 = vld [vmem:[#allocation2_spill] sm:$0xff] }
 0x2bb   : > { %2455 = vperm.xlu1 %3070, %v2429_v63   ;;  %v516_v0 = vmul.f32 %v3411_v33, %v507_v15  ;;  %v533_v24 = vmul.f32 %v3422_v37, %v4760_v19  ;;  %vm6081_vm1 = vcmp.lt.s32.totalorder %v3814_v43, 126  ;;  %v534_v25 = vmul.f32 %v3422_v37, %v4775_v16 }
 0x2bc   : > { %v544_v61 = vsel %vm6081_vm1, %v3431_v40, %v3391_v27  ;;  %v517_v7 = vadd.f32 %v515_v62, %v488_v3  ;;  %vm6084_vm0 = vcmp.lt.s32.totalorder %v3837_v20, 14  ;;  %vm2059_vm4 = vcmp.lt.s32.totalorder %v3814_v43, 97 }
 0x2bd   : > { %2445 = vperm.xlu0 %3068, %v2427_v12   ;;  %2435 = vperm.xlu2 %3069, %v2425_v23   ;;  %v2034_v4 = vpop.permute.xlu1 %2033  ;;  %v518_v26 = vadd.f32 %v516_v0, %v489_v60  ;;  %v4836_v50 = vsel %vm5909_vm3, %v3453_v48, %v3444_v45  ;;  %vm6091_vm3 = vcmp.lt.s32.totalorder %v3814_v43, 125  ;;  %v580_v10 = vmul.f32 %v6094_v21, %v4830_v51 }
 0x2be   : > { %v2036_v47 = vsel %vm2035_vm2, %v2032_v54, %v2034_v4  ;;  %v2037_v13 = vsel %vm2035_vm2, %v2034_v4, %v2032_v54  ;;  %vm6082_vm2 = vmmov %vm6081_vm1  ;;  %v2426_v54 = vld [vmem:[%s5779_s9 + $0x8] sm:$0xff]  ;;  %v535_v63 = vadd.f32 %v533_v24, %v517_v7  ;;  %vm6088_vm1 = vcmp.ge.s32.totalorder %v3837_v20, 1  ;;  %v6098_v24 = vld [vmem:[#allocation14_spill] sm:$0xff] }
 0x2bf   : > { %v2056_v55 = vpop.permute.xlu0 %2055  ;;  %v2038_v36 = vsel %vm4749_vm11, %v2036_v47, 0.0  ;;  %v2039_v39 = vsel %vm4766_vm13, %v2037_v13, 0.0  ;;  %v545_v41 = vsel %vm6082_vm2, %v3391_v27, %v3431_v40  ;;  %vm6083_vm11 = vcmp.lt.s32.totalorder %v3833_v35, 14  ;;  %v2726_v27 = vld [vmem:[%s5781_s11] sm:$0xff]  ;;  %vm4842_vm2 = vmand %vm4664_vm14, %vm6088_vm1 }
 0x2c0   : > { %v2047_v33 = vmul.f32 %v4623_v56, %v2038_v36  ;;  %v2048_v44 = vmul.f32 %v4623_v56, %v2039_v39  ;;  %v553_v28 = vsel %vm6083_vm11, %v544_v61, %v552_v57  ;;  %v554_v8 = vsel %vm6084_vm0, %v545_v41, %v551_v11  ;;  %v4849_v23 = vpop.permute.xlu2 %2115  ;;  %v2727_v57 = vld [vmem:[%s5781_s11 + $0x8] sm:$0xff]  ;;  %v6099_v36 = vld [vmem:[#allocation5_spill] sm:$0xff] }
 0x2c1   : > { %vm6085_vm13 = vcmp.ge.s32.totalorder %v3833_v35, 1  ;;  %v562_v53 = vmul.f32 %v3401_v30, %v553_v28  ;;  %v563_v58 = vmul.f32 %v3401_v30, %v554_v8  ;;  %v536_v30 = vadd.f32 %v534_v25, %v518_v26  ;;  %v6103_v28 = vld [vmem:[#allocation9_spill] sm:$0xff]  ;;  %v6104_v8 = vld [vmem:[#allocation3_spill] sm:$0xff] }
 0x2c2   : > { %v2049_v40 = vadd.f32 %v2047_v33, %v2025_v31  ;;  %v2050_v56 = vadd.f32 %v2048_v44, %v2026_v18  ;;  %vm4819_vm12 = vmand %vm4652_vm15, %vm6085_vm13  ;;  %vm619_vm11 = vcmp.lt.s32.totalorder %v3814_v43, 64  ;;  %vm637_vm0 = vcmp.lt.s32.totalorder %v3814_v43, 124  ;;  %v6101_v44 = vld [vmem:[#allocation12_spill] sm:$0xff] }
 0x2c3   : > { %2440 = vperm.xlu1 %3070, %v2426_v54   ;;  %vm644_vm13 = vcmp.lt.s32.totalorder %v3814_v43, 12  ;;  %v591_v48 = vsel %vm6091_vm3, %v3455_v49, %v3464_v52  ;;  %vm6093_vm1 = vcmp.lt.s32.totalorder %v3814_v43, 13  ;;  %v581_v3 = vmul.f32 %v6094_v21, %v4836_v50  ;;  %v6102_v54 = vld [vmem:[#allocation4_spill] sm:$0xff] }
 0x2c4   : > { %v599_v17 = vsel %vm6093_vm1, %v6092_v42, %v3424_v38  ;;  %v565_v60 = vadd.f32 %v563_v58, %v536_v30  ;;  %v564_v62 = vadd.f32 %v562_v53, %v535_v63  ;;  %v592_v47 = vsel %vm6091_vm3, %v3464_v52, %v3455_v49  ;;  %v6105_v53 = vld [vmem:[#allocation11_spill] sm:$0xff] }
 0x2c5   : > { %2730 = vperm.xlu0 %3068, %v2726_v27   ;;  %v2058_v45 = vpop.permute.xlu1 %2057  ;;  %v646_v39 = vsel %vm644_vm13, %v6099_v36, %v6098_v24  ;;  %vm6100_vm3 = vcmp.lt.s32.totalorder %v3837_v20, 13  ;;  %v638_v7 = vsel %vm637_vm0, %v6102_v54, %v6101_v44  ;;  %v4916_v27 = vsel %vm619_vm11, %v6104_v8, %v6103_v28 }
 0x2c6   : > { %v2060_v31 = vsel %vm2059_vm4, %v2056_v55, %v2058_v45  ;;  %v2061_v18 = vsel %vm2059_vm4, %v2058_v45, %v2056_v55  ;;  %vm6096_vm4 = vcmp.lt.s32.totalorder %v3833_v35, 13  ;;  %v582_v52 = vadd.f32 %v580_v10, %v564_v62  ;;  %v6109_v10 = vld [vmem:[#allocation7_spill] sm:$0xff] }
 0x2c7   : > { %v4863_v46 = vpop.permute.xlu0 %2079  ;;  %v2062_v15 = vsel %vm4819_vm12, %v2060_v31, 0.0  ;;  %v2063_v29 = vsel %vm4842_vm2, %v2061_v18, 0.0  ;;  %vm6095_vm12 = vmmov %vm6093_vm1  ;;  %v600_v55 = vsel %vm6096_vm4, %v591_v48, %v599_v17  ;;  %vm631_vm2 = vcmp.lt.s32.totalorder %v3833_v35, 12  ;;  %v6106_v48 = vld [vmem:[#allocation21_spill] sm:$0xff]  ;;  %v6108_v18 = vld [vmem:[#allocation15_spill] sm:$0xff] }
 0x2c8   : > { %v2071_v4 = vmul.f32 %v4656_v34, %v2062_v15  ;;  %v2072_v11 = vmul.f32 %v4656_v34, %v2063_v29  ;;  %v598_v13 = vsel %vm6095_vm12, %v3424_v38, %v6092_v42  ;;  %v6097_v34 = vld [vmem:[#allocation8_spill] sm:$0xff]  ;;  %v583_v41 = vadd.f32 %v581_v3, %v565_v60  ;;  %v6107_v42 = vld [vmem:[#allocation23_spill] sm:$0xff]  ;;  %v4944_v31 = vpop.permute.xlu2 %2139  ;;  %v6110_v3 = vld [vmem:[#allocation17_spill] sm:$0xff] }
 0x2c9   : > { %v609_v0 = vmul.f32 %v6097_v34, %v600_v55  ;;  %v645_v38 = vsel %vm644_vm13, %v6098_v24, %v6099_v36  ;;  %vm632_vm1 = vcmp.lt.s32.totalorder %v3837_v20, 12  ;;  %v601_v33 = vsel %vm6100_vm3, %v592_v47, %v598_v13  ;;  %v6115_v24 = vld [vmem:[#allocation18_spill] sm:$0xff] }
 0x2ca   : > { %v4894_v61 = vadd.f32 %v2071_v4, %v2049_v40  ;;  %v4896_v49 = vadd.f32 %v2072_v11, %v2050_v56  ;;  %vm684_vm12 = vcmp.lt.s32.totalorder %v3814_v43, 123  ;;  %vm691_vm4 = vcmp.lt.s32.totalorder %v3814_v43, 11  ;;  %v6113_v11 = vld [vmem:[#allocation10_spill] sm:$0xff] }
 0x2cb   : > { %2735 = vperm.xlu1 %3070, %v2727_v57   ;;  %v610_v25 = vmul.f32 %v6097_v34, %v601_v33  ;;  %v639_v40 = vsel %vm637_vm0, %v6101_v44, %v6102_v54  ;;  %v647_v56 = vsel %vm631_vm2, %v638_v7, %v646_v39  ;;  %v611_v63 = vadd.f32 %v609_v0, %v582_v52  ;;  %v6114_v57 = vld [vmem:[#allocation20_spill] sm:$0xff]  ;;  %v6119_v7 = vld [vmem:[#allocation13_spill] sm:$0xff] }
 0x2cc   : > { %v4930_v37 = vsel %vm619_vm11, %v6103_v28, %v6104_v8  ;;  %v627_v58 = vmul.f32 %v6105_v53, %v4916_v27  ;;  %v648_v12 = vsel %vm632_vm1, %v639_v40, %v645_v38  ;;  %vm678_vm0 = vcmp.lt.s32.totalorder %v3833_v35, 11  ;;  %v6116_v38 = vld [vmem:[#allocation26_spill] sm:$0xff]  ;;  %v6117_v33 = vld [vmem:[#allocation24_spill] sm:$0xff] }
 0x2cd   : > { %v4924_v26 = vpop.permute.xlu1 %2081  ;;  %v628_v45 = vmul.f32 %v6105_v53, %v4930_v37  ;;  %vm679_vm13 = vcmp.lt.s32.totalorder %v3837_v20, 11  ;;  %v693_v17 = vsel %vm691_vm4, %v6107_v42, %v6106_v48  ;;  %v656_v21 = vmul.f32 %v6108_v18, %v647_v56 }
 0x2ce   : > { %vm6111_vm11 = vcmp.lt.s32.totalorder %v3814_v43, 48  ;;  %v692_v60 = vsel %vm691_vm4, %v6106_v48, %v6107_v42  ;;  %v612_v62 = vadd.f32 %v610_v25, %v583_v41  ;;  %v657_v4 = vmul.f32 %v6108_v18, %v648_v12  ;;  %v6123_v48 = vld [vmem:[#allocation27_spill] sm:$0xff]  ;;  %v6124_v18 = vld [vmem:[#allocation30_spill] sm:$0xff] }
 0x2cf   : > { %v4934_v30 = vpop.permute.xlu0 %2102  ;;  %v4951_v15 = vsel %vm6111_vm11, %v6110_v3, %v6109_v10  ;;  %vm6112_vm2 = vmmov %vm6111_vm11  ;;  %v685_v47 = vsel %vm684_vm12, %v6114_v57, %v6113_v11  ;;  %v629_v13 = vadd.f32 %v627_v58, %v611_v63  ;;  %v686_v55 = vsel %vm684_vm12, %v6113_v11, %v6114_v57  ;;  %v6121_v58 = vld [vmem:[#allocation16_spill] sm:$0xff]  ;;  %v6126_v57 = vld [vmem:[#allocation38_spill] sm:$0xff] }
 0x2d0   : > { %v4957_v29 = vsel %vm6112_vm2, %v6109_v10, %v6110_v3  ;;  %v694_v34 = vsel %vm678_vm0, %v685_v47, %v693_v17  ;;  %v630_v0 = vadd.f32 %v628_v45, %v612_v62  ;;  %v674_v36 = vmul.f32 %v6115_v24, %v4951_v15  ;;  %v6122_v45 = vld [vmem:[#allocation29_spill] sm:$0xff]  ;;  %v6127_v47 = vld [vmem:[#allocation28_spill] sm:$0xff] }
 0x2d1   : > { %v675_v39 = vmul.f32 %v6115_v24, %v4957_v29  ;;  %v695_v52 = vsel %vm679_vm13, %v686_v55, %v692_v60  ;;  %v658_v41 = vadd.f32 %v656_v21, %v629_v13  ;;  %vm6118_vm1 = vcmp.lt.s32.totalorder %v3814_v43, 32  ;;  %v6125_v21 = vld [vmem:[#allocation19_spill] sm:$0xff]  ;;  %v6128_v24 = vld [vmem:[#allocation32_spill] sm:$0xff] }
 0x2d2   : > { %v4982_v44 = vsel %vm6118_vm1, %v6117_v33, %v6116_v38  ;;  %v659_v54 = vadd.f32 %v657_v4, %v630_v0  ;;  %v703_v25 = vmul.f32 %v6119_v7, %v694_v34  ;;  %vm731_vm3 = vcmp.lt.s32.totalorder %v3814_v43, 122  ;;  %vm6120_vm4 = vmmov %vm6118_vm1  ;;  %v5014_v4 = vpop.permute.xlu2 %2163 }
 0x2d3   : > { %vm738_vm12 = vcmp.lt.s32.totalorder %v3814_v43, 10  ;;  %v704_v8 = vmul.f32 %v6119_v7, %v695_v52  ;;  %v4994_v40 = vsel %vm6120_vm4, %v6116_v38, %v6117_v33  ;;  %vm725_vm0 = vcmp.lt.s32.totalorder %v3833_v35, 10  ;;  %v6130_v52 = vld [vmem:[#allocation25_spill] sm:$0xff] }
 0x2d4   : > { %vm726_vm13 = vcmp.lt.s32.totalorder %v3837_v20, 10  ;;  %v676_v63 = vadd.f32 %v674_v36, %v658_v41  ;;  %v677_v53 = vadd.f32 %v675_v39, %v659_v54  ;;  %v721_v12 = vmul.f32 %v6121_v58, %v4982_v44  ;;  %v6129_v39 = vld [vmem:[#allocation36_spill] sm:$0xff]  ;;  %v6131_v7 = vld [vmem:[#allocation33_spill] sm:$0xff] }
 0x2d5   : > { %v4987_v28 = vpop.permute.xlu1 %2104  ;;  %vm785_vm11 = vcmp.lt.s32.totalorder %v3814_v43, 9  ;;  %v732_v42 = vsel %vm731_vm3, %v6123_v48, %v6122_v45  ;;  %v733_v17 = vsel %vm731_vm3, %v6122_v45, %v6123_v48  ;;  %v739_v10 = vsel %vm738_vm12, %v6125_v21, %v6124_v18 }
 0x2d6   : > { %v740_v3 = vsel %vm738_vm12, %v6124_v18, %v6125_v21  ;;  %v705_v60 = vadd.f32 %v703_v25, %v676_v63  ;;  %v722_v62 = vmul.f32 %v6121_v58, %v4994_v40  ;;  %vm778_vm2 = vcmp.lt.s32.totalorder %v3814_v43, 121  ;;  %v6132_v25 = vld [vmem:[#allocation22_spill] sm:$0xff]  ;;  %v6136_v21 = vld [vmem:[#allocation44_spill] sm:$0xff] }
 0x2d7   : > { %v4998_v56 = vpop.permute.xlu0 %2126  ;;  %v706_v11 = vadd.f32 %v704_v8, %v677_v53  ;;  %v787_v13 = vsel %vm785_vm11, %v6127_v47, %v6126_v57  ;;  %vm772_vm1 = vcmp.lt.s32.totalorder %v3833_v35, 9  ;;  %v741_v34 = vsel %vm725_vm0, %v732_v42, %v740_v3 }
 0x2d8   : > { %v723_v55 = vadd.f32 %v721_v12, %v705_v60  ;;  %v742_v0 = vsel %vm726_vm13, %v733_v17, %v739_v10  ;;  %vm773_vm3 = vcmp.lt.s32.totalorder %v3837_v20, 9  ;;  %v750_v36 = vmul.f32 %v6128_v24, %v741_v34  ;;  %v6135_v12 = vld [vmem:[#allocation35_spill] sm:$0xff]  ;;  %v6137_v10 = vld [vmem:[#allocation34_spill] sm:$0xff] }
 0x2d9   : > { %v779_v41 = vsel %vm778_vm2, %v6130_v52, %v6129_v39  ;;  %v786_v38 = vsel %vm785_vm11, %v6126_v57, %v6127_v47  ;;  %vm825_vm12 = vcmp.lt.s32.totalorder %v3814_v43, 8  ;;  %v724_v33 = vadd.f32 %v722_v62, %v706_v11  ;;  %v6138_v62 = vld [vmem:[#allocation39_spill] sm:$0xff]  ;;  %v6139_v47 = vld [vmem:[#allocation42_spill] sm:$0xff] }
 0x2da   : > { %v751_v54 = vmul.f32 %v6128_v24, %v742_v0  ;;  %vm6133_vm4 = vcmp.lt.s32.totalorder %v3814_v43, 16  ;;  %v788_v63 = vsel %vm772_vm1, %v779_v41, %v787_v13  ;;  %v780_v48 = vsel %vm778_vm2, %v6129_v39, %v6130_v52  ;;  %v6140_v13 = vld [vmem:[#allocation31_spill] sm:$0xff] }
 0x2db   : > { %v5041_v8 = vsel %vm6133_vm4, %v6132_v25, %v6131_v7  ;;  %vm6134_vm0 = vmmov %vm6133_vm4  ;;  %vm818_vm13 = vcmp.lt.s32.totalorder %v3814_v43, 120  ;;  %v789_v18 = vsel %vm773_vm3, %v780_v48, %v786_v38  ;;  %v827_v3 = vsel %vm825_vm12, %v6137_v10, %v6136_v21 }
 0x2dc   : > { %v5049_v58 = vsel %vm6134_vm0, %v6131_v7, %v6132_v25  ;;  %v768_v45 = vmul.f32 %v6135_v12, %v5041_v8  ;;  %vm812_vm11 = vcmp.lt.s32.totalorder %v3833_v35, 8  ;;  %v752_v60 = vadd.f32 %v750_v36, %v723_v55  ;;  %v6141_v36 = vld [vmem:[#allocation41_spill] sm:$0xff]  ;;  %v6142_v25 = vld [vmem:[#allocation50_spill] sm:$0xff] }
 0x2dd   : > { %v5043_v53 = vpop.permute.xlu1 %2128  ;;  %v769_v17 = vmul.f32 %v6135_v12, %v5049_v58  ;;  %v797_v11 = vmul.f32 %v6138_v62, %v788_v63  ;;  %vm813_vm2 = vcmp.lt.s32.totalorder %v3837_v20, 8  ;;  %v753_v57 = vadd.f32 %v751_v54, %v724_v33  ;;  %v5088_v33 = vpop.permute.xlu2 %2193  ;;  %v6143_v63 = vld [vmem:[#allocation40_spill] sm:$0xff] }
 0x2de   : > { %v819_v34 = vsel %vm818_vm13, %v6140_v13, %v6139_v47  ;;  %v826_v0 = vsel %vm825_vm12, %v6136_v21, %v6137_v10  ;;  %vm865_vm1 = vcmp.lt.s32.totalorder %v3814_v43, 7  ;;  %v770_v24 = vadd.f32 %v768_v45, %v752_v60  ;;  %v6144_v45 = vld [vmem:[#allocation45_spill] sm:$0xff] }
 0x2df   : > { %v5058_v42 = vpop.permute.xlu0 %2150  ;;  %v798_v55 = vmul.f32 %v6138_v62, %v789_v18  ;;  %v808_v39 = vmul.f32 %v6141_v36, %v3293_v9  ;;  %v828_v52 = vsel %vm812_vm11, %v819_v34, %v827_v3  ;;  %v771_v41 = vadd.f32 %v769_v17, %v753_v57  ;;  %v6145_v3 = vld [vmem:[#allocation48_spill] sm:$0xff]  ;;  %v6146_v60 = vld [vmem:[#allocation37_spill] sm:$0xff]  ;;  %v6147_v57 = vld [vmem:[#allocation47_spill] sm:$0xff] }
 0x2e0   : > { %v820_v38 = vsel %vm818_vm13, %v6139_v47, %v6140_v13  ;;  %vm858_vm3 = vcmp.lt.s32.totalorder %v3814_v43, 119  ;;  %v799_v54 = vadd.f32 %v797_v11, %v770_v24  ;;  %v867_v12 = vsel %vm865_vm1, %v6143_v63, %v6142_v25 }
 0x2e1   : > { %v829_v7 = vsel %vm813_vm2, %v820_v38, %v826_v0  ;;  %vm852_vm12 = vcmp.lt.s32.totalorder %v3833_v35, 7  ;;  %v809_v9 = vmul.f32 %v6141_v36, %v3280_v5  ;;  %v837_v48 = vmul.f32 %v6144_v45, %v828_v52 }
 0x2e2   : > { %v866_v17 = vsel %vm865_vm1, %v6142_v25, %v6143_v63  ;;  %vm853_vm4 = vcmp.lt.s32.totalorder %v3837_v20, 7  ;;  %v800_v21 = vadd.f32 %v798_v55, %v771_v41  ;;  %v810_v10 = vadd.f32 %v808_v39, %v799_v54  ;;  %v6148_v39 = vld [vmem:[#allocation51_spill] sm:$0xff]  ;;  %v6149_v41 = vld [vmem:[#allocation46_spill] sm:$0xff] }
 0x2e3   : > { %v859_v62 = vsel %vm858_vm3, %v6146_v60, %v6145_v3  ;;  %vm905_vm0 = vcmp.lt.s32.totalorder %v3814_v43, 6  ;;  %v838_v5 = vmul.f32 %v6144_v45, %v829_v7  ;;  %v848_v47 = vmul.f32 %v6147_v57, %v4698_v59  ;;  %v6150_v59 = vld [vmem:[#allocation56_spill] sm:$0xff]  ;;  %v6153_v45 = vld [vmem:[#allocation43_spill] sm:$0xff] }
 0x2e4   : > { %v860_v13 = vsel %vm858_vm3, %v6145_v3, %v6146_v60  ;;  %v868_v34 = vsel %vm852_vm12, %v859_v62, %v867_v12  ;;  %vm898_vm13 = vcmp.lt.s32.totalorder %v3814_v43, 118  ;;  %v811_v24 = vadd.f32 %v809_v9, %v800_v21  ;;  %v6151_v12 = vld [vmem:[#allocation53_spill] sm:$0xff] }
 0x2e5   : > { %v5099_v18 = vpop.permute.xlu1 %2152  ;;  %v869_v0 = vsel %vm853_vm4, %v860_v13, %v866_v17  ;;  %v839_v55 = vadd.f32 %v837_v48, %v810_v10  ;;  %v849_v36 = vmul.f32 %v6147_v57, %v4689_v14  ;;  %vm892_vm11 = vcmp.lt.s32.totalorder %v3833_v35, 6  ;;  %v6152_v14 = vld [vmem:[#allocation54_spill] sm:$0xff]  ;;  %v5135_v62 = vpop.permute.xlu2 %2217  ;;  %v6154_v13 = vld [vmem:[#allocation52_spill] sm:$0xff] }
 0x2e6   : > { %v877_v52 = vmul.f32 %v6148_v39, %v868_v34  ;;  %v906_v38 = vsel %vm905_vm0, %v6150_v59, %v6149_v41  ;;  %v907_v54 = vsel %vm905_vm0, %v6149_v41, %v6150_v59  ;;  %vm893_vm2 = vcmp.lt.s32.totalorder %v3837_v20, 6  ;;  %v6155_v34 = vld [vmem:[#allocation62_spill] sm:$0xff]  ;;  %v6157_v41 = vld [vmem:[#allocation60_spill] sm:$0xff]  ;;  %v6158_v59 = vld [vmem:[#allocation49_spill] sm:$0xff] }
 0x2e7   : > { %v5106_v11 = vpop.permute.xlu0 %2180  ;;  %v840_v7 = vadd.f32 %v838_v5, %v811_v24  ;;  %v850_v25 = vadd.f32 %v848_v47, %v839_v55  ;;  %v878_v63 = vmul.f32 %v6148_v39, %v869_v0  ;;  %v888_v9 = vmul.f32 %v6151_v12, %v4775_v16  ;;  %v6156_v55 = vld [vmem:[#allocation57_spill] sm:$0xff] }
 0x2e8   : > { %v899_v48 = vsel %vm898_vm13, %v6153_v45, %v6152_v14  ;;  %v900_v17 = vsel %vm898_vm13, %v6152_v14, %v6153_v45  ;;  %vm945_vm1 = vcmp.lt.s32.totalorder %v3814_v43, 5  ;;  %v889_v10 = vmul.f32 %v6151_v12, %v4760_v19 }
 0x2e9   : > { %v851_v21 = vadd.f32 %v849_v36, %v840_v7  ;;  %v908_v3 = vsel %vm892_vm11, %v899_v48, %v907_v54  ;;  %v909_v60 = vsel %vm893_vm2, %v900_v17, %v906_v38  ;;  %v879_v57 = vadd.f32 %v877_v52, %v850_v25  ;;  %v6159_v7 = vld [vmem:[#allocation59_spill] sm:$0xff]  ;;  %v6160_v48 = vld [vmem:[#allocation58_spill] sm:$0xff]  ;;  %v6161_v17 = vld [vmem:[#allocation68_spill] sm:$0xff] }
 0x2ea   : > { %vm938_vm3 = vcmp.lt.s32.totalorder %v3814_v43, 117  ;;  %vm932_vm12 = vcmp.lt.s32.totalorder %v3833_v35, 5  ;;  %v946_v0 = vsel %vm945_vm1, %v6155_v34, %v6154_v13  ;;  %v947_v19 = vsel %vm945_vm1, %v6154_v13, %v6155_v34  ;;  %v6163_v13 = vld [vmem:[#allocation66_spill] sm:$0xff]  ;;  %v6164_v34 = vld [vmem:[#allocation55_spill] sm:$0xff] }
 0x2eb   : > { %v880_v47 = vadd.f32 %v878_v63, %v851_v21  ;;  %vm933_vm4 = vcmp.lt.s32.totalorder %v3837_v20, 5  ;;  %v890_v24 = vadd.f32 %v888_v9, %v879_v57  ;;  %v917_v36 = vmul.f32 %v6156_v55, %v908_v3 }
 0x2ec   : > { %v918_v39 = vmul.f32 %v6156_v55, %v909_v60  ;;  %v939_v38 = vsel %vm938_vm3, %v6158_v59, %v6157_v41  ;;  %v940_v54 = vsel %vm938_vm3, %v6157_v41, %v6158_v59  ;;  %vm985_vm0 = vcmp.lt.s32.totalorder %v3814_v43, 4 }
 0x2ed   : > { %v5137_v5 = vpop.permute.xlu1 %2182  ;;  %v891_v52 = vadd.f32 %v889_v10, %v880_v47  ;;  %v928_v25 = vmul.f32 %v6159_v7, %v4836_v50  ;;  %v929_v63 = vmul.f32 %v6159_v7, %v4830_v51  ;;  %v948_v12 = vsel %vm932_vm12, %v939_v38, %v947_v19  ;;  %v6162_v50 = vld [vmem:[#allocation63_spill] sm:$0xff]  ;;  %v6166_v38 = vld [vmem:[#allocation64_spill] sm:$0xff] }
 0x2ee   : > { %v949_v9 = vsel %vm933_vm4, %v940_v54, %v946_v0  ;;  %vm978_vm13 = vcmp.lt.s32.totalorder %v3814_v43, 116  ;;  %vm972_vm11 = vcmp.lt.s32.totalorder %v3833_v35, 4  ;;  %vm973_vm2 = vcmp.lt.s32.totalorder %v3837_v20, 4  ;;  %v6167_v54 = vld [vmem:[#allocation74_spill] sm:$0xff] }
 0x2ef   : > { %v5141_v16 = vpop.permute.xlu0 %2204  ;;  %v919_v14 = vadd.f32 %v917_v36, %v890_v24  ;;  %v920_v45 = vadd.f32 %v918_v39, %v891_v52  ;;  %v986_v21 = vsel %vm985_vm0, %v6161_v17, %v6160_v48  ;;  %v987_v10 = vsel %vm985_vm0, %v6160_v48, %v6161_v17  ;;  %v5178_v39 = vpop.permute.xlu2 %2241  ;;  %v6165_v52 = vld [vmem:[#allocation65_spill] sm:$0xff] }
 0x2f0   : > { %v957_v3 = vmul.f32 %v6162_v50, %v948_v12  ;;  %v958_v51 = vmul.f32 %v6162_v50, %v949_v9  ;;  %v979_v0 = vsel %vm978_vm13, %v6164_v34, %v6163_v13  ;;  %v980_v19 = vsel %vm978_vm13, %v6163_v13, %v6164_v34  ;;  %v6170_v9 = vld [vmem:[#allocation69_spill] sm:$0xff] }
 0x2f1   : > { %v930_v57 = vadd.f32 %v928_v25, %v919_v14  ;;  %v931_v47 = vadd.f32 %v929_v63, %v920_v45  ;;  %v988_v55 = vsel %vm972_vm11, %v979_v0, %v987_v10  ;;  %v989_v36 = vsel %vm973_vm2, %v980_v19, %v986_v21  ;;  %v6172_v48 = vld [vmem:[#allocation61_spill] sm:$0xff]  ;;  %v6176_v19 = vld [vmem:[#allocation75_spill] sm:$0xff] }
 0x2f2   : > { %vm1012_vm1 = vcmp.lt.s32.totalorder %v3833_v35, 3  ;;  %vm1013_vm3 = vcmp.lt.s32.totalorder %v3837_v20, 3  ;;  %v968_v41 = vmul.f32 %v6165_v52, %v4930_v37  ;;  %v969_v59 = vmul.f32 %v6165_v52, %v4916_v27  ;;  %v6171_v37 = vld [vmem:[#allocation72_spill] sm:$0xff] }
 0x2f3   : > { %vm6168_vm12 = vcmp.lt.s32.totalorder %v3814_v43, 3  ;;  %v959_v63 = vadd.f32 %v957_v3, %v930_v57  ;;  %v960_v12 = vadd.f32 %v958_v51, %v931_v47  ;;  %v997_v14 = vmul.f32 %v6170_v9, %v988_v55  ;;  %v6175_v3 = vld [vmem:[#allocation71_spill] sm:$0xff] }
 0x2f4   : > { %v1026_v7 = vsel %vm6168_vm12, %v6167_v54, %v6166_v38  ;;  %vm6169_vm4 = vmmov %vm6168_vm12  ;;  %v998_v45 = vmul.f32 %v6170_v9, %v989_v36  ;;  %vm6173_vm0 = vcmp.lt.s32.totalorder %v3814_v43, 115  ;;  %v1008_v51 = vmul.f32 %v6175_v3, %v4957_v29 }
 0x2f5   : > { %v5168_v60 = vpop.permute.xlu1 %2206  ;;  %v1027_v25 = vsel %vm6169_vm4, %v6166_v38, %v6167_v54  ;;  %v1019_v27 = vsel %vm6173_vm0, %v6172_v48, %v6171_v37  ;;  %vm6174_vm13 = vmmov %vm6173_vm0  ;;  %v970_v50 = vadd.f32 %v968_v41, %v959_v63  ;;  %v971_v13 = vadd.f32 %v969_v59, %v960_v12 }
 0x2f6   : > { %v1020_v17 = vsel %vm6174_vm13, %v6171_v37, %v6172_v48  ;;  %v1028_v21 = vsel %vm1012_vm1, %v1019_v27, %v1027_v25  ;;  %v1009_v57 = vmul.f32 %v6175_v3, %v4951_v15  ;;  %v2083_v41 = vsel %vm525_vm6, %v4863_v46, %v4924_v26  ;;  %vm5246_vm12 = vmand %vm4664_vm14, %vm5910_vm8  ;;  %v6182_v37 = vld [vmem:[#allocation79_spill] sm:$0xff]  ;;  %v6183_v48 = vld [vmem:[#allocation70_spill] sm:$0xff] }
 0x2f7   : > { %v5174_v24 = vpop.permute.xlu0 %2228  ;;  %v1029_v10 = vsel %vm1013_vm3, %v1020_v17, %v1026_v7  ;;  %v999_v34 = vadd.f32 %v997_v14, %v970_v50  ;;  %v1000_v0 = vadd.f32 %v998_v45, %v971_v13  ;;  %v1037_v55 = vmul.f32 %v6176_v19, %v1028_v21  ;;  %v5223_v38 = vpop.permute.xlu2 %2264  ;;  %vm5233_vm3 = vmand %vm4652_vm15, %vm5911_vm9 }
 0x2f8   : > { %v1038_v36 = vmul.f32 %v6176_v19, %v1029_v10  ;;  %v2084_v15 = vsel %vm525_vm6, %v4924_v26, %v4863_v46  ;;  %vm2106_vm11 = vcmp.lt.s32.totalorder %v3814_v43, 95  ;;  %vm1052_vm2 = vcmp.lt.s32.totalorder %v3833_v35, 2  ;;  %v6179_v26 = vld [vmem:[#allocation77_spill] sm:$0xff] }
 0x2f9   : > { %v1010_v59 = vadd.f32 %v1008_v51, %v999_v34  ;;  %v1011_v29 = vadd.f32 %v1009_v57, %v1000_v0  ;;  %v2085_v25 = vsel %vm4652_vm15, %v2083_v41, 0.0  ;;  %vm2130_vm6 = vcmp.lt.s32.totalorder %v3814_v43, 94  ;;  %v6194_v34 = vld [vmem:[#allocation78_spill] sm:$0xff]  ;;  %v6195_v0 = vld [vmem:[#allocation67_spill] sm:$0xff] }
 0x2fa   : > { %v1048_v63 = vmul.f32 %v6179_v26, %v4994_v40  ;;  %v2086_v12 = vsel %vm4664_vm14, %v2084_v15, 0.0  ;;  %v2107_v14 = vsel %vm2106_vm11, %v4934_v30, %v4987_v28  ;;  %v2108_v45 = vsel %vm2106_vm11, %v4987_v28, %v4934_v30 }
 0x2fb   : > { %v1039_v54 = vadd.f32 %v1037_v55, %v1010_v59  ;;  %v5225_v7 = vadd.f32 %v1038_v36, %v1011_v29  ;;  %vm6184_vm4 = vcmp.lt.s32.totalorder %v3814_v43, 2  ;;  %vm6185_vm0 = vcmp.lt.s32.totalorder %v3833_v35, 14 }
 0x2fc   : > { %v1067_v40 = vsel %vm6184_vm4, %v6183_v48, %v6182_v37  ;;  %vm5262_vm13 = vmand %vm4652_vm15, %vm6185_vm0  ;;  %vm2154_vm8 = vcmp.lt.s32.totalorder %v3814_v43, 93  ;;  %vm2170_vm9 = vcmp.ge.s32.totalorder %v3821_v22, 4294967293  ;;  %v2094_v30 = vmul.f32 %v4743_v32, %v2085_v25 }
 0x2fd   : > { %v5206_v47 = vpop.permute.xlu1 %2230  ;;  %vm6188_vm11 = vcmp.lt.s32.totalorder %v3837_v20, 14  ;;  %v2131_v17 = vsel %vm2130_vm6, %v4998_v56, %v5043_v53  ;;  %vm2171_vm0 = vcmp.ge.s32.totalorder %v3823_v2, 4294967293  ;;  %vm2173_vm1 = vcmp.lt.s32.totalorder %v3823_v2, 13 }
 0x2fe   : > { %vm5274_vm4 = vmand %vm4664_vm14, %vm6188_vm11  ;;  %v2095_v10 = vmul.f32 %v4743_v32, %v2086_v12  ;;  %v2109_v50 = vsel %vm5233_vm3, %v2107_v14, 0.0  ;;  %v2110_v13 = vsel %vm5246_vm12, %v2108_v45, 0.0  ;;  %v2132_v3 = vsel %vm2130_vm6, %v5043_v53, %v4998_v56 }
 0x2ff   : > { %v5210_v52 = vpop.permute.xlu0 %2252  ;;  %vm6191_vm11 = vcmp.lt.s32.totalorder %v3833_v35, 13  ;;  %v5307_v57 = vmul.f32 %v6179_v26, %v4982_v44  ;;  %vm6196_vm3 = vcmp.lt.s32.totalorder %v3814_v43, 114  ;;  %v2155_v56 = vsel %vm2154_vm8, %v5058_v42, %v5099_v18 }
 0x300   : > { %vm5299_vm7 = vmand %vm4652_vm15, %vm6191_vm11  ;;  %v1059_v19 = vsel %vm6196_vm3, %v6195_v0, %v6194_v34  ;;  %vm6200_vm12 = vcmp.lt.s32.totalorder %v3814_v43, 2  ;;  %v2133_v36 = vsel %vm5262_vm13, %v2131_v17, 0.0  ;;  %v2118_v41 = vmul.f32 %v4849_v23, %v2109_v50  ;;  %v6219_v50 = vld [vmem:[#allocation76_spill] sm:$0xff] }
 0x301   : > { %vm6197_vm6 = vmmov %vm6196_vm3  ;;  %v1066_v53 = vsel %vm6200_vm12, %v6182_v37, %v6183_v48  ;;  %v1068_v55 = vsel %vm1052_vm2, %v1059_v19, %v1067_v40  ;;  %v2119_v59 = vmul.f32 %v4849_v23, %v2110_v13  ;;  %v2134_v29 = vsel %vm5274_vm4, %v2132_v3, 0.0  ;;  %v6220_v13 = vld [vmem:[#allocation83_spill] sm:$0xff] }
 0x302   : > { %v1060_v6 = vsel %vm6197_vm6, %v6194_v34, %v6195_v0  ;;  %vm5325_vm15 = vmand %vm2170_vm9, %vm2172_vm10  ;;  %vm2184_vm10 = vcmp.lt.s32.totalorder %v3814_v43, 83  ;;  %vm6203_vm9 = vcmp.lt.s32.totalorder %v3837_v20, 13  ;;  %v2156_v2 = vsel %vm2154_vm8, %v5099_v18, %v5058_v42  ;;  %v5389_v18 = vpop.permute.xlu2 %2288 }
 0x303   : > { %vm5341_vm11 = vmand %vm2171_vm0, %vm2173_vm1  ;;  %v5362_v25 = vadd.f32 %v1048_v63, %v1039_v54  ;;  %v2096_v23 = vadd.f32 %v2094_v30, %v4894_v61  ;;  %v2097_v46 = vadd.f32 %v2095_v10, %v4896_v49  ;;  %v2157_v26 = vsel %vm5299_vm7, %v2155_v56, 0.0  ;;  %v6212_v63 = vld [vmem:[#allocation80_spill] sm:$0xff] }
 0x304   : > { %vm5354_vm2 = vmand %vm4664_vm14, %vm6203_vm9  ;;  %v2142_v12 = vmul.f32 %v4944_v31, %v2133_v36  ;;  %vm6208_vm8 = vcmp.ge.s32.totalorder %v3837_v20, 3  ;;  %v2185_v49 = vsel %vm2184_vm10, %v5106_v11, %v5137_v5  ;;  %v2186_v42 = vsel %vm2184_vm10, %v5137_v5, %v5106_v11 }
 0x305   : > { %v5284_v21 = vpop.permute.xlu1 %2254  ;;  %vm5372_vm14 = vmand %vm5325_vm15, %vm1135_vm5  ;;  %vm2208_vm5 = vcmp.lt.s32.totalorder %v3814_v43, 82  ;;  %vm6211_vm7 = vcmp.lt.s32.totalorder %v3837_v20, 2  ;;  %v5395_v9 = vmul.f32 %v6212_v63, %v1068_v55  ;;  %v2143_v14 = vmul.f32 %v4944_v31, %v2134_v29 }
 0x306   : > { %vm5381_vm1 = vmand %vm5341_vm11, %vm6208_vm8  ;;  %v1069_v54 = vsel %vm6211_vm7, %v1060_v6, %v1066_v53  ;;  %v2158_v45 = vsel %vm5354_vm2, %v2156_v2, 0.0  ;;  %v2120_v37 = vadd.f32 %v2118_v41, %v2096_v23  ;;  %v2121_v48 = vadd.f32 %v2119_v59, %v2097_v46 }
 0x307   : > { %v5303_v32 = vpop.permute.xlu0 %2275  ;;  %v2166_v40 = vmul.f32 %v5014_v4, %v2157_v26  ;;  %vm6213_vm13 = vcmp.ge.s32.totalorder %v3833_v35, 2  ;;  %vm2232_vm0 = vcmp.lt.s32.totalorder %v3814_v43, 81  ;;  %vm1092_vm3 = vcmp.lt.s32.totalorder %v3833_v35, 1 }
 0x308   : > { %vm5405_vm4 = vmand %vm5325_vm15, %vm6213_vm13  ;;  %vm1093_vm6 = vcmp.lt.s32.totalorder %v3837_v20, 1  ;;  %v2187_v31 = vsel %vm5372_vm14, %v2185_v49, 0.0  ;;  %v2188_v27 = vsel %vm5381_vm1, %v2186_v42, 0.0  ;;  %vm6216_vm12 = vcmp.ge.s32.totalorder %v3837_v20, 2 }
 0x309   : > { %vm5420_vm10 = vmand %vm5341_vm11, %vm6216_vm12  ;;  %v2209_v28 = vsel %vm2208_vm5, %v5141_v16, %v5168_v60  ;;  %v2210_v17 = vsel %vm2208_vm5, %v5168_v60, %v5141_v16  ;;  %v5433_v10 = vmul.f32 %v6212_v63, %v1069_v54  ;;  %vm6221_vm9 = vcmp.lt.s32.totalorder %v3814_v43, 1 }
 0x30a   : > { %v1106_v3 = vsel %vm6221_vm9, %v6220_v13, %v6219_v50  ;;  %v2144_v51 = vadd.f32 %v2142_v12, %v2120_v37  ;;  %v2167_v34 = vmul.f32 %v5014_v4, %v2158_v45  ;;  %vm6222_vm2 = vcmp.ge.s32.totalorder %v3833_v35, 1  ;;  %vm6228_vm7 = vmmov %vm6221_vm9  ;;  %v2313_v61 = vpop.permute.xlu2 %2312 }
 0x30b   : > { %vm5444_vm14 = vmand %vm5325_vm15, %vm6222_vm2  ;;  %v2145_v60 = vadd.f32 %v2143_v14, %v2121_v48  ;;  %vm6225_vm8 = vcmp.ge.s32.totalorder %v3837_v20, 1  ;;  %v2233_v4 = vsel %vm2232_vm0, %v5174_v24, %v5206_v47  ;;  %v2234_v6 = vsel %vm2232_vm0, %v5206_v47, %v5174_v24  ;;  %v6243_v48 = vld [vmem:[#allocation82_spill] sm:$0xff] }
 0x30c   : > { %vm5452_vm1 = vmand %vm5341_vm11, %vm6225_vm8  ;;  %vm2279_vm5 = vcmp.lt.s32.totalorder %v3814_v43, 79  ;;  %v2196_v56 = vmul.f32 %v5088_v33, %v2187_v31  ;;  %v2197_v53 = vmul.f32 %v5088_v33, %v2188_v27  ;;  %v2211_v55 = vsel %vm5405_vm4, %v2209_v28, 0.0 }
 0x30d   : > { %v2278_v5 = vpop.permute.xlu1 %2277  ;;  %v2212_v36 = vsel %vm5420_vm10, %v2210_v17, 0.0  ;;  %v1107_v41 = vsel %vm6228_vm7, %v6219_v50, %v6220_v13  ;;  %v2168_v59 = vadd.f32 %v2166_v40, %v2144_v51  ;;  %vm6229_vm13 = vcmp.lt.s32.totalorder %v3814_v43, 80  ;;  %v6244_v40 = vld [vmem:[#allocation73_spill] sm:$0xff] }
 0x30e   : > { %v2256_v24 = vsel %vm6229_vm13, %v5210_v52, %v5284_v21  ;;  %vm6230_vm0 = vmmov %vm6229_vm13  ;;  %v2169_v47 = vadd.f32 %v2167_v34, %v2145_v60  ;;  %v2235_v29 = vsel %vm5444_vm14, %v2233_v4, 0.0  ;;  %v2236_v15 = vsel %vm5452_vm1, %v2234_v6, 0.0  ;;  %v6247_v6 = vld [vmem:[#allocation81_spill] sm:$0xff] }
 0x30f   : > { %v2300_v16 = vpop.permute.xlu0 %2299  ;;  %v2257_v33 = vsel %vm6230_vm0, %v5284_v21, %v5210_v52  ;;  %vm6231_vm4 = vcmp.lt.s32.totalorder %v3833_v35, 15  ;;  %vm2303_vm10 = vcmp.lt.s32.totalorder %v3814_v43, 78  ;;  %v2220_v23 = vmul.f32 %v5135_v62, %v2211_v55 }
 0x310   : > { %vm5491_vm12 = vmand %vm5325_vm15, %vm6231_vm4  ;;  %v2221_v52 = vmul.f32 %v5135_v62, %v2212_v36  ;;  %vm6234_vm9 = vcmp.lt.s32.totalorder %v3837_v20, 15  ;;  %v2280_v46 = vsel %vm2279_vm5, %v5303_v32, %v2278_v5  ;;  %v2281_v26 = vsel %vm2279_vm5, %v2278_v5, %v5303_v32 }
 0x311   : > { %vm5502_vm2 = vmand %vm5341_vm11, %vm6234_vm9  ;;  %v2198_v1 = vadd.f32 %v2196_v56, %v2168_v59  ;;  %v2199_v12 = vadd.f32 %v2197_v53, %v2169_v47  ;;  %v2258_v62 = vsel %vm5325_vm15, %v2256_v24, 0.0  ;;  %v2259_v49 = vsel %vm5341_vm11, %v2257_v33, 0.0 }
 0x312   : > { %vm6237_vm14 = vcmp.lt.s32.totalorder %v3833_v35, 14  ;;  %v2244_v32 = vmul.f32 %v5178_v39, %v2235_v29  ;;  %v2245_v63 = vmul.f32 %v5178_v39, %v2236_v15  ;;  %vm6240_vm1 = vcmp.lt.s32.totalorder %v3837_v20, 14  ;;  %v2337_v29 = vpop.permute.xlu2 %2336 }
 0x313   : > { %vm5520_vm8 = vmand %vm5325_vm15, %vm6237_vm14  ;;  %vm6245_vm7 = vcmp.lt.s32.totalorder %v3814_v43, 113  ;;  %v2282_v5 = vsel %vm5491_vm12, %v2280_v46, 0.0  ;;  %v2283_v31 = vsel %vm5502_vm2, %v2281_v26, 0.0  ;;  %v2222_v27 = vadd.f32 %v2220_v23, %v2198_v1 }
 0x314   : > { %vm5530_vm5 = vmand %vm5341_vm11, %vm6240_vm1  ;;  %v1099_v11 = vsel %vm6245_vm7, %v6244_v40, %v6243_v48  ;;  %v2223_v30 = vadd.f32 %v2221_v52, %v2199_v12  ;;  %v2267_v28 = vmul.f32 %v5223_v38, %v2258_v62  ;;  %v2268_v17 = vmul.f32 %v5223_v38, %v2259_v49  ;;  %v6255_v12 = vld [vmem:[#allocation85_spill] sm:$0xff] }
 0x315   : > { %v2302_v54 = vpop.permute.xlu1 %2301  ;;  %vm6246_vm13 = vmmov %vm6245_vm7  ;;  %v1108_v50 = vsel %vm1092_vm3, %v1099_v11, %v1107_v41  ;;  %v2291_v19 = vmul.f32 %v5389_v18, %v2282_v5  ;;  %v2292_v4 = vmul.f32 %v5389_v18, %v2283_v31  ;;  %v1051_v38 = vadd.f32 %v5307_v57, %v5225_v7  ;;  %v6254_v57 = vld [vmem:[#allocation84_spill] sm:$0xff] }
 0x316   : > { %v2304_v45 = vsel %vm2303_vm10, %v2300_v16, %v2302_v54  ;;  %v2305_v37 = vsel %vm2303_vm10, %v2302_v54, %v2300_v16  ;;  %v1100_v39 = vsel %vm6246_vm13, %v6243_v48, %v6244_v40  ;;  %v2246_v16 = vadd.f32 %v2244_v32, %v2222_v27 }
 0x317   : > { %v1109_v13 = vsel %vm1093_vm6, %v1100_v39, %v1106_v3  ;;  %v2306_v51 = vsel %vm5520_vm8, %v2304_v45, 0.0  ;;  %v2307_v34 = vsel %vm5530_vm5, %v2305_v37, 0.0  ;;  %v2324_v0 = vpop.permute.xlu0 %2323  ;;  %v2247_v60 = vadd.f32 %v2245_v63, %v2223_v30 }
 0x318   : > { %v1088_v56 = vmul.f32 %v6247_v6, %v5049_v58  ;;  %v1089_v3 = vmul.f32 %v6247_v6, %v5041_v8  ;;  %vm6248_vm3 = vcmp.lt.s32.totalorder %v3833_v35, 13  ;;  %vm2327_vm0 = vcmp.lt.s32.totalorder %v3814_v43, 77 }
 0x319   : > { %vm5572_vm6 = vmand %vm5325_vm15, %vm6248_vm3  ;;  %v2269_v18 = vadd.f32 %v2267_v28, %v2246_v16  ;;  %v2270_v55 = vadd.f32 %v2268_v17, %v2247_v60  ;;  %v2315_v36 = vmul.f32 %v2313_v61, %v2306_v51  ;;  %v2316_v7 = vmul.f32 %v2313_v61, %v2307_v34 }
 0x31a   : > { %vm6251_vm4 = vcmp.lt.s32.totalorder %v3837_v20, 13  ;;  %v1079_v35 = vadd.f32 %v5395_v9, %v5362_v25  ;;  %v1080_v58 = vadd.f32 %v5433_v10, %v1051_v38  ;;  %v1117_v44 = vmul.f32 %v6254_v57, %v1108_v50 }
 0x31b   : > { %vm5581_vm12 = vmand %vm5341_vm11, %vm6251_vm4  ;;  %v1118_v43 = vmul.f32 %v6254_v57, %v1109_v13  ;;  %v2293_v59 = vadd.f32 %v2291_v19, %v2269_v18  ;;  %v2294_v24 = vadd.f32 %v2292_v4, %v2270_v55  ;;  %vm2473_vm8 = vcmask 130048  }
 0x31c   : > { %v1090_v47 = vadd.f32 %v1088_v56, %v1079_v35  ;;  %v1091_v22 = vadd.f32 %v1089_v3, %v1080_v58  ;;  %vm2738_vm1 = vcmask 523264  }
 0x31d   : > { %v2326_v41 = vpop.permute.xlu1 %2325  ;;  %v2317_v2 = vadd.f32 %v2315_v36, %v2293_v59  ;;  %v2318_v23 = vadd.f32 %v2316_v7, %v2294_v24 }
 0x31e   : > { %v2328_v33 = vsel %vm2327_vm0, %v2324_v0, %v2326_v41  ;;  %v2329_v20 = vsel %vm2327_vm0, %v2326_v41, %v2324_v0  ;;  %v1120_v52 = vadd.f32 %v1118_v43, %v1091_v22  ;;  %v1119_v21 = vadd.f32 %v1117_v44, %v1090_v47 }
 0x31f   : > { %v2330_v15 = vsel %vm5572_vm6, %v2328_v33, 0.0  ;;  %v2331_v25 = vsel %vm5581_vm12, %v2329_v20, 0.0  ;;  %v2347_v1 = vpop.permute.xlu0 %2346 }
 0x320   : > { %v2339_v9 = vmul.f32 %v2337_v29, %v2330_v15  ;;  %v2340_v10 = vmul.f32 %v2337_v29, %v2331_v25  ;;  %v1127_v61 = vadd.f32 %v6255_v12, %v1119_v21  ;;  %v1128_v62 = vadd.f32 %v6255_v12, %v1120_v52 }
 0x322   : > { %v2341_v46 = vadd.f32 %v2339_v9, %v2317_v2  ;;  %v2342_v26 = vadd.f32 %v2340_v10, %v2318_v23 }
 0x324   : > { %v2349_v49 = vadd.f32 %v2347_v1, %v2341_v46  ;;  %v2350_v42 = vadd.f32 %v2347_v1, %v2342_v26 }
 0x326   : > { %v2351_v54 = vadd.f32 %v2349_v49, %v1127_v61  ;;  %v2358_v32 = vadd.f32 %v2350_v42, %v1128_v62 }
 0x328   : > { %v2352_v63 = vrot.slane %v2351_v54, 4  ;;  %v2359_v14 = vrot.slane %v2358_v32, 4 }
 0x32a   : > { %v2353_v45 = vadd.f32 %v2352_v63, %v2351_v54  ;;  %v2360_v37 = vadd.f32 %v2359_v14, %v2358_v32  ;;  %v2424_v54 = vld [vmem:[%s5778_s8 + $0x38] sm:$0xff]  ;;  %v2419_v32 = vld [vmem:[%s5778_s8 + $0x10] sm:$0xff]  ;;  %v2421_v14 = vld [vmem:[%s5778_s8 + $0x20] sm:$0xff] }
 0x32b   : > { %v2420_v63 = vld [vmem:[%s5778_s8 + $0x18] sm:$0xff] }
 0x32c   : > { %v2354_v48 = vrot.slane %v2353_v45, 2  ;;  %v2361_v40 = vrot.slane %v2360_v37, 2 }
 0x32e   : > { %v2355_v11 = vadd.f32 %v2354_v48, %v2353_v45  ;;  %v2362_v39 = vadd.f32 %v2361_v40, %v2360_v37  ;;  %v2466_v37 = vpop.permute.xlu2 %2465  ;;  %v2471_v40 = vpop.permute.xlu1 %2470 }
 0x330   : > { %v2356_v5 = vrot.slane %v2355_v11, 1  ;;  %v2363_v31 = vrot.slane %v2362_v39, 1 }
 0x332   : > { %v2357_v27 = vadd.f32 %v2356_v5, %v2355_v11  ;;  %v2364_v30 = vadd.f32 %v2363_v31, %v2362_v39 }
 0x334   : > { %v2365_v28 = vmul.f32 0.0625, %v2357_v27  ;;  %v2366_v17 = vmul.f32 0.0625, %v2364_v30 }
 0x336   : > { %v2367_v50 = vsub.f32 %v1127_v61, %v2365_v28  ;;  %v2369_v13 = vsub.f32 %v2349_v49, %v2365_v28  ;;  %v2368_v51 = vsub.f32 %v1128_v62, %v2366_v17  ;;  %v2370_v34 = vsub.f32 %v2350_v42, %v2366_v17  ;;  %v2417_v61 = vld [vmem:[%s5778_s8] sm:$0xff]  ;;  %v2423_v62 = vld [vmem:[%s5778_s8 + $0x30] sm:$0xff]  ;;  %v2422_v49 = vld [vmem:[%s5778_s8 + $0x28] sm:$0xff]  ;;  %v5640_v28 = vpop.permute.xlu0 %2460  ;;  %v2451_v17 = vpop.permute.xlu2 %2450 }
 0x337   : > { %v2418_v42 = vld [vmem:[%s5778_s8 + $0x8] sm:$0xff] }
 0x338   : > { %v2371_v0 = vmul.f32 %v2367_v50, %v2367_v50  ;;  %v2373_v16 = vmul.f32 %v2369_v13, %v2369_v13  ;;  %v2372_v60 = vmul.f32 %v2368_v51, %v2368_v51  ;;  %v2374_v19 = vmul.f32 %v2370_v34, %v2370_v34 }
 0x33a   : > { %v2375_v4 = vadd.f32 %v2373_v16, %v2371_v0  ;;  %v2382_v38 = vadd.f32 %v2374_v19, %v2372_v60 }
 0x33c   : > { %v2376_v6 = vrot.slane %v2375_v4, 4  ;;  %v2383_v56 = vrot.slane %v2382_v38, 4 }
 0x33e   : > { %v2377_v3 = vadd.f32 %v2376_v6, %v2375_v4  ;;  %v2384_v53 = vadd.f32 %v2383_v56, %v2382_v38 }
 0x340   : > { %v2378_v18 = vrot.slane %v2377_v3, 2  ;;  %v2385_v55 = vrot.slane %v2384_v53, 2 }
 0x342   : > { %v2379_v36 = vadd.f32 %v2378_v18, %v2377_v3  ;;  %v2386_v7 = vadd.f32 %v2385_v55, %v2384_v53 }
 0x344   : > { %v2380_v8 = vrot.slane %v2379_v36, 1  ;;  %v2387_v35 = vrot.slane %v2386_v7, 1 }
 0x346   : > { %v2381_v58 = vadd.f32 %v2380_v8, %v2379_v36  ;;  %v2388_v57 = vadd.f32 %v2387_v35, %v2386_v7  ;;  %v2446_v36 = vpop.permute.xlu0 %2445  ;;  %v2436_v35 = vpop.permute.xlu2 %2435 }
 0x348   : > { %v2389_v44 = vmul.f32 0.0625, %v2381_v58  ;;  %v2390_v43 = vmul.f32 0.0625, %v2388_v57 }
 0x34a   : > { %v2391_v41 = vadd.f32 1e-06, %v2389_v44  ;;  %v2392_v59 = vadd.f32 1e-06, %v2390_v43 }
 0x34c   : > { %3071 = vrsqrt.f32 %v2391_v41  ;;  %vm2399_vm10 = vweird.f32 %v2391_v41  ;;  %vm2409_vm2 = vweird.f32 %v2392_v59 }
 0x34d   : > { %3073 = vrsqrt.f32 %v2392_v59 }
 0x352   : > { %v3072_v24 = vpop.eup %3071 }
 0x353   : > { %v3074_v33 = vpop.eup %3073  ;;  %v2394_v20 = vmul.f32 %v3072_v24, %v2391_v41  ;;  %vm2400_vm15 = vweird.f32 %v3072_v24 }
 0x354   : > { %v2404_v47 = vmul.f32 %v3074_v33, %v2392_v59  ;;  %vm2410_vm11 = vweird.f32 %v3074_v33  ;;  %vm2401_vm9 = vmor %vm2399_vm10, %vm2400_vm15 }
 0x355   : > { %v2395_v22 = vmul.f32 %v3072_v24, %v2394_v20  ;;  %vm2411_vm14 = vmor %vm2409_vm2, %vm2410_vm11 }
 0x356   : > { %v2405_v29 = vmul.f32 %v3074_v33, %v2404_v47 }
 0x357   : > { %v2396_v15 = vmul.f32 0.5, %v2395_v22 }
 0x358   : > { %v2406_v25 = vmul.f32 0.5, %v2405_v29 }
 0x359   : > { %v2397_v9 = vsub.f32 1.5, %v2396_v15 }
 0x35a   : > { %v2407_v10 = vsub.f32 1.5, %v2406_v25 }
 0x35b   : > { %v2398_v2 = vmul.f32 %v3072_v24, %v2397_v9 }
 0x35c   : > { %v2408_v23 = vmul.f32 %v3074_v33, %v2407_v10 }
 0x35d   : > { %v2402_v52 = vsel %vm2401_vm9, %v3072_v24, %v2398_v2 }
 0x35e   : > { %v2415_v21 = vmul.f32 %v2402_v52, %v2369_v13  ;;  %v2412_v46 = vsel %vm2411_vm14, %v3074_v33, %v2408_v23  ;;  %v2413_v1 = vmul.f32 %v2402_v52, %v2367_v50 }
 0x35f   : > { %v2416_v26 = vmul.f32 %v2412_v46, %v2370_v34  ;;  %v2414_v12 = vmul.f32 %v2412_v46, %v2368_v51  ;;  %v5646_v51 = vpop.permute.xlu1 %2455 }
 0x360   : > { %2512 = vmatpush.msra.mxu0 %v2415_v21  ;;  %2988 = vmatpush.msra.mxu2 %v2415_v21 }
 0x361   : > { %2553 = vmatpush.msra.mxu1 %v2416_v26  ;;  %2990 = vmatpush.msra.mxu3 %v2416_v26 }
 0x362   : > { %2513 = vmatpush.msra.mxu0 %v2413_v1  ;;  %2989 = vmatpush.msra.mxu2 %v2413_v1 }
 0x363   : > { %2554 = vmatpush.msra.mxu1 %v2414_v12  ;;  %2991 = vmatpush.msra.mxu3 %v2414_v12 }
 0x364   : > { %2963 = vmatmul.msk.f32.vlgmr.msra.gmra.mxu0 %vm2473_vm8, %v2417_v61  ;;  %2969 = vmatmul.msk.f32.vlgmr.msra.gmra.mxu2 %vm2473_vm8, %v2423_v62 }
 0x365   : > { %2971 = vmatmul.msk.f32.vlgmr.msra.gmra.mxu1 %vm2473_vm8, %v2417_v61  ;;  %2976 = vmatmul.msk.f32.vlgmr.msra.gmra.mxu3 %vm2473_vm8, %v2422_v49 }
 0x367   : > { %v2441_v44 = vpop.permute.xlu1 %2440 }
 0x36c   : > { %2964 = vmatmul.msk.f32.gmra.mxu0 %vm2473_vm8, %v2418_v42  ;;  %2970 = vmatmul.msk.f32.gmra.mxu2 %vm2473_vm8, %v2424_v54 }
 0x36d   : > { %2972 = vmatmul.msk.f32.gmra.mxu1 %vm2473_vm8, %v2418_v42  ;;  %2977 = vmatmul.msk.f32.gmra.mxu3 %vm2473_vm8, %v2423_v62 }
 0x374   : > { %2965 = vmatmul.msk.f32.gmra.mxu0 %vm2473_vm8, %v2419_v32 }
 0x375   : > { %2973 = vmatmul.msk.f32.gmra.mxu1 %vm2473_vm8, %v2419_v32  ;;  %2978 = vmatmul.msk.f32.gmra.mxu3 %vm2473_vm8, %v2424_v54 }
 0x37c   : > { %2966 = vmatmul.msk.f32.gmra.mxu0 %vm2473_vm8, %v2420_v63 }
 0x37d   : > { %2974 = vmatmul.msk.f32.gmra.mxu1 %vm2473_vm8, %v2420_v63 }
 0x384   : > { %2967 = vmatmul.msk.f32.gmra.mxu0 %vm2473_vm8, %v2421_v14 }
 0x385   : > { %2975 = vmatmul.msk.f32.gmra.mxu1 %vm2473_vm8, %v2421_v14 }
 0x38c   : > { %2968 = vmatmul.msk.f32.gmra.mxu0 %vm2473_vm8, %v2422_v49 }
 0x3e1   : > { %v2515_v45 = vpop.f32.mrf.mxu0 }
 0x3e2   : > { %v2556_v48 = vpop.f32.mrf.mxu1  ;;  %v5665_v29 = vadd.f32 %v2515_v45, %v2436_v35 }
 0x3e3   : > { %v5659_v43 = vadd.f32 %v2556_v48, %v2436_v35 }
 0x3e4   : > { %v2596_v62 = vmul.f32 %v5665_v29, %v5665_v29 }
 0x3e5   : > { %v2597_v10 = vmul.f32 %v5659_v43, %v5659_v43 }
 0x3e7   : > { %v2533_v11 = vpop.f32.mrf.mxu2  ;;  %v2613_v32 = vmul.f32 %v2597_v10, %v5659_v43 }
 0x3e8   : > { %v5636_v39 = vadd.f32 %v2533_v11, %v2466_v37  ;;  %v2571_v5 = vpop.f32.mrf.mxu3 }
 0x3e9   : > { %v2518_v31 = vpop.f32.mrf.mxu0  ;;  %v5644_v13 = vadd.f32 %v2571_v5, %v5640_v28  ;;  %v2629_v35 = vmul.f32 0.044715, %v2613_v32 }
 0x3ea   : > { %v2608_v27 = vmul.f32 %v5636_v39, %v5636_v39  ;;  %v2559_v30 = vpop.f32.mrf.mxu1  ;;  %v5681_v1 = vadd.f32 %v2518_v31, %v2441_v44 }
 0x3eb   : > { %v2607_v16 = vmul.f32 %v5644_v13, %v5644_v13  ;;  %v5661_v59 = vadd.f32 %v2559_v30, %v2441_v44 }
 0x3ec   : > { %v2624_v50 = vmul.f32 %v2608_v27, %v5636_v39  ;;  %v2598_v5 = vmul.f32 %v5681_v1, %v5681_v1 }
 0x3ed   : > { %v2623_v18 = vmul.f32 %v2607_v16, %v5644_v13  ;;  %v2599_v21 = vmul.f32 %v5661_v59, %v5661_v59 }
 0x3ee   : > { %v2640_v34 = vmul.f32 0.044715, %v2624_v50 }
 0x3ef   : > { %v2536_v0 = vpop.f32.mrf.mxu2  ;;  %v2639_v20 = vmul.f32 0.044715, %v2623_v18 }
 0x3f0   : > { %v2537_v60 = vadd.f32 %v2536_v0, %v2471_v40  ;;  %v2574_v19 = vpop.f32.mrf.mxu3  ;;  %v2656_v6 = vadd.f32 %v2640_v34, %v5636_v39 }
 0x3f1   : > { %v5650_v4 = vadd.f32 %v2574_v19, %v2466_v37  ;;  %v2521_v38 = vpop.f32.mrf.mxu0  ;;  %v2655_v26 = vadd.f32 %v2639_v20, %v5644_v13  ;;  %v2615_v37 = vmul.f32 %v2599_v21, %v5661_v59 }
 0x3f2   : > { %v2610_v56 = vmul.f32 %v2537_v60, %v2537_v60  ;;  %v2562_v3 = vpop.f32.mrf.mxu1  ;;  %v2672_v8 = vmul.f32 0.7978846, %v2656_v6  ;;  %v5688_v49 = vadd.f32 %v2521_v38, %v2446_v36  ;;  %v2594_v27 = vmul.f32 0.5, %v2537_v60 }
 0x3f3   : > { %v2609_v53 = vmul.f32 %v5650_v4, %v5650_v4  ;;  %v5657_v58 = vadd.f32 %v2562_v3, %v2446_v36  ;;  %v2671_v11 = vmul.f32 0.7978846, %v2655_v26  ;;  %v2645_v26 = vadd.f32 %v2629_v35, %v5659_v43 }
 0x3f4   : > { %v2626_v55 = vmul.f32 %v2610_v56, %v2537_v60  ;;  %3075 = vtanh.f32 %v2672_v8  ;;  %v2600_v34 = vmul.f32 %v5688_v49, %v5688_v49 }
 0x3f5   : > { %v2625_v7 = vmul.f32 %v2609_v53, %v5650_v4  ;;  %v2601_v15 = vmul.f32 %v5657_v58, %v5657_v58  ;;  %v2631_v53 = vmul.f32 0.044715, %v2615_v37 }
 0x3f6   : > { %v2642_v57 = vmul.f32 0.044715, %v2626_v55 }
 0x3f7   : > { %v2641_v41 = vmul.f32 0.044715, %v2625_v7  ;;  %v2617_v42 = vmul.f32 %v2601_v15, %v5657_v58 }
 0x3f8   : > { %v2577_v24 = vpop.f32.mrf.mxu3  ;;  %v2658_v33 = vadd.f32 %v2642_v57, %v2537_v60  ;;  %v2616_v57 = vmul.f32 %v2600_v34, %v5688_v49 }
 0x3f9   : > { %v5663_v47 = vadd.f32 %v2577_v24, %v2471_v40  ;;  %v2524_v22 = vpop.f32.mrf.mxu0  ;;  %v2657_v52 = vadd.f32 %v2641_v41, %v5650_v4  ;;  %v2592_v40 = vmul.f32 0.5, %v5636_v39  ;;  %v2633_v38 = vmul.f32 0.044715, %v2617_v42 }
 0x3fa   : > { %v2565_v25 = vpop.f32.mrf.mxu1  ;;  %v2674_v9 = vmul.f32 0.7978846, %v2658_v33  ;;  %v5678_v46 = vadd.f32 %v2524_v22, %v2451_v17  ;;  %v3076_v54 = vpop.eup %3075  ;;  %v2612_v24 = vmul.f32 %v2596_v62, %v5665_v29  ;;  %v2593_v42 = vmul.f32 0.5, %v5650_v4 }
 0x3fb   : > { %v2611_v2 = vmul.f32 %v5663_v47, %v5663_v47  ;;  %v5673_v23 = vadd.f32 %v2565_v25, %v2451_v17  ;;  %v2673_v45 = vmul.f32 0.7978846, %v2657_v52  ;;  %v2704_v19 = vadd.f32 1.0, %v3076_v54 }
 0x3fc   : > { %3077 = vtanh.f32 %v2674_v9  ;;  %v2602_v48 = vmul.f32 %v5678_v46, %v5678_v46  ;;  %v2649_v8 = vadd.f32 %v2633_v38, %v5657_v58  ;;  %v2647_v9 = vadd.f32 %v2631_v53, %v5661_v59 }
 0x3fd   : > { %v2627_v12 = vmul.f32 %v2611_v2, %v5663_v47  ;;  %v2603_v61 = vmul.f32 %v5673_v23, %v5673_v23  ;;  %3079 = vtanh.f32 %v2673_v45  ;;  %v2720_v41 = vmul.f32 %v2704_v19, %v2592_v40 }
 0x3fe   : > { %v2618_v60 = vmul.f32 %v2602_v48, %v5678_v46  ;;  %3081 = vtanh.f32 %v2671_v11  ;;  %v2665_v21 = vmul.f32 0.7978846, %v2649_v8  ;;  %v2595_v62 = vmul.f32 0.5, %v5663_v47 }
 0x3ff   : > { %v2619_v63 = vmul.f32 %v2603_v61, %v5673_v23  ;;  %v2643_v14 = vmul.f32 0.044715, %v2627_v12  ;;  %v2632_v32 = vmul.f32 0.044715, %v2616_v57  ;;  %v2663_v48 = vmul.f32 0.7978846, %v2647_v9 }
 0x400   : > { %v2634_v10 = vmul.f32 0.044715, %v2618_v60  ;;  %v2591_v4 = vmul.f32 0.5, %v5644_v13 }
 0x401   : > { %v2527_v31 = vpop.f32.mrf.mxu0  ;;  %v2659_v30 = vadd.f32 %v2643_v14, %v5663_v47  ;;  %v2635_v17 = vmul.f32 0.044715, %v2619_v63  ;;  %v2648_v34 = vadd.f32 %v2632_v32, %v5688_v49 }
 0x402   : > { %v3078_v50 = vpop.eup %3077  ;;  %v5703_v0 = vadd.f32 %v2527_v31, %v5646_v51  ;;  %v2568_v16 = vpop.f32.mrf.mxu1  ;;  %v2650_v40 = vadd.f32 %v2634_v10, %v5678_v46  ;;  %v2661_v31 = vmul.f32 0.7978846, %v2645_v26  ;;  %v2583_v10 = vmul.f32 0.5, %v5661_v59  ;;  %v2724_v59 = vld [vmem:[%s5780_s10] sm:$0xff] }
 0x403   : > { %v5706_v39 = vadd.f32 %v2568_v16, %v5646_v51  ;;  %v2706_v6 = vadd.f32 1.0, %v3078_v50  ;;  %v2675_v56 = vmul.f32 0.7978846, %v2659_v30  ;;  %v2651_v36 = vadd.f32 %v2635_v17, %v5673_v23  ;;  %v3080_v20 = vpop.eup %3079 }
 0x404   : > { %v2604_v3 = vmul.f32 %v5703_v0, %v5703_v0  ;;  %v2614_v51 = vmul.f32 %v2598_v5, %v5681_v1  ;;  %v3082_v2 = vpop.eup %3081  ;;  %v2705_v45 = vadd.f32 1.0, %v3080_v20  ;;  %v2666_v16 = vmul.f32 0.7978846, %v2650_v40 }
 0x405   : > { %v2605_v18 = vmul.f32 %v5706_v39, %v5706_v39  ;;  %v2722_v55 = vmul.f32 %v2706_v6, %v2594_v27  ;;  %3083 = vtanh.f32 %v2675_v56  ;;  %v2667_v25 = vmul.f32 0.7978846, %v2651_v36 }
 0x406   : > { %v2620_v7 = vmul.f32 %v2604_v3, %v5703_v0  ;;  %v2630_v12 = vmul.f32 0.044715, %v2614_v51  ;;  %v2703_v5 = vadd.f32 1.0, %v3082_v2  ;;  %v2628_v27 = vmul.f32 0.044715, %v2612_v24 }
 0x407   : > { %v2621_v44 = vmul.f32 %v2605_v18, %v5706_v39  ;;  %2753 = vmatpush.msrb.mxu2 %v2722_v55  ;;  %3085 = vtanh.f32 %v2667_v25  ;;  %v2721_v30 = vmul.f32 %v2705_v45, %v2593_v42  ;;  %v2664_v53 = vmul.f32 0.7978846, %v2648_v34 }
 0x408   : > { %v2636_v33 = vmul.f32 0.044715, %v2620_v7  ;;  %3087 = vtanh.f32 %v2665_v21  ;;  %v2646_v19 = vadd.f32 %v2630_v12, %v5681_v1  ;;  %v2719_v38 = vmul.f32 %v2703_v5, %v2591_v4  ;;  %v2725_v5 = vld [vmem:[%s5780_s10 + $0x8] sm:$0xff] }
 0x409   : > { %v2530_v22 = vpop.f32.mrf.mxu0  ;;  %2754 = vmatpush.msrb.mxu2 %v2720_v41  ;;  %v2637_v15 = vmul.f32 0.044715, %v2621_v44  ;;  %v2644_v13 = vadd.f32 %v2628_v27, %v5665_v29  ;;  %v2589_v36 = vmul.f32 0.5, %v5706_v39  ;;  %v2587_v44 = vmul.f32 0.5, %v5673_v23 }
 0x40a   : > { %v5722_v52 = vadd.f32 %v2530_v22, %v5640_v28  ;;  %v2652_v28 = vadd.f32 %v2636_v33, %v5703_v0  ;;  %v2662_v55 = vmul.f32 0.7978846, %v2646_v19  ;;  %v2585_v22 = vmul.f32 0.5, %v5657_v58  ;;  %v3110_v19 = vld [vmem:[%s3617_s18 + $0x18] sm:$0xff] }
 0x40b   : > { %v3084_v61 = vpop.eup %3083  ;;  %v2653_v54 = vadd.f32 %v2637_v15, %v5706_v39  ;;  %v2660_v35 = vmul.f32 0.7978846, %v2644_v13  ;;  %v2588_v42 = vmul.f32 0.5, %v5703_v0  ;;  %v2584_v0 = vmul.f32 0.5, %v5688_v49 }
 0x40c   : > { %v2606_v63 = vmul.f32 %v5722_v52, %v5722_v52  ;;  %v2707_v14 = vadd.f32 1.0, %v3084_v61  ;;  %v2668_v50 = vmul.f32 0.7978846, %v2652_v28  ;;  %v2590_v23 = vmul.f32 0.5, %v5722_v52 }
 0x40d   : > { %v2669_v37 = vmul.f32 0.7978846, %v2653_v54  ;;  %v3086_v56 = vpop.eup %3085  ;;  %v2582_v40 = vmul.f32 0.5, %v5681_v1  ;;  %v2731_v1 = vpop.permute.xlu0 %2730 }
 0x40e   : > { %v2622_v11 = vmul.f32 %v2606_v63, %v5722_v52  ;;  %v2723_v47 = vmul.f32 %v2707_v14, %v2595_v62  ;;  %v3088_v60 = vpop.eup %3087  ;;  %v2699_v7 = vadd.f32 1.0, %v3086_v56  ;;  %v2581_v62 = vmul.f32 0.5, %v5659_v43 }
 0x40f   : > { %3089 = vtanh.f32 %v2669_v37  ;;  %v2697_v41 = vadd.f32 1.0, %v3088_v60  ;;  %v2586_v14 = vmul.f32 0.5, %v5678_v46  ;;  %v2580_v46 = vmul.f32 0.5, %v5665_v29  ;;  %v3109_v29 = vld [vmem:[%s3277_s14 + $0x8] sm:$0xff] }
 0x410   : > { %2776 = vmatpush.msrb.mxu3 %v2723_v47  ;;  %v2638_v17 = vmul.f32 0.044715, %v2622_v11  ;;  %3091 = vtanh.f32 %v2663_v48  ;;  %v2715_v20 = vmul.f32 %v2699_v7, %v2587_v44 }
 0x411   : > { %3093 = vtanh.f32 %v2661_v31  ;;  %v2713_v9 = vmul.f32 %v2697_v41, %v2585_v22 }
 0x412   : > { %2777 = vmatpush.msrb.mxu3 %v2721_v30  ;;  %v2654_v6 = vadd.f32 %v2638_v17, %v5722_v52  ;;  %3095 = vtanh.f32 %v2668_v50  ;;  %v2736_v30 = vpop.permute.xlu1 %2735 }
 0x413   : > { %3097 = vtanh.f32 %v2666_v16 }
 0x414   : > { %2778 = vmatpush.msrb.mxu3 %v2719_v38  ;;  %v2670_v3 = vmul.f32 0.7978846, %v2654_v6  ;;  %v3111_v6 = vld [vmem:[%s3277_s14] sm:$0xff] }
 0x415   : > { %v3090_v18 = vpop.eup %3089 }
 0x416   : > { %v2701_v51 = vadd.f32 1.0, %v3090_v18  ;;  %3099 = vtanh.f32 %v2670_v3  ;;  %v3092_v8 = vpop.eup %3091  ;;  %v3112_v3 = vld [vmem:[%s3617_s18 + $0x10] sm:$0xff] }
 0x417   : > { %3101 = vtanh.f32 %v2664_v53  ;;  %v3094_v24 = vpop.eup %3093  ;;  %v2695_v15 = vadd.f32 1.0, %v3092_v8 }
 0x418   : > { %v2717_v57 = vmul.f32 %v2701_v51, %v2589_v36  ;;  %v3096_v33 = vpop.eup %3095  ;;  %3103 = vtanh.f32 %v2662_v55  ;;  %v2693_v2 = vadd.f32 1.0, %v3094_v24 }
 0x419   : > { %v3098_v25 = vpop.eup %3097  ;;  %3105 = vtanh.f32 %v2660_v35  ;;  %v2700_v26 = vadd.f32 1.0, %v3096_v33  ;;  %v2711_v61 = vmul.f32 %v2695_v15, %v2583_v10 }
 0x41a   : > { %2779 = vmatpush.msrb.mxu3 %v2717_v57  ;;  %v2698_v54 = vadd.f32 1.0, %v3098_v25  ;;  %v2709_v63 = vmul.f32 %v2693_v2, %v2581_v62 }
 0x41b   : > { %v2716_v52 = vmul.f32 %v2700_v26, %v2588_v42 }
 0x41c   : > { %v3100_v39 = vpop.eup %3099  ;;  %2780 = vmatpush.msrb.mxu3 %v2715_v20  ;;  %v2714_v43 = vmul.f32 %v2698_v54, %v2586_v14 }
 0x41d   : > { %v2702_v21 = vadd.f32 1.0, %v3100_v39  ;;  %v3102_v12 = vpop.eup %3101 }
 0x41e   : > { %2781 = vmatpush.msrb.mxu3 %v2713_v9  ;;  %v3104_v32 = vpop.eup %3103  ;;  %v2696_v45 = vadd.f32 1.0, %v3102_v12 }
 0x41f   : > { %v2718_v58 = vmul.f32 %v2702_v21, %v2590_v23  ;;  %v3106_v28 = vpop.eup %3105  ;;  %v2694_v37 = vadd.f32 1.0, %v3104_v32 }
 0x420   : > { %2782 = vmatpush.msrb.mxu3 %v2711_v61  ;;  %v2712_v48 = vmul.f32 %v2696_v45, %v2584_v0  ;;  %v2692_v11 = vadd.f32 1.0, %v3106_v28 }
 0x421   : > { %2755 = vmatpush.msrb.mxu2 %v2718_v58  ;;  %v2710_v47 = vmul.f32 %v2694_v37, %v2582_v40 }
 0x422   : > { %2783 = vmatpush.msrb.mxu3 %v2709_v63  ;;  %v2708_v4 = vmul.f32 %v2692_v11, %v2580_v46 }
 0x423   : > { %2981 = vmatmul.msk.f32.vlgmr.msrb.gmra.mxu3 %vm2738_vm1, %v2724_v59  ;;  %2756 = vmatpush.msrb.mxu2 %v2716_v52 }
 0x425   : > { %2757 = vmatpush.msrb.mxu2 %v2714_v43 }
 0x427   : > { %2758 = vmatpush.msrb.mxu2 %v2712_v48 }
 0x429   : > { %2759 = vmatpush.msrb.mxu2 %v2710_v47 }
 0x42b   : > { %2982 = vmatmul.msk.f32.gmra.mxu3 %vm2738_vm1, %v2725_v5  ;;  %2760 = vmatpush.msrb.mxu2 %v2708_v4 }
 0x42c   : > { %2979 = vmatmul.msk.f32.vlgmr.msrb.gmra.mxu2 %vm2738_vm1, %v2724_v59 }
 0x434   : > { %2980 = vmatmul.msk.f32.gmra.mxu2 %vm2738_vm1, %v2725_v5 }
 0x4a6   : > { %v2785_v49 = vpop.f32.mrf.mxu3 }
 0x4a7   : > { %v2786_v31 = vadd.f32 %v2785_v49, %v2731_v1 }
 0x4a9   : > { %v2792_v27 = vadd.f32 %v3109_v29, %v2786_v31 }
 0x4ab   : > { %2796 = vst [vmem:[%s436_s23 + $0x8] sm:$0xff] %v2792_v27 }
 0x4ae   : > { %v2788_v17 = vpop.f32.mrf.mxu3 }
 0x4af   : > { %v2789_v50 = vadd.f32 %v2788_v17, %v2736_v30  ;;  %v2762_v34 = vpop.f32.mrf.mxu2 }
 0x4b0   : > { %v2763_v16 = vadd.f32 %v2762_v34, %v2731_v1 }
 0x4b1   : > { %v2794_v38 = vadd.f32 %v3110_v19, %v2789_v50 }
 0x4b2   : > { %v2791_v56 = vadd.f32 %v3111_v6, %v2763_v16 }
 0x4b3   : > { %2798 = vst [vmem:[%s436_s23 + $0x18] sm:$0xff] %v2794_v38 }
 0x4b4   : > { %2795 = vst [vmem:[%s436_s23] sm:$0xff] %v2791_v56 }
 0x4b7   : > { %v2765_v13 = vpop.f32.mrf.mxu2 }
 0x4b8   : > { %v2766_v60 = vadd.f32 %v2765_v13, %v2736_v30 }
 0x4ba   : > { %v2793_v53 = vadd.f32 %v3112_v3, %v2766_v60 }
 0x4bc   : > { %2797 = vst [vmem:[%s436_s23 + $0x10] sm:$0xff] %v2793_v53 }
 0x4bd PF: > { %s22_s21 = sadd.s32 1, %s3119_s21  }
 0x4be   : > { %p19_p4 = scmp.ge.s32.totalorder %s22_s21, 4  }
 0x4c0   :  { %21 = sbr.rel (!%p19_p4) target bundleno = 1 (0x1), region = 179 }

</bundles_post_ra>
